<compile_context>
chip_gen: v7x
topology: tpu7x:2x2x1
jax: 0.10.0
libtpu: 0.0.40
codegen_flags: <defaults>
</compile_context>

<pallas_src>
import jax
import jax.numpy as jnp
from jax import lax
from jax.experimental import pallas as pl
from jax.experimental.pallas import tpu as pltpu


def _round_up(n, m):
    return ((n + m - 1) // m) * m


def _affine_kernel(data_ref, w6_ref, b6_ref, g2_ref, sy_ref, maskx_ref, out_ref):
    d = data_ref[...]                                     # [TBP, P*C]

    hi = lax.Precision.HIGHEST

    def dot(a, b):
        return jnp.dot(a, b, precision=hi, preferred_element_type=jnp.float32)

    # Gather the lane-packed x / y halves (exact 0/1 matmuls).
    x = dot(d, g2_ref[0])                                 # [TBP, P*H]
    y = dot(d, g2_ref[1])                                 # [TBP, P*H]

    relu = lambda v: jnp.maximum(v, 0.0)

    def lin(h, k):
        # block-diagonal kron(I_P, W_k) weight + lane-tiled bias
        return dot(h, w6_ref[k]) + b6_ref[k]

    # --- compute_nets(x): two pre-activation residual blocks + two heads ---
    prex = x
    h = relu(x)
    h = lin(h, 0)            # lina
    h = relu(h)
    h = lin(h, 1)            # linb
    h = h + prex

    prex = h
    h = relu(h)
    h = lin(h, 2)            # linc
    h = relu(h)
    h = lin(h, 3)            # lind
    h = h + prex

    h = relu(h)
    m = lin(h, 4)            # mults, `ms` pre-folded into W6[4]/b6[4]
    a = lin(h, 5)            # adds

    y_new = y * jnp.exp(m) + a                            # [TBP, P*H]

    # Full-width output: pass x lanes through, scatter y_new into y lanes.
    out_ref[...] = d * maskx_ref[...] + dot(y_new, sy_ref[...])


def _pack_constants(params, H, P, dtype=jnp.float32):
    """Fold the 13 parameters into 5 lane-packed constant operands."""
    C = 2 * H
    PH, PC = P * H, P * C

    # Fold ms into the `mults` head: (h@Wm + bm)*ms == h@(Wm*ms) + bm*ms.
    wm_eff = params["wm"] * params["ms"][None, :]
    bm_eff = params["bm"] * params["ms"]

    w_stack = jnp.stack([params["wa"], params["wb"], params["wc"],
                         params["wd"], wm_eff, params["wad"]]).astype(dtype)   # [6,H,H]
    b_stack = jnp.stack([params["ba"], params["bb"], params["bc"],
                         params["bd"], bm_eff, params["bad"]]).astype(dtype)   # [6,H]

    # Block-diagonal kron(I_P, W_k): element [k, p*H+a, q*H+b] = eye[p,q]*W[k,a,b]
    eye_p = jnp.eye(P, dtype=dtype)
    w6 = (eye_p[None, :, None, :, None] * w_stack[:, None, :, None, :]
          ).reshape(6, PH, PH)
    b6 = jnp.tile(b_stack, (1, P)).reshape(6, 1, PH)

    # Gather/scatter between the packed full-width [.., P*C] and half-width
    # [.., P*H] layouts (exact 0/1 matrices).
    lane = jnp.arange(PC)
    grp = lane // C
    ch = lane % C
    colh = jnp.arange(PH)
    gx = ((ch[:, None] < H) &
          (colh[None, :] == grp[:, None] * H + ch[:, None])).astype(dtype)
    gy = ((ch[:, None] >= H) &
          (colh[None, :] == grp[:, None] * H + (ch[:, None] - H))).astype(dtype)
    g2 = jnp.stack([gx, gy])                        # [2, PC, PH]
    sy = gy.T                                       # [PH, PC]
    maskx = (ch < H).astype(dtype).reshape(1, PC)   # [1, PC]
    return w6, b6, g2, sy, maskx


def affine_forward(data, params, *, block_b=16384):
    """data: [B, C] float32.  params: dict with wa..wad ([in,out]=[H,H]),
    ba..bad ([H]), ms ([H]).  block_b: batch tile in ORIGINAL rows; tune per
    generation (v5e/v6e can go much higher, v7x keep packed tiles under the
    64 MiB VMEM budget)."""
    B, C = data.shape
    assert C % 2 == 0, "channels must be even"
    H = C // 2
    # Lane-pack factor: P original rows per 128-lane group (P=8 at H=16).
    P = 128 // H if (H <= 128 and 128 % H == 0) else 1

    data = data.astype(jnp.float32)

    # Pad only to a multiple of P (at most P-1 rows); reshape is then free.
    B_pad = _round_up(B, P)
    if B_pad != B:
        data = jnp.pad(data, ((0, B_pad - B), (0, 0)))
    rows_p = B_pad // P
    data_p = data.reshape(rows_p, P * C)

    w6, b6, g2, sy, maskx = _pack_constants(params, H, P)

    # Packed-row tile size: sublane aligned, capped so v7x's 2 TensorCores
    # both get work whenever there are enough rows; partial trailing tile OK.
    tbp = max(1, block_b // P)
    if rows_p > 8:
        tbp = min(tbp, _round_up(pl.cdiv(rows_p, 2), 8))
    if tbp >= rows_p:
        tbp = rows_p
    else:
        tbp = _round_up(tbp, 8)
        if tbp >= rows_p:
            tbp = rows_p
    grid = (pl.cdiv(rows_p, tbp),)

    PC, PH = P * C, P * H
    batch_spec = pl.BlockSpec((tbp, PC), lambda i: (i, 0))
    in_specs = [
        batch_spec,
        pl.BlockSpec(w6.shape, lambda i: (0, 0, 0)),
        pl.BlockSpec(b6.shape, lambda i: (0, 0, 0)),
        pl.BlockSpec(g2.shape, lambda i: (0, 0, 0)),
        pl.BlockSpec(sy.shape, lambda i: (0, 0)),
        pl.BlockSpec(maskx.shape, lambda i: (0, 0)),
    ]

    out_p = pl.pallas_call(
        _affine_kernel,
        out_shape=jax.ShapeDtypeStruct((rows_p, PC), jnp.float32),
        grid=grid,
        in_specs=in_specs,
        out_specs=batch_spec,
        compiler_params=pltpu.CompilerParams(
            dimension_semantics=("parallel",),
            vmem_limit_bytes=48 * 1024 * 1024),
    )(data_p, w6, b6, g2, sy, maskx)

    out = out_p.reshape(B_pad, C)
    if B_pad != B:
        out = out[:B]
    return out


def affine_forward_ref(data, params):
    """Pure-JAX reference matching the PyTorch module (f32, HIGHEST precision)."""
    H = data.shape[1] // 2
    x = data[:, :H]
    y = data[:, H:]
    relu = lambda v: jnp.maximum(v, 0.0)
    hi = lax.Precision.HIGHEST
    lin = lambda h, w, b: jnp.dot(h, w, precision=hi) + b

    prex = x
    h = relu(x)
    h = lin(h, params["wa"], params["ba"])
    h = relu(h)
    h = lin(h, params["wb"], params["bb"])
    h = h + prex
    prex = h
    h = relu(h)
    h = lin(h, params["wc"], params["bc"])
    h = relu(h)
    h = lin(h, params["wd"], params["bd"])
    h = h + prex
    h = relu(h)
    m = lin(h, params["wm"], params["bm"]) * params["ms"]
    a = lin(h, params["wad"], params["bad"])
    return jnp.concatenate([x, y * jnp.exp(m) + a], axis=1)


def make_params(key, channels):
    """Deterministic synthetic params. PyTorch Linear weight is [out,in]; we
    store the transposed [in,out] so the kernel does h @ W. Note: the PyTorch
    module initializes `ms` to zeros (m == 0); small random values here
    exercise the exp path."""
    H = channels // 2
    keys = jax.random.split(key, 13)
    scale = 1.0 / jnp.sqrt(H)

    def w(k):
        return jax.random.uniform(k, (H, H), jnp.float32, -scale, scale)

    def b(k):
        return jax.random.uniform(k, (H,), jnp.float32, -scale, scale)

    return {
        "wa": w(keys[0]), "ba": b(keys[1]),
        "wb": w(keys[2]), "bb": b(keys[3]),
        "wc": w(keys[4]), "bc": b(keys[5]),
        "wd": w(keys[6]), "bd": b(keys[7]),
        "wm": w(keys[8]), "bm": b(keys[9]),
        "wad": w(keys[10]), "bad": b(keys[11]),
        "ms": jax.random.normal(keys[12], (H,), jnp.float32) * 0.1,
    }


if __name__ == "__main__":
    channels = 32  # hparams['channels']; must be even

    key = jax.random.PRNGKey(0)
    k_a, k_params, k_b = jax.random.split(key, 3)
    params = make_params(k_params, channels)

    # Case 1: small batch not a multiple of the pack factor (pads 20 -> 24),
    # single grid step.
    data_a = jax.random.normal(k_a, (20, channels), jnp.float32)
    ref_a = affine_forward_ref(data_a, params)
    out_a = jax.block_until_ready(affine_forward(data_a, params))
    assert out_a.shape == data_a.shape
    assert jnp.allclose(out_a, ref_a, atol=1e-5, rtol=1e-5), "mismatch (case 1)"

    # Case 2: bigger batch with a tiny tile -> multi-step grid including a
    # partial trailing block (exercises pipelining + cdiv grid).
    data_b = jax.random.normal(k_b, (180, channels), jnp.float32)
    ref_b = affine_forward_ref(data_b, params)
    out_b = jax.block_until_ready(affine_forward(data_b, params, block_b=64))
    assert out_b.shape == data_b.shape
    assert jnp.allclose(out_b, ref_b, atol=1e-5, rtol=1e-5), "mismatch (case 2)"

    print("KERNEL_OK")
</pallas_src>

<mosaic_0001>
module attributes {stable_mosaic.version = 11 : i64} {
  func.func @_affine_kernel(%arg0: i32, %arg1: memref<3x256xf32, #tpu.memory_space<vmem>>, %arg2: memref<6x128x128xf32, #tpu.memory_space<vmem>>, %arg3: memref<6x1x128xf32, #tpu.memory_space<vmem>>, %arg4: memref<2x256x128xf32, #tpu.memory_space<vmem>>, %arg5: memref<128x256xf32, #tpu.memory_space<vmem>>, %arg6: memref<1x256xf32, #tpu.memory_space<vmem>>, %arg7: memref<3x256xf32, #tpu.memory_space<vmem>>) attributes {dimension_semantics = [#tpu.dimension_semantics<parallel>], iteration_bounds = array<i64: 1>, scalar_prefetch = 0 : i64, scratch_operands = 0 : i64, tpu.core_type = #tpu.core_type<tc>, window_params = [{transform_indices = @transform_0, window_bounds = array<i64: 3, 256>}, {pipeline_mode = #tpu.pipeline_mode<synchronous>, transform_indices = @transform_1, window_bounds = array<i64: 6, 128, 128>}, {pipeline_mode = #tpu.pipeline_mode<synchronous>, transform_indices = @transform_2, window_bounds = array<i64: 6, 1, 128>}, {pipeline_mode = #tpu.pipeline_mode<synchronous>, transform_indices = @transform_3, window_bounds = array<i64: 2, 256, 128>}, {pipeline_mode = #tpu.pipeline_mode<synchronous>, transform_indices = @transform_4, window_bounds = array<i64: 128, 256>}, {pipeline_mode = #tpu.pipeline_mode<synchronous>, transform_indices = @transform_5, window_bounds = array<i64: 1, 256>}, {transform_indices = @transform_6, window_bounds = array<i64: 3, 256>}]} {
    %c0 = arith.constant 0 : index
    %c0_0 = arith.constant 0 : index
    %0 = vector.load %arg1[%c0, %c0_0] : memref<3x256xf32, #tpu.memory_space<vmem>>, vector<3x256xf32>
    %c0_1 = arith.constant 0 : index
    %c0_2 = arith.constant 0 : index
    %c0_3 = arith.constant 0 : index
    %1 = vector.load %arg4[%c0_1, %c0_2, %c0_3] : memref<2x256x128xf32, #tpu.memory_space<vmem>>, vector<1x256x128xf32>
    %2 = vector.shape_cast %1 : vector<1x256x128xf32> to vector<256x128xf32>
    %cst = arith.constant dense<0.000000e+00> : vector<3x128xf32>
    %3 = tpu.matmul %0, %2, %cst {dimension_numbers = #tpu.dot_dimension_numbers<[1], [0], [0], [1], [0, 0, 1, 1], [], []>, precision = #tpu.contract_precision<fp32>} : vector<3x256xf32>, vector<256x128xf32>, vector<3x128xf32> -> vector<3x128xf32>
    %c1 = arith.constant 1 : index
    %c0_4 = arith.constant 0 : index
    %c0_5 = arith.constant 0 : index
    %4 = vector.load %arg4[%c1, %c0_4, %c0_5] : memref<2x256x128xf32, #tpu.memory_space<vmem>>, vector<1x256x128xf32>
    %5 = vector.shape_cast %4 : vector<1x256x128xf32> to vector<256x128xf32>
    %cst_6 = arith.constant dense<0.000000e+00> : vector<3x128xf32>
    %6 = tpu.matmul %0, %5, %cst_6 {dimension_numbers = #tpu.dot_dimension_numbers<[1], [0], [0], [1], [0, 0, 1, 1], [], []>, precision = #tpu.contract_precision<fp32>} : vector<3x256xf32>, vector<256x128xf32>, vector<3x128xf32> -> vector<3x128xf32>
    %cst_7 = arith.constant 0.000000e+00 : f32
    %7 = vector.broadcast %cst_7 : f32 to vector<3x128xf32>
    %8 = arith.maximumf %3, %7 : vector<3x128xf32>
    %c0_8 = arith.constant 0 : index
    %c0_9 = arith.constant 0 : index
    %c0_10 = arith.constant 0 : index
    %9 = vector.load %arg2[%c0_8, %c0_9, %c0_10] : memref<6x128x128xf32, #tpu.memory_space<vmem>>, vector<1x128x128xf32>
    %10 = vector.shape_cast %9 : vector<1x128x128xf32> to vector<128x128xf32>
    %cst_11 = arith.constant dense<0.000000e+00> : vector<3x128xf32>
    %11 = tpu.matmul %8, %10, %cst_11 {dimension_numbers = #tpu.dot_dimension_numbers<[1], [0], [0], [1], [0, 0, 1, 1], [], []>, precision = #tpu.contract_precision<fp32>} : vector<3x128xf32>, vector<128x128xf32>, vector<3x128xf32> -> vector<3x128xf32>
    %c0_12 = arith.constant 0 : index
    %c0_13 = arith.constant 0 : index
    %c0_14 = arith.constant 0 : index
    %12 = vector.load %arg3[%c0_12, %c0_13, %c0_14] : memref<6x1x128xf32, #tpu.memory_space<vmem>>, vector<1x1x128xf32>
    %13 = vector.shape_cast %12 : vector<1x1x128xf32> to vector<1x128xf32>
    %14 = vector.broadcast %13 : vector<1x128xf32> to vector<3x128xf32>
    %15 = arith.addf %11, %14 : vector<3x128xf32>
    %cst_15 = arith.constant 0.000000e+00 : f32
    %16 = vector.broadcast %cst_15 : f32 to vector<3x128xf32>
    %17 = arith.maximumf %15, %16 : vector<3x128xf32>
    %c1_16 = arith.constant 1 : index
    %c0_17 = arith.constant 0 : index
    %c0_18 = arith.constant 0 : index
    %18 = vector.load %arg2[%c1_16, %c0_17, %c0_18] : memref<6x128x128xf32, #tpu.memory_space<vmem>>, vector<1x128x128xf32>
    %19 = vector.shape_cast %18 : vector<1x128x128xf32> to vector<128x128xf32>
    %cst_19 = arith.constant dense<0.000000e+00> : vector<3x128xf32>
    %20 = tpu.matmul %17, %19, %cst_19 {dimension_numbers = #tpu.dot_dimension_numbers<[1], [0], [0], [1], [0, 0, 1, 1], [], []>, precision = #tpu.contract_precision<fp32>} : vector<3x128xf32>, vector<128x128xf32>, vector<3x128xf32> -> vector<3x128xf32>
    %c1_20 = arith.constant 1 : index
    %c0_21 = arith.constant 0 : index
    %c0_22 = arith.constant 0 : index
    %21 = vector.load %arg3[%c1_20, %c0_21, %c0_22] : memref<6x1x128xf32, #tpu.memory_space<vmem>>, vector<1x1x128xf32>
    %22 = vector.shape_cast %21 : vector<1x1x128xf32> to vector<1x128xf32>
    %23 = vector.broadcast %22 : vector<1x128xf32> to vector<3x128xf32>
    %24 = arith.addf %20, %23 : vector<3x128xf32>
    %25 = arith.addf %24, %3 : vector<3x128xf32>
    %cst_23 = arith.constant 0.000000e+00 : f32
    %26 = vector.broadcast %cst_23 : f32 to vector<3x128xf32>
    %27 = arith.maximumf %25, %26 : vector<3x128xf32>
    %c2 = arith.constant 2 : index
    %c0_24 = arith.constant 0 : index
    %c0_25 = arith.constant 0 : index
    %28 = vector.load %arg2[%c2, %c0_24, %c0_25] : memref<6x128x128xf32, #tpu.memory_space<vmem>>, vector<1x128x128xf32>
    %29 = vector.shape_cast %28 : vector<1x128x128xf32> to vector<128x128xf32>
    %cst_26 = arith.constant dense<0.000000e+00> : vector<3x128xf32>
    %30 = tpu.matmul %27, %29, %cst_26 {dimension_numbers = #tpu.dot_dimension_numbers<[1], [0], [0], [1], [0, 0, 1, 1], [], []>, precision = #tpu.contract_precision<fp32>} : vector<3x128xf32>, vector<128x128xf32>, vector<3x128xf32> -> vector<3x128xf32>
    %c2_27 = arith.constant 2 : index
    %c0_28 = arith.constant 0 : index
    %c0_29 = arith.constant 0 : index
    %31 = vector.load %arg3[%c2_27, %c0_28, %c0_29] : memref<6x1x128xf32, #tpu.memory_space<vmem>>, vector<1x1x128xf32>
    %32 = vector.shape_cast %31 : vector<1x1x128xf32> to vector<1x128xf32>
    %33 = vector.broadcast %32 : vector<1x128xf32> to vector<3x128xf32>
    %34 = arith.addf %30, %33 : vector<3x128xf32>
    %cst_30 = arith.constant 0.000000e+00 : f32
    %35 = vector.broadcast %cst_30 : f32 to vector<3x128xf32>
    %36 = arith.maximumf %34, %35 : vector<3x128xf32>
    %c3 = arith.constant 3 : index
    %c0_31 = arith.constant 0 : index
    %c0_32 = arith.constant 0 : index
    %37 = vector.load %arg2[%c3, %c0_31, %c0_32] : memref<6x128x128xf32, #tpu.memory_space<vmem>>, vector<1x128x128xf32>
    %38 = vector.shape_cast %37 : vector<1x128x128xf32> to vector<128x128xf32>
    %cst_33 = arith.constant dense<0.000000e+00> : vector<3x128xf32>
    %39 = tpu.matmul %36, %38, %cst_33 {dimension_numbers = #tpu.dot_dimension_numbers<[1], [0], [0], [1], [0, 0, 1, 1], [], []>, precision = #tpu.contract_precision<fp32>} : vector<3x128xf32>, vector<128x128xf32>, vector<3x128xf32> -> vector<3x128xf32>
    %c3_34 = arith.constant 3 : index
    %c0_35 = arith.constant 0 : index
    %c0_36 = arith.constant 0 : index
    %40 = vector.load %arg3[%c3_34, %c0_35, %c0_36] : memref<6x1x128xf32, #tpu.memory_space<vmem>>, vector<1x1x128xf32>
    %41 = vector.shape_cast %40 : vector<1x1x128xf32> to vector<1x128xf32>
    %42 = vector.broadcast %41 : vector<1x128xf32> to vector<3x128xf32>
    %43 = arith.addf %39, %42 : vector<3x128xf32>
    %44 = arith.addf %43, %25 : vector<3x128xf32>
    %cst_37 = arith.constant 0.000000e+00 : f32
    %45 = vector.broadcast %cst_37 : f32 to vector<3x128xf32>
    %46 = arith.maximumf %44, %45 : vector<3x128xf32>
    %c4 = arith.constant 4 : index
    %c0_38 = arith.constant 0 : index
    %c0_39 = arith.constant 0 : index
    %47 = vector.load %arg2[%c4, %c0_38, %c0_39] : memref<6x128x128xf32, #tpu.memory_space<vmem>>, vector<1x128x128xf32>
    %48 = vector.shape_cast %47 : vector<1x128x128xf32> to vector<128x128xf32>
    %cst_40 = arith.constant dense<0.000000e+00> : vector<3x128xf32>
    %49 = tpu.matmul %46, %48, %cst_40 {dimension_numbers = #tpu.dot_dimension_numbers<[1], [0], [0], [1], [0, 0, 1, 1], [], []>, precision = #tpu.contract_precision<fp32>} : vector<3x128xf32>, vector<128x128xf32>, vector<3x128xf32> -> vector<3x128xf32>
    %c4_41 = arith.constant 4 : index
    %c0_42 = arith.constant 0 : index
    %c0_43 = arith.constant 0 : index
    %50 = vector.load %arg3[%c4_41, %c0_42, %c0_43] : memref<6x1x128xf32, #tpu.memory_space<vmem>>, vector<1x1x128xf32>
    %51 = vector.shape_cast %50 : vector<1x1x128xf32> to vector<1x128xf32>
    %52 = vector.broadcast %51 : vector<1x128xf32> to vector<3x128xf32>
    %53 = arith.addf %49, %52 : vector<3x128xf32>
    %c5 = arith.constant 5 : index
    %c0_44 = arith.constant 0 : index
    %c0_45 = arith.constant 0 : index
    %54 = vector.load %arg2[%c5, %c0_44, %c0_45] : memref<6x128x128xf32, #tpu.memory_space<vmem>>, vector<1x128x128xf32>
    %55 = vector.shape_cast %54 : vector<1x128x128xf32> to vector<128x128xf32>
    %cst_46 = arith.constant dense<0.000000e+00> : vector<3x128xf32>
    %56 = tpu.matmul %46, %55, %cst_46 {dimension_numbers = #tpu.dot_dimension_numbers<[1], [0], [0], [1], [0, 0, 1, 1], [], []>, precision = #tpu.contract_precision<fp32>} : vector<3x128xf32>, vector<128x128xf32>, vector<3x128xf32> -> vector<3x128xf32>
    %c5_47 = arith.constant 5 : index
    %c0_48 = arith.constant 0 : index
    %c0_49 = arith.constant 0 : index
    %57 = vector.load %arg3[%c5_47, %c0_48, %c0_49] : memref<6x1x128xf32, #tpu.memory_space<vmem>>, vector<1x1x128xf32>
    %58 = vector.shape_cast %57 : vector<1x1x128xf32> to vector<1x128xf32>
    %59 = vector.broadcast %58 : vector<1x128xf32> to vector<3x128xf32>
    %60 = arith.addf %56, %59 : vector<3x128xf32>
    %61 = math.exp %53 : vector<3x128xf32>
    %62 = arith.mulf %6, %61 : vector<3x128xf32>
    %63 = arith.addf %62, %60 : vector<3x128xf32>
    %c0_50 = arith.constant 0 : index
    %c0_51 = arith.constant 0 : index
    %64 = vector.load %arg6[%c0_50, %c0_51] : memref<1x256xf32, #tpu.memory_space<vmem>>, vector<1x256xf32>
    %65 = vector.broadcast %64 : vector<1x256xf32> to vector<3x256xf32>
    %66 = arith.mulf %0, %65 : vector<3x256xf32>
    %c0_52 = arith.constant 0 : index
    %c0_53 = arith.constant 0 : index
    %67 = vector.load %arg5[%c0_52, %c0_53] : memref<128x256xf32, #tpu.memory_space<vmem>>, vector<128x256xf32>
    %cst_54 = arith.constant dense<0.000000e+00> : vector<3x256xf32>
    %68 = tpu.matmul %63, %67, %cst_54 {dimension_numbers = #tpu.dot_dimension_numbers<[1], [0], [0], [1], [0, 0, 1, 1], [], []>, precision = #tpu.contract_precision<fp32>} : vector<3x128xf32>, vector<128x256xf32>, vector<3x256xf32> -> vector<3x256xf32>
    %69 = arith.addf %66, %68 : vector<3x256xf32>
    %c0_55 = arith.constant 0 : index
    %c0_56 = arith.constant 0 : index
    %70 = vector.load %arg7[%c0_55, %c0_56] : memref<3x256xf32, #tpu.memory_space<vmem>>, vector<3x256xf32>
    tpu.vector_store %arg7[%c0_55, %c0_56], %69 {strides = array<i32>} : memref<3x256xf32, #tpu.memory_space<vmem>>, vector<3x256xf32>,
    return
  }
  func.func @transform_0(%arg0: i32) -> (i32, i32) {
    %c0_i32 = arith.constant 0 : i32
    %c0_i32_0 = arith.constant 0 : i32
    return %arg0, %c0_i32 : i32, i32
  }
  func.func @transform_1(%arg0: i32) -> (i32, i32, i32) {
    %c0_i32 = arith.constant 0 : i32
    %c0_i32_0 = arith.constant 0 : i32
    %c0_i32_1 = arith.constant 0 : i32
    %c0_i32_2 = arith.constant 0 : i32
    return %c0_i32, %c0_i32_0, %c0_i32_1 : i32, i32, i32
  }
  func.func @transform_2(%arg0: i32) -> (i32, i32, i32) {
    %c0_i32 = arith.constant 0 : i32
    %c0_i32_0 = arith.constant 0 : i32
    %c0_i32_1 = arith.constant 0 : i32
    %c0_i32_2 = arith.constant 0 : i32
    return %c0_i32, %c0_i32_0, %c0_i32_1 : i32, i32, i32
  }
  func.func @transform_3(%arg0: i32) -> (i32, i32, i32) {
    %c0_i32 = arith.constant 0 : i32
    %c0_i32_0 = arith.constant 0 : i32
    %c0_i32_1 = arith.constant 0 : i32
    %c0_i32_2 = arith.constant 0 : i32
    return %c0_i32, %c0_i32_0, %c0_i32_1 : i32, i32, i32
  }
  func.func @transform_4(%arg0: i32) -> (i32, i32) {
    %c0_i32 = arith.constant 0 : i32
    %c0_i32_0 = arith.constant 0 : i32
    %c0_i32_1 = arith.constant 0 : i32
    return %c0_i32, %c0_i32_0 : i32, i32
  }
  func.func @transform_5(%arg0: i32) -> (i32, i32) {
    %c0_i32 = arith.constant 0 : i32
    %c0_i32_0 = arith.constant 0 : i32
    %c0_i32_1 = arith.constant 0 : i32
    return %c0_i32, %c0_i32_0 : i32, i32
  }
  func.func @transform_6(%arg0: i32) -> (i32, i32) {
    %c0_i32 = arith.constant 0 : i32
    %c0_i32_0 = arith.constant 0 : i32
    return %arg0, %c0_i32 : i32, i32
  }
}

</mosaic_0001>

<bundles_post_ra>
// kernel: tpu_custom_call.1
= control target key start
LH: loop header
LB: loop body
LE: loop exit
PB: predicated region body
PF: predicated region fallthrough
CT: control target
= control target key end

     0   :  { %11 = vsyncpa [#allocation3], 0  ;;  %s14061_s0 = inlined_call_operand.hbm [shape: f32[3,256], index: 0, kind: input, shape index: {}]   ;;  %s14062_s1 = inlined_call_operand.hbm [shape: f32[6,128,128], index: 1, kind: input, shape index: {}]   ;;  %s14063_s2 = inlined_call_operand.vmem [shape: f32[6,1,128], index: 2, kind: input, shape index: {}]   ;;  %s14064_s3 = inlined_call_operand.hbm [shape: f32[2,256,128], index: 3, kind: input, shape index: {}]   ;;  %s14065_s4 = inlined_call_operand.hbm [shape: f32[128,256], index: 4, kind: input, shape index: {}]   ;;  %s14066_s5 = inlined_call_operand.vmem [shape: f32[1,256], index: 5, kind: input, shape index: {}]   ;;  %s14067_s6 = inlined_call_operand.hbm [shape: f32[3,256], index: 6, kind: output, shape index: {}]  }
   0x1   :  { %12 = vsyncpa [#allocation6], 0 }
   0x2   :  { %13 = vsyncpa [#allocation9], 0 }
   0x3   :  { %14 = vsyncpa [#allocation4], 0  ;;  %s10718_s21 = smov [#allocation5]   ;;  %s10600_s25 = scalar_lea.hbm %s14062_s1, 12288 }
   0x4   :  { %s30_s22 = sshll.u32 %s10718_s21, 4  ;;  %p10601_p0 = scmp.ne.s32.totalorder %s14062_s1, %s10600_s25  ;;  %s31_s22 = int_to_ptr.vmem [resolvable:$true] %s30_s22 }
   0x5   :  { %p10604_p1 = scmp.lt.u32.totalorder %s10600_s25, %s14062_s1 }
   0x7   :  { %p10606_p2 = pnand %p10604_p1, %p10601_p0 }
   0x9   :  { %10609 = shalt.err (!%p10606_p2)
}
   0xa   :  { %s10610_s30 = scalar_lea.vmem %s31_s22, 12288  ;;  %p10615_p4 = scmp.lt.s32.totalorder %s31_s22, %s31_s22 }
   0xb   :  { %p10611_p3 = scmp.ne.s32.totalorder %s31_s22, %s10610_s30  ;;  %p10616_p5 = scmp.lt.s32.totalorder %s10610_s30, %s10610_s30 }
   0xd   :  { %p10617_p6 = por %p10616_p5, %p10615_p4 }
   0xf   :  { %p10618_p7 = pnand %p10617_p6, %p10611_p3 }
  0x11   :  { %10621 = shalt.err (!%p10618_p7)
}
  0x12   :  { %s10719_s7 = smov 128   ;;  %s10720_s8 = smov 8  }
  0x13   :  { %36 = dma.hbm_to_vmem [thread:$0]  %s14062_s1, 12288, %s31_s22, [#allocation6], %s10719_s7, %s10719_s7, %s10720_s8  }
  0x14   :  { %s10721_s11 = smov [#allocation2]   ;;  %s10722_s13 = smov [#allocation7]  }
  0x15   :  { %s21_s12 = sshll.u32 %s10721_s11, 4  ;;  %s44_s14 = sshll.u32 %s10722_s13, 4  ;;  %s22_s12 = int_to_ptr.vmem [resolvable:$true] %s21_s12  ;;  %s45_s14 = int_to_ptr.vmem [resolvable:$true] %s44_s14 }
  0x16   :  { %s10622_s17 = scalar_lea.hbm %s14061_s0, 128 }
  0x17   :  { %p10623_p8 = scmp.ne.s32.totalorder %s14061_s0, %s10622_s17  ;;  %p10626_p9 = scmp.lt.u32.totalorder %s10622_s17, %s14061_s0 }
  0x19   :  { %p10628_p10 = pnand %p10626_p9, %p10623_p8 }
  0x1b   :  { %10631 = shalt.err (!%p10628_p10)
}
  0x1c   :  { %s10632_s1 = scalar_lea.vmem %s22_s12, 128  ;;  %p10637_p12 = scmp.lt.s32.totalorder %s22_s12, %s22_s12 }
  0x1d   :  { %p10633_p11 = scmp.ne.s32.totalorder %s22_s12, %s10632_s1  ;;  %p10638_p13 = scmp.lt.s32.totalorder %s10632_s1, %s10632_s1 }
  0x1f   :  { %p10639_p0 = por %p10638_p13, %p10637_p12 }
  0x21   :  { %p10640_p1 = pnand %p10639_p0, %p10633_p11 }
  0x23   :  { %10643 = shalt.err (!%p10640_p1)
}
  0x24   :  { %24 = dma.hbm_to_vmem [thread:$0]  %s14061_s0, 128, %s22_s12, [#allocation3]  }
  0x25   :  { %s10644_s26 = scalar_lea.hbm %s14064_s3, 8192 }
  0x26   :  { %p10645_p2 = scmp.ne.s32.totalorder %s14064_s3, %s10644_s26  ;;  %p10648_p3 = scmp.lt.u32.totalorder %s10644_s26, %s14064_s3 }
  0x28   :  { %p10650_p4 = pnand %p10648_p3, %p10645_p2 }
  0x2a   :  { %10653 = shalt.err (!%p10650_p4)
}
  0x2b   :  { %s10654_s9 = scalar_lea.vmem %s45_s14, 8192  ;;  %p10659_p6 = scmp.lt.s32.totalorder %s45_s14, %s45_s14 }
  0x2c   :  { %p10655_p5 = scmp.ne.s32.totalorder %s45_s14, %s10654_s9  ;;  %p10660_p7 = scmp.lt.s32.totalorder %s10654_s9, %s10654_s9 }
  0x2e   :  { %p10661_p8 = por %p10660_p7, %p10659_p6 }
  0x30   :  { %p10662_p9 = pnand %p10661_p8, %p10655_p5 }
  0x32   :  { %10665 = shalt.err (!%p10662_p9)
}
  0x33   :  { %50 = dma.hbm_to_vmem [thread:$0]  %s14064_s3, 8192, %s45_s14, [#allocation6], %s10719_s7, %s10719_s7, %s10720_s8  }
  0x34   :  { %s10723_s11 = smov [#allocation8]   ;;  %s10666_s16 = scalar_lea.hbm %s14065_s4, 4096 }
  0x35   :  { %s56_s12 = sshll.u32 %s10723_s11, 4  ;;  %p10667_p10 = scmp.ne.s32.totalorder %s14065_s4, %s10666_s16  ;;  %s57_s12 = int_to_ptr.vmem [resolvable:$true] %s56_s12 }
  0x36   :  { %p10670_p11 = scmp.lt.u32.totalorder %s10666_s16, %s14065_s4 }
  0x38   :  { %p10672_p12 = pnand %p10670_p11, %p10667_p10 }
  0x3a   :  { %10675 = shalt.err (!%p10672_p12)
}
  0x3b   :  { %s10676_s21 = scalar_lea.vmem %s57_s12, 4096  ;;  %p10681_p0 = scmp.lt.s32.totalorder %s57_s12, %s57_s12 }
  0x3c   :  { %p10677_p13 = scmp.ne.s32.totalorder %s57_s12, %s10676_s21  ;;  %p10682_p1 = scmp.lt.s32.totalorder %s10676_s21, %s10676_s21 }
  0x3e   :  { %p10683_p2 = por %p10682_p1, %p10681_p0 }
  0x40   :  { %p10684_p3 = pnand %p10683_p2, %p10677_p13 }
  0x42   :  { %10687 = shalt.err (!%p10684_p3)
}
  0x43   :  { %s10724_s3 = smov 256   ;;  %s10725_s7 = smov 16  }
  0x44   :  { %62 = dma.hbm_to_vmem [thread:$0]  %s14065_s4, 4096, %s57_s12, [#allocation9], %s10724_s3, %s10724_s3, %s10725_s7  }
  0x45   :  { %10710 = dma.done.wait [#allocation3], 128  }
  0x46   :  { %10711 = vsyncadd [#allocation3], 4294967168 }
  0x47   :  { %10712 = dma.done.wait [#allocation6], 20480  }
  0x48   :  { %10713 = vsyncadd [#allocation6], 4294946816 }
  0x49   :  { %10714 = dma.done.wait [#allocation9], 4096  }
  0x4a   :  { %10715 = vsyncadd [#allocation9], 4294963200  ;;  %v94_v0 = vld [vmem:[#allocation7 + $0x80] sm:$0xff]  ;;  %v95_v1 = vld [vmem:[#allocation7 + $0x88] sm:$0xff]  ;;  %vm10727_vm0 = vmmov 0   ;;  %s10729_s10 = smov [#allocation10]  }
  0x4b   :  { %v78_v2 = vld [vmem:[#allocation7] sm:$0xff]  ;;  %v162_v3 = vand.u32 4294901760, %v94_v0  ;;  %v165_v4 = vand.u32 4294901760, %v95_v1  ;;  %v79_v5 = vld [vmem:[#allocation7 + $0x8] sm:$0xff]  ;;  %v96_v7 = vld [vmem:[#allocation7 + $0x90] sm:$0xff]  ;;  %s6787_s11 = sshll.u32 %s10729_s10, 4  ;;  %s6788_s11 = int_to_ptr.vmem [resolvable:$true] %s6787_s11 }
  0x4c   :  { %v114_v6 = vand.u32 4294901760, %v78_v2  ;;  %v97_v8 = vld [vmem:[#allocation7 + $0x98] sm:$0xff]  ;;  %v117_v9 = vand.u32 4294901760, %v79_v5  ;;  %v168_v10 = vand.u32 4294901760, %v96_v7  ;;  %v80_v12 = vld [vmem:[#allocation7 + $0x10] sm:$0xff]  ;;  %v98_v14 = vld [vmem:[#allocation7 + $0xa0] sm:$0xff]  ;;  %p10693_p5 = scmp.lt.s32.totalorder %s6788_s11, %s6788_s11 }
  0x4d   :  { %v171_v11 = vand.u32 4294901760, %v97_v8  ;;  %v81_v13 = vld [vmem:[#allocation7 + $0x18] sm:$0xff]  ;;  %v10819_v15 = vpack.c.bf16 %v165_v4, %v162_v3  ;;  %v99_v16 = vld [vmem:[#allocation7 + $0xa8] sm:$0xff]  ;;  %v82_v17 = vld [vmem:[#allocation7 + $0x20] sm:$0xff]  ;;  %v10826_v22 = vsub.f32 %v94_v0, %v162_v3  ;;  %v120_v23 = vand.u32 4294901760, %v80_v12  ;;  %s10688_s12 = scalar_lea.vmem %s6788_s11, 128 }
  0x4e   :  { %v83_v18 = vld [vmem:[#allocation7 + $0x28] sm:$0xff]  ;;  %v10821_v19 = vpack.c.bf16 %v117_v9, %v114_v6  ;;  %v100_v21 = vld [vmem:[#allocation7 + $0xb0] sm:$0xff]  ;;  %v123_v24 = vand.u32 4294901760, %v81_v13  ;;  %v174_v25 = vand.u32 4294901760, %v98_v14  ;;  %v10828_v26 = vsub.f32 %v95_v1, %v165_v4  ;;  %v101_v30 = vld [vmem:[#allocation7 + $0xb8] sm:$0xff]  ;;  %p10689_p4 = scmp.ne.s32.totalorder %s6788_s11, %s10688_s12  ;;  %p10694_p6 = scmp.lt.s32.totalorder %s10688_s12, %s10688_s12 }
  0x4f   :  { %14389 = vst [vmem:[#allocation15_spill] sm:$0xff] %v10819_v15  ;;  %v10823_v20 = vpack.c.bf16 %v171_v11, %v168_v10  ;;  %9102 = vmatprep.subr.bf16.mxu1 %v10819_v15  ;;  %v177_v27 = vand.u32 4294901760, %v99_v16  ;;  %v126_v28 = vand.u32 4294901760, %v82_v17  ;;  %v129_v29 = vand.u32 4294901760, %v83_v18  ;;  %v84_v31 = vld [vmem:[#allocation7 + $0x30] sm:$0xff]  ;;  %v85_v36 = vld [vmem:[#allocation7 + $0x38] sm:$0xff] }
  0x50   :  { %14390 = vst [vmem:[#allocation16_spill] sm:$0xff] %v10821_v19  ;;  %9104 = vmatpush3.bf16.msra.mxu1 %v10821_v19  ;;  %v10831_v32 = vsub.f32 %v78_v2, %v114_v6  ;;  %v10833_v33 = vsub.f32 %v79_v5, %v117_v9  ;;  %v10836_v34 = vpack.c.bf16 %v123_v24, %v120_v23  ;;  %v180_v35 = vand.u32 4294901760, %v100_v21  ;;  %v102_v37 = vld [vmem:[#allocation7 + $0xc0] sm:$0xff]  ;;  %v103_v38 = vld [vmem:[#allocation7 + $0xc8] sm:$0xff]  ;;  %v104_v53 = vld [vmem:[#allocation7 + $0xd0] sm:$0xff]  ;;  %p10695_p7 = por %p10694_p6, %p10693_p5 }
  0x51   :  { %14391 = vst [vmem:[#allocation17_spill] sm:$0xff] %v10823_v20  ;;  %9106 = vmatprep.subr.bf16.mxu1 %v10823_v20  ;;  %v10838_v39 = vsub.f32 %v96_v7, %v168_v10  ;;  %v10840_v40 = vsub.f32 %v97_v8, %v171_v11  ;;  %v10842_v41 = vsub.f32 %v80_v12, %v120_v23  ;;  %v183_v45 = vand.u32 4294901760, %v101_v30  ;;  %v86_v47 = vld [vmem:[#allocation7 + $0x40] sm:$0xff]  ;;  %v87_v48 = vld [vmem:[#allocation7 + $0x48] sm:$0xff]  ;;  %v105_v58 = vld [vmem:[#allocation7 + $0xd8] sm:$0xff] }
  0x52   :  { %14392 = vst [vmem:[#allocation18_spill] sm:$0xff] %v10836_v34  ;;  %v10844_v42 = vpack.c.bf16 %v177_v27, %v174_v25  ;;  %v10846_v43 = vsub.f32 %v81_v13, %v123_v24  ;;  %v10848_v44 = vsub.f32 %v98_v14, %v174_v25  ;;  %v132_v46 = vand.u32 4294901760, %v84_v31  ;;  %v88_v59 = vld [vmem:[#allocation7 + $0x50] sm:$0xff]  ;;  %v89_v60 = vld [vmem:[#allocation7 + $0x58] sm:$0xff]  ;;  %v106_v1 = vld [vmem:[#allocation7 + $0xe0] sm:$0xff]  ;;  %p10696_p8 = pnand %p10695_p7, %p10689_p4 }
  0x53   :  { %v10851_v49 = vpack.c.bf16 %v129_v29, %v126_v28  ;;  %v135_v50 = vand.u32 4294901760, %v85_v36  ;;  %v186_v51 = vand.u32 4294901760, %v102_v37  ;;  %v189_v52 = vand.u32 4294901760, %v103_v38  ;;  %v107_v2 = vld [vmem:[#allocation7 + $0xe8] sm:$0xff]  ;;  %v90_v7 = vld [vmem:[#allocation7 + $0x60] sm:$0xff]  ;;  %v108_v25 = vld [vmem:[#allocation7 + $0xf0] sm:$0xff] }
  0x54   :  { %14393 = vst [vmem:[#allocation19_spill] sm:$0xff] %v10844_v42  ;;  %9108 = vmatpush3.bf16.msra.mxu1 %v10836_v34  ;;  %v10854_v54 = vsub.f32 %v99_v16, %v177_v27  ;;  %v10856_v55 = vsub.f32 %v82_v17, %v126_v28  ;;  %v10858_v56 = vsub.f32 %v83_v18, %v129_v29  ;;  %v138_v63 = vand.u32 4294901760, %v86_v47  ;;  %v91_v12 = vld [vmem:[#allocation7 + $0x68] sm:$0xff]  ;;  %v10886_v27 = vld [vmem:[#allocation7 + $0xf8] sm:$0xff] }
  0x55   :  { %14394 = vst [vmem:[#allocation20_spill] sm:$0xff] %v10851_v49  ;;  %9110 = vmatprep.subr.bf16.mxu1 %v10844_v42  ;;  %v10860_v57 = vpack.c.bf16 %v183_v45, %v180_v35  ;;  %v10862_v61 = vsub.f32 %v100_v21, %v180_v35  ;;  %v10864_v62 = vsub.f32 %v101_v30, %v183_v45  ;;  %v141_v0 = vand.u32 4294901760, %v87_v48  ;;  %v77_v35 = vld [vmem:[#allocation2] sm:$0x77] }
  0x56   :  { %v10866_v3 = vpack.c.bf16 %v135_v50, %v132_v46  ;;  %v10868_v4 = vsub.f32 %v84_v31, %v132_v46  ;;  %v10870_v5 = vsub.f32 %v85_v36, %v135_v50  ;;  %v10872_v6 = vpack.c.bf16 %v189_v52, %v186_v51  ;;  %v10903_v46 = vld [vmem:[#allocation7 + $0x70] sm:$0xff] }
  0x57   :  { %14395 = vst [vmem:[#allocation21_spill] sm:$0xff] %v10860_v57  ;;  %v192_v8 = vand.u32 4294901760, %v104_v53  ;;  %v195_v9 = vand.u32 4294901760, %v105_v58  ;;  %v144_v10 = vand.u32 4294901760, %v88_v59  ;;  %v147_v11 = vand.u32 4294901760, %v89_v60 }
  0x58   :  { %14396 = vst [vmem:[#allocation22_spill] sm:$0xff] %v10866_v3  ;;  %14397 = vst [vmem:[#allocation23_spill] sm:$0xff] %v10872_v6  ;;  %9112 = vmatpush3.bf16.msra.mxu1 %v10851_v49  ;;  %v10876_v13 = vsub.f32 %v102_v37, %v186_v51  ;;  %v10878_v14 = vsub.f32 %v103_v38, %v189_v52  ;;  %v198_v16 = vand.u32 4294901760, %v106_v1  ;;  %v201_v17 = vand.u32 4294901760, %v107_v2  ;;  %v10911_v52 = vld [vmem:[#allocation7 + $0x78] sm:$0xff] }
  0x59   :  { %9114 = vmatprep.subr.bf16.mxu1 %v10860_v57  ;;  %v10880_v18 = vpack.c.bf16 %v141_v0, %v138_v63  ;;  %v10882_v21 = vsub.f32 %v86_v47, %v138_v63  ;;  %v10884_v23 = vsub.f32 %v87_v48, %v141_v0  ;;  %v150_v24 = vand.u32 4294901760, %v90_v7 }
  0x5a   :  { %v10888_v28 = vpack.c.bf16 %v195_v9, %v192_v8  ;;  %v10890_v29 = vsub.f32 %v104_v53, %v192_v8  ;;  %v10892_v30 = vsub.f32 %v105_v58, %v195_v9  ;;  %v153_v31 = vand.u32 4294901760, %v91_v12 }
  0x5b   :  { %14398 = vst [vmem:[#allocation24_spill] sm:$0xff] %v10880_v18  ;;  %v10895_v36 = vpack.c.bf16 %v147_v11, %v144_v10  ;;  %v10897_v37 = vsub.f32 %v88_v59, %v144_v10  ;;  %v10899_v38 = vsub.f32 %v89_v60, %v147_v11  ;;  %v10901_v45 = vpack.c.bf16 %v201_v17, %v198_v16 }
  0x5c   :  { %14399 = vst [vmem:[#allocation25_spill] sm:$0xff] %v10888_v28  ;;  %9116 = vmatpush3.bf16.msra.mxu1 %v10866_v3  ;;  %v10906_v47 = vsub.f32 %v106_v1, %v198_v16  ;;  %v10908_v48 = vsub.f32 %v107_v2, %v201_v17  ;;  %v204_v50 = vand.u32 4294901760, %v108_v25  ;;  %v14068_v51 = vand.u32 4294901760, %v10886_v27 }
  0x5d   :  { %14400 = vst [vmem:[#allocation26_spill] sm:$0xff] %v10895_v36  ;;  %14401 = vst [vmem:[#allocation27_spill] sm:$0xff] %v10901_v45  ;;  %9118 = vmatprep.subr.bf16.mxu1 %v10872_v6  ;;  %v111_v53 = vcombine.high %v77_v35, %v77_v35  ;;  %v10913_v58 = vand.u32 4294901760, %v77_v35  ;;  %v14069_v59 = vand.u32 4294901760, %v10826_v22  ;;  %v14070_v60 = vand.u32 4294901760, %v10828_v26 }
  0x5e   :  { %14402 = vst [vmem:[#allocation28_spill] sm:$0xff] %v10906_v47  ;;  %14403 = vst [vmem:[#allocation29_spill] sm:$0xff] %v10908_v48  ;;  %v10917_v63 = vpack.c.bf16 %v153_v31, %v150_v24  ;;  %v10919_v0 = vsub.f32 %v90_v7, %v150_v24  ;;  %v10921_v1 = vsub.f32 %v91_v12, %v153_v31  ;;  %v14071_v16 = vand.u32 4294901760, %v10831_v32 }
  0x5f   :  { %v10927_v8 = vpack.c.bf16 %v14068_v51, %v204_v50  ;;  %v10930_v10 = vand.u32 4294901760, %v111_v53  ;;  %v10933_v11 = vsub.f32 %v77_v35, %v10913_v58  ;;  %v341_v7 = vsub.f32 %v10826_v22, %v14069_v59 }
  0x60   :  { %14404 = vst [vmem:[#allocation30_spill] sm:$0xff] %v10917_v63  ;;  %14405 = vst [vmem:[#allocation31_spill] sm:$0xff] %v10919_v0  ;;  %9120 = vmatpush3.bf16.msra.mxu1 %v10880_v18  ;;  %v348_v12 = vsub.f32 %v10828_v26, %v14070_v60  ;;  %v14074_v17 = vand.u32 4294901760, %v10833_v33  ;;  %v229_v60 = vsub.f32 %v10831_v32, %v14071_v16  ;;  %v14412_v51 = vand.u32 4294901760, %v10838_v39 }
  0x61   :  { %14406 = vst [vmem:[#allocation32_spill] sm:$0xff] %v10921_v1  ;;  %14407 = vst [vmem:[#allocation33_spill] sm:$0xff] %v10927_v8  ;;  %9122 = vmatprep.subr.bf16.mxu1 %v10888_v28  ;;  %v10945_v24 = vsub.f32 %v111_v53, %v10930_v10  ;;  %v10948_v31 = vand.u32 4294901760, %v10933_v11  ;;  %v342_v9 = vand.u32 4294901760, %v341_v7  ;;  %v10971_v28 = vsub.f32 %v108_v25, %v204_v50 }
  0x62   :  { %14408 = vst [vmem:[#allocation34_spill] sm:$0xff] %v10930_v10  ;;  %14409 = vst [vmem:[#allocation35_spill] sm:$0xff] %v10933_v11  ;;  %v349_v59 = vand.u32 4294901760, %v348_v12  ;;  %v236_v2 = vsub.f32 %v10833_v33, %v14074_v17  ;;  %v355_v7 = vsub.f32 %v10838_v39, %v14412_v51  ;;  %v14413_v12 = vand.u32 4294901760, %v10840_v40 }
  0x63   :  { %14410 = vst [vmem:[#allocation36_spill] sm:$0xff] %v10948_v31  ;;  %v10960_v53 = vand.u32 4294901760, %v10945_v24  ;;  %v218_v35 = vsub.f32 %v10933_v11, %v10948_v31  ;;  %14414 = vst [vmem:[#allocation38_spill] sm:$0xff] %v10971_v28  ;;  %v14415_v17 = vand.u32 4294901760, %v10903_v46  ;;  %v14089_v31 = vand.u32 4294901760, %v10842_v41 }
  0x64   :  { %9124 = vmatpush3.bf16.msra.mxu1 %v10895_v36  ;;  %v362_v16 = vsub.f32 %v10840_v40, %v14413_v12  ;;  %v14416_v36 = vand.u32 4294901760, %v10911_v52  ;;  %v9133_v6 = vpack.c.bf16 %v349_v59, %v342_v9  ;;  %v230_v57 = vand.u32 4294901760, %v229_v60 }
  0x65   :  { %14411 = vst [vmem:[#allocation37_spill] sm:$0xff] %v10960_v53  ;;  %9126 = vmatprep.subr.bf16.mxu1 %v10901_v45  ;;  %v212_v51 = vsub.f32 %v10945_v24, %v10960_v53  ;;  %v10982_v3 = vand.u32 4294901760, %v218_v35  ;;  %v237_v12 = vand.u32 4294901760, %v236_v2  ;;  %v356_v49 = vand.u32 4294901760, %v355_v7 }
  0x66   :  { %v10977_v18 = vpack.c.bf16 %v14416_v36, %v14415_v17  ;;  %v243_v25 = vsub.f32 %v10842_v41, %v14089_v31  ;;  %v14092_v50 = vand.u32 4294901760, %v10846_v43  ;;  %v14095_v36 = vand.u32 4294901760, %v10848_v44 }
  0x67   :  { %14418 = vst [vmem:[#allocation40_spill] sm:$0xff] %v10982_v3  ;;  %v213_v59 = vand.u32 4294901760, %v212_v51  ;;  %v363_v9 = vand.u32 4294901760, %v362_v16  ;;  %v14098_v17 = vand.u32 4294901760, %v10854_v54  ;;  %v14101_v35 = vand.u32 4294901760, %v10856_v55 }
  0x68   :  { %14417 = vst [vmem:[#allocation39_spill] sm:$0xff] %v10977_v18  ;;  %9128 = vmatpush3.bf16.msra.mxu1 %v10917_v63  ;;  %v244_v60 = vand.u32 4294901760, %v243_v25  ;;  %v250_v2 = vsub.f32 %v10846_v43, %v14092_v50  ;;  %v369_v7 = vsub.f32 %v10848_v44, %v14095_v36  ;;  %v14102_v31 = vand.u32 4294901760, %v10858_v56 }
  0x69   :  { %9130 = vmatprep.subr.bf16.mxu1 %v10927_v8  ;;  %214 = vmatprep.mubr.f32.mxu1 %v213_v59  ;;  %v376_v16 = vsub.f32 %v10854_v54, %v14098_v17  ;;  %v257_v51 = vsub.f32 %v10856_v55, %v14101_v35  ;;  %v14107_v25 = vand.u32 4294901760, %v10862_v61  ;;  %v14116_v8 = vand.u32 4294901760, %v10864_v62 }
  0x6a   :  { %1109 = vmatprep.mubr.f32.mxu0 %v213_v59  ;;  %v251_v50 = vand.u32 4294901760, %v250_v2  ;;  %v370_v63 = vand.u32 4294901760, %v369_v7  ;;  %v264_v36 = vsub.f32 %v10858_v56, %v14102_v31  ;;  %v14115_v45 = vand.u32 4294901760, %v10868_v4 }
  0x6b   :  { %v9135_v17 = vpack.c.bf16 %v237_v12, %v230_v57  ;;  %v377_v42 = vand.u32 4294901760, %v376_v16  ;;  %v383_v35 = vsub.f32 %v10862_v61, %v14107_v25  ;;  %v390_v59 = vsub.f32 %v10864_v62, %v14116_v8 }
  0x6c   :  { %9132 = vmatpush3.bf16.msra.mxu1 %v10977_v18  ;;  %v9137_v2 = vpack.c.bf16 %v363_v9, %v356_v49  ;;  %v258_v7 = vand.u32 4294901760, %v257_v51  ;;  %v271_v31 = vsub.f32 %v10868_v4, %v14115_v45  ;;  %v14112_v34 = vand.u32 4294901760, %v10870_v5 }
  0x6d   :  { %9134 = vmatprep.subr.bf16.mxu1 %v9133_v6  ;;  %v9139_v18 = vpack.c.bf16 %v251_v50, %v244_v60  ;;  %v9141_v57 = vpack.c.bf16 %v377_v42, %v370_v63  ;;  %v265_v12 = vand.u32 4294901760, %v264_v36  ;;  %v14111_v16 = vand.u32 4294901760, %v10876_v13 }
  0x6e   :  { %v384_v25 = vand.u32 4294901760, %v383_v35  ;;  %v391_v20 = vand.u32 4294901760, %v390_v59  ;;  %v278_v49 = vsub.f32 %v10870_v5, %v14112_v34  ;;  %v14110_v6 = vand.u32 4294901760, %v10878_v14 }
  0x6f   :  { %220 = vmatmul.mubr.f32.vlgmr.msra.gmra.mrb[0].mxu1 %v10982_v3  ;;  %v272_v9 = vand.u32 4294901760, %v271_v31  ;;  %v397_v50 = vsub.f32 %v10876_v13, %v14111_v16  ;;  %v14114_v42 = vand.u32 4294901760, %v10882_v21  ;;  %v14113_v63 = vand.u32 4294901760, %v10884_v23 }
  0x70   :  { %9136 = vmatpush3.bf16.msra.mxu1 %v9135_v17  ;;  %450 = vmatprep.mubr.f32.mxu1 %v10930_v10  ;;  %v279_v36 = vand.u32 4294901760, %v278_v49  ;;  %v404_v35 = vsub.f32 %v10878_v14, %v14110_v6  ;;  %v14120_v60 = vand.u32 4294901760, %v10890_v29  ;;  %v14123_v31 = vand.u32 4294901760, %v10892_v30 }
  0x71   :  { %9138 = vmatprep.subr.bf16.mxu1 %v9137_v2  ;;  %v14419_v17 = vand.u32 4294901760, %v10886_v27  ;;  %v285_v59 = vsub.f32 %v10882_v21, %v14114_v42  ;;  %v292_v2 = vsub.f32 %v10884_v23, %v14113_v63  ;;  %v14421_v6 = vand.u32 4294901760, %v10903_v46 }
  0x72   :  { %v14422_v34 = vand.u32 4294901760, %v10911_v52  ;;  %v418_v63 = vsub.f32 %v10892_v30, %v14123_v31  ;;  %v9143_v42 = vpack.c.bf16 %v265_v12, %v258_v7  ;;  %v9145_v45 = vpack.c.bf16 %v391_v20, %v384_v25 }
  0x73   :  { %v11043_v51 = vsub.f32 %v10886_v27, %v14419_v17  ;;  %v11055_v16 = vsub.f32 %v10903_v46, %v14421_v6  ;;  %v411_v17 = vsub.f32 %v10890_v29, %v14120_v60  ;;  %v398_v8 = vand.u32 4294901760, %v397_v50 }
  0x74   :  { %v11060_v27 = vsub.f32 %v10911_v52, %v14422_v34  ;;  %9140 = vmatpush3.bf16.msra.mxu1 %v9139_v18  ;;  %v305_v46 = vand.u32 4294901760, %v10899_v38  ;;  %v9147_v6 = vpack.c.bf16 %v279_v36, %v272_v9  ;;  %v405_v49 = vand.u32 4294901760, %v404_v35 }
  0x75   :  { %14420 = vst [vmem:[#allocation41_spill] sm:$0xff] %v11043_v51  ;;  %9142 = vmatprep.subr.bf16.mxu1 %v9141_v57  ;;  %v286_v3 = vand.u32 4294901760, %v285_v59  ;;  %v424_v34 = vand.u32 4294901760, %v10906_v47  ;;  %v293_v52 = vand.u32 4294901760, %v292_v2  ;;  %v412_v10 = vand.u32 4294901760, %v411_v17 }
  0x76   :  { %v14423_v60 = vand.u32 4294901760, %v10897_v37  ;;  %v431_v31 = vand.u32 4294901760, %v10908_v48  ;;  %v419_v18 = vand.u32 4294901760, %v418_v63  ;;  %v306_v20 = vsub.f32 %v10899_v38, %v305_v46 }
  0x77   :  { %v312_v25 = vand.u32 4294901760, %v10919_v0  ;;  %v319_v7 = vand.u32 4294901760, %v10921_v1  ;;  %v425_v57 = vsub.f32 %v10906_v47, %v424_v34  ;;  %v438_v9 = vand.u32 4294901760, %v10971_v28 }
  0x78   :  { %v299_v53 = vsub.f32 %v10897_v37, %v14423_v60  ;;  %9144 = vmatpush3.bf16.msra.mxu1 %v9143_v42  ;;  %v432_v12 = vsub.f32 %v10908_v48, %v431_v31  ;;  %v445_v50 = vand.u32 4294901760, %v11043_v51  ;;  %v9149_v36 = vpack.c.bf16 %v405_v49, %v398_v8 }
  0x79   :  { %9146 = vmatprep.subr.bf16.mxu1 %v9145_v45  ;;  %v313_v35 = vsub.f32 %v10919_v0, %v312_v25  ;;  %v320_v63 = vsub.f32 %v10921_v1, %v319_v7  ;;  %v326_v60 = vand.u32 4294901760, %v11055_v16  ;;  %v439_v59 = vsub.f32 %v10971_v28, %v438_v9 }
  0x7a   :  { %v446_v42 = vsub.f32 %v11043_v51, %v445_v50  ;;  %v9151_v2 = vpack.c.bf16 %v293_v52, %v286_v3  ;;  %v9153_v17 = vpack.c.bf16 %v419_v18, %v412_v10  ;;  %v300_v19 = vand.u32 4294901760, %v299_v53 }
  0x7b   :  { %v333_v11 = vand.u32 4294901760, %v11060_v27  ;;  %v307_v15 = vand.u32 4294901760, %v306_v20  ;;  %v426_v48 = vand.u32 4294901760, %v425_v57  ;;  %v433_v45 = vand.u32 4294901760, %v432_v12 }
  0x7c   :  { %9148 = vmatpush3.bf16.msra.mxu1 %v9147_v6  ;;  %v314_v8 = vand.u32 4294901760, %v313_v35  ;;  %v321_v49 = vand.u32 4294901760, %v320_v63  ;;  %v440_v0 = vand.u32 4294901760, %v439_v59  ;;  %v447_v1 = vand.u32 4294901760, %v446_v42 }
  0x7d   :  { %9150 = vmatprep.subr.bf16.mxu1 %v9149_v36  ;;  %v327_v47 = vsub.f32 %v11055_v16, %v326_v60  ;;  %v334_v28 = vsub.f32 %v11060_v27, %v333_v11  ;;  %v9155_v51 = vpack.c.bf16 %v307_v15, %v300_v19  ;;  %v9157_v3 = vpack.c.bf16 %v433_v45, %v426_v48 }
  0x7e   :  { %v9159_v10 = vpack.c.bf16 %v321_v49, %v314_v8  ;;  %v9161_v53 = vpack.c.bf16 %v447_v1, %v440_v0  ;;  %v14424_v18 = vand.u32 4294901760, %v10826_v22  ;;  %v14425_v20 = vand.u32 4294901760, %v10828_v26 }
  0x7f   :  { %v328_v52 = vand.u32 4294901760, %v327_v47  ;;  %v335_v6 = vand.u32 4294901760, %v334_v28  ;;  %v14426_v12 = vand.u32 4294901760, %v10831_v32  ;;  %v14427_v36 = vand.u32 4294901760, %v10833_v33 }
  0x80   :  { %9152 = vmatpush3.bf16.msra.mxu1 %v9151_v2  ;;  %v11093_v57 = vpack.c.bf16 %v14425_v20, %v14424_v18  ;;  %v14428_v15 = vand.u32 4294901760, %v10838_v39  ;;  %v14429_v19 = vand.u32 4294901760, %v10840_v40  ;;  %v14430_v28 = vand.u32 4294901760, %v10842_v41 }
  0x81   :  { %9154 = vmatprep.subr.bf16.mxu1 %v9153_v17  ;;  %v11099_v35 = vpack.c.bf16 %v14427_v36, %v14426_v12  ;;  %v14431_v47 = vand.u32 4294901760, %v10846_v43  ;;  %v14432_v1 = vand.u32 4294901760, %v10848_v44  ;;  %v14433_v63 = vand.u32 4294901760, %v10854_v54 }
  0x82   :  { %v11105_v48 = vpack.c.bf16 %v14429_v19, %v14428_v15  ;;  %v14434_v42 = vand.u32 4294901760, %v10856_v55  ;;  %v14435_v2 = vand.u32 4294901760, %v10858_v56  ;;  %v14436_v45 = vand.u32 4294901760, %v10862_v61 }
  0x83   :  { %v11111_v0 = vpack.c.bf16 %v14431_v47, %v14430_v28  ;;  %v11117_v59 = vpack.c.bf16 %v14433_v63, %v14432_v1  ;;  %v14437_v8 = vand.u32 4294901760, %v10864_v62  ;;  %v14438_v18 = vand.u32 4294901760, %v10868_v4 }
  0x84   :  { %v11123_v17 = vpack.c.bf16 %v14435_v2, %v14434_v42  ;;  %9156 = vmatpush3.bf16.msra.mxu1 %v9155_v51  ;;  %v14439_v20 = vand.u32 4294901760, %v10870_v5  ;;  %v14440_v36 = vand.u32 4294901760, %v10876_v13  ;;  %v14441_v15 = vand.u32 4294901760, %v10878_v14 }
  0x85   :  { %v11129_v49 = vpack.c.bf16 %v14437_v8, %v14436_v45  ;;  %v14442_v28 = vand.u32 4294901760, %v10882_v21  ;;  %v14443_v47 = vand.u32 4294901760, %v10884_v23  ;;  %v14444_v51 = vand.u32 4294901760, %v10890_v29  ;;  %9158 = vmatprep.subr.bf16.mxu1 %v9157_v3 }
  0x86   :  { %v11135_v12 = vpack.c.bf16 %v14439_v20, %v14438_v18  ;;  %v11141_v19 = vpack.c.bf16 %v14441_v15, %v14440_v36  ;;  %v14445_v63 = vand.u32 4294901760, %v10892_v30  ;;  %v14446_v2 = vand.u32 4294901760, %v10897_v37 }
  0x87   :  { %v11147_v1 = vpack.c.bf16 %v14443_v47, %v14442_v28  ;;  %v11159_v8 = vpack.c.bf16 %v431_v31, %v424_v34  ;;  %v11161_v18 = vpack.c.bf16 %v319_v7, %v312_v25  ;;  %v11163_v20 = vpack.c.bf16 %v445_v50, %v438_v9 }
  0x88   :  { %v11153_v42 = vpack.c.bf16 %v14445_v63, %v14444_v51  ;;  %v11157_v45 = vpack.c.bf16 %v305_v46, %v14446_v2  ;;  %v11165_v36 = vpack.c.bf16 %v333_v11, %v326_v60  ;;  %9160 = vmatpush3.bf16.msra.mxu1 %v9159_v10  ;;  %v9163_v15 = vpack.c.bf16 %v335_v6, %v328_v52  ;;  %v978_v10 = vld [vmem:[#allocation7 + $0x110] sm:$0xff] }
  0x89   :  { %9162 = vmatprep.subr.bf16.mxu1 %v9161_v53  ;;  %v9165_v28 = vpack.c.bf16 %v10828_v26, %v10826_v22  ;;  %v9167_v3 = vpack.c.bf16 %v10833_v33, %v10831_v32  ;;  %v9169_v31 = vpack.c.bf16 %v10840_v40, %v10838_v39  ;;  %v9171_v11 = vpack.c.bf16 %v10846_v43, %v10842_v41  ;;  %v992_v26 = vld [vmem:[#allocation7 + $0x180] sm:$0xff]  ;;  %v993_v32 = vld [vmem:[#allocation7 + $0x188] sm:$0xff]  ;;  %v979_v53 = vld [vmem:[#allocation7 + $0x118] sm:$0xff] }
  0x8a   :  { %v9173_v46 = vpack.c.bf16 %v10854_v54, %v10848_v44  ;;  %v9175_v34 = vpack.c.bf16 %v10858_v56, %v10856_v55  ;;  %v9177_v22 = vpack.c.bf16 %v10864_v62, %v10862_v61  ;;  %v976_v33 = vld [vmem:[#allocation7 + $0x100] sm:$0xff]  ;;  %v9179_v39 = vpack.c.bf16 %v10870_v5, %v10868_v4  ;;  %v977_v43 = vld [vmem:[#allocation7 + $0x108] sm:$0xff]  ;;  %v994_v44 = vld [vmem:[#allocation7 + $0x190] sm:$0xff] }
  0x8b   :  { %v1057_v40 = vand.u32 4294901760, %v992_v26  ;;  %v1060_v41 = vand.u32 4294901760, %v993_v32  ;;  %v1009_v25 = vand.u32 4294901760, %v976_v33  ;;  %v995_v54 = vld [vmem:[#allocation7 + $0x198] sm:$0xff]  ;;  %v9181_v55 = vpack.c.bf16 %v10878_v14, %v10876_v13 }
  0x8c   :  { %9164 = vmatpush3.bf16.msra.mxu1 %v9163_v15  ;;  %v1012_v56 = vand.u32 4294901760, %v977_v43  ;;  %v1063_v61 = vand.u32 4294901760, %v994_v44  ;;  %v1066_v62 = vand.u32 4294901760, %v995_v54  ;;  %v9187_v5 = vpack.c.bf16 %v10899_v38, %v10897_v37  ;;  %v14463_v37 = vld [vmem:[#allocation35_spill] sm:$0xff]  ;;  %v14464_v38 = vld [vmem:[#allocation16_spill] sm:$0xff] }
  0x8d   :  { %9166 = vmatprep.subr.bf16.mxu1 %v9165_v28  ;;  %v11187_v7 = vpack.c.bf16 %v1060_v41, %v1057_v40  ;;  %v11189_v9 = vsub.f32 %v992_v26, %v1057_v40  ;;  %v11191_v50 = vsub.f32 %v993_v32, %v1060_v41  ;;  %v11193_v60 = vsub.f32 %v976_v33, %v1009_v25 }
  0x8e   :  { %v11195_v52 = vpack.c.bf16 %v1012_v56, %v1009_v25  ;;  %v11197_v6 = vsub.f32 %v977_v43, %v1012_v56  ;;  %v11199_v47 = vpack.c.bf16 %v1066_v62, %v1063_v61  ;;  %v11201_v13 = vsub.f32 %v994_v44, %v1063_v61  ;;  %v996_v25 = vld [vmem:[#allocation7 + $0x1a0] sm:$0xff]  ;;  %v997_v44 = vld [vmem:[#allocation7 + $0x1a8] sm:$0xff] }
  0x8f   :  { %452 = vmatmul.mubr.f32.vlgmr.msra.gmra.mrb[2].mxu1 %v10913_v58  ;;  %14447 = vst [vmem:[#allocation42_spill] sm:$0xff] %v11187_v7  ;;  %9294 = vmatprep.subr.bf16.mxu0 %v11187_v7  ;;  %v14144_v14 = vand.u32 4294901760, %v11189_v9  ;;  %v14142_v51 = vand.u32 4294901760, %v11191_v50  ;;  %v14136_v63 = vand.u32 4294901760, %v11193_v60  ;;  %v11207_v2 = vsub.f32 %v995_v54, %v1066_v62 }
  0x90   :  { %9168 = vmatpush3.bf16.msra.mxu1 %v9167_v3  ;;  %587 = vmatprep.mubr.f32.mxu1 %v10945_v24  ;;  %14448 = vst [vmem:[#allocation43_spill] sm:$0xff] %v11195_v52  ;;  %14449 = vst [vmem:[#allocation44_spill] sm:$0xff] %v11199_v47  ;;  %v14141_v15 = vand.u32 4294901760, %v11197_v6  ;;  %v1015_v28 = vand.u32 4294901760, %v978_v10  ;;  %v1018_v3 = vand.u32 4294901760, %v979_v53 }
  0x91   :  { %9170 = vmatprep.subr.bf16.mxu1 %v9169_v31  ;;  %9296 = vmatpush3.bf16.msra.mxu0 %v11195_v52  ;;  %v14137_v31 = vand.u32 4294901760, %v11201_v13  ;;  %v1243_v26 = vsub.f32 %v11191_v50, %v14142_v51  ;;  %v14140_v32 = vand.u32 4294901760, %v11207_v2  ;;  %v11312_v51 = vld [vmem:[#allocation7 + $0x1c0] sm:$0xff] }
  0x92   :  { %9298 = vmatprep.subr.bf16.mxu0 %v11199_v47  ;;  %v1131_v33 = vsub.f32 %v11197_v6, %v14141_v15  ;;  %v11226_v40 = vpack.c.bf16 %v1018_v3, %v1015_v28  ;;  %v11228_v41 = vsub.f32 %v978_v10, %v1015_v28  ;;  %v11230_v43 = vsub.f32 %v979_v53, %v1018_v3  ;;  %v11310_v15 = vld [vmem:[#allocation7 + $0x138] sm:$0xff]  ;;  %v14478_v47 = vld [vmem:[#allocation26_spill] sm:$0xff] }
  0x93   :  { %v1244_v56 = vand.u32 4294901760, %v1243_v26  ;;  %v1250_v62 = vsub.f32 %v11201_v13, %v14137_v31  ;;  %v1257_v10 = vsub.f32 %v11207_v2, %v14140_v32  ;;  %v1072_v26 = vand.u32 4294901760, %v997_v44 }
  0x94   :  { %9172 = vmatpush3.bf16.msra.mxu1 %v9171_v11  ;;  %v1236_v11 = vsub.f32 %v11189_v9, %v14144_v14  ;;  %14450 = vst [vmem:[#allocation45_spill] sm:$0xff] %v11226_v40  ;;  %v14139_v53 = vand.u32 4294901760, %v11228_v41  ;;  %v14138_v28 = vand.u32 4294901760, %v11230_v43  ;;  %v14473_v14 = vld [vmem:[#allocation24_spill] sm:$0xff] }
  0x95   :  { %9174 = vmatprep.subr.bf16.mxu1 %v9173_v46  ;;  %v1124_v46 = vsub.f32 %v11193_v60, %v14136_v63  ;;  %v1132_v63 = vand.u32 4294901760, %v1131_v33  ;;  %9300 = vmatpush3.bf16.msra.mxu0 %v11226_v40  ;;  %v1251_v3 = vand.u32 4294901760, %v1250_v62  ;;  %v1258_v31 = vand.u32 4294901760, %v1257_v10 }
  0x96   :  { %v1237_v54 = vand.u32 4294901760, %v1236_v11  ;;  %v1069_v11 = vand.u32 4294901760, %v996_v25  ;;  %v1145_v33 = vsub.f32 %v11230_v43, %v14138_v28  ;;  %v9185_v62 = vpack.c.bf16 %v10892_v30, %v10890_v29  ;;  %v14460_v30 = vld [vmem:[#allocation38_spill] sm:$0xff] }
  0x97   :  { %v1125_v61 = vand.u32 4294901760, %v1124_v46  ;;  %v11264_v10 = vpack.c.bf16 %v1258_v31, %v1251_v3  ;;  %v14461_v31 = vld [vmem:[#allocation41_spill] sm:$0xff] }
  0x98   :  { %9176 = vmatpush3.bf16.msra.mxu1 %v9175_v34  ;;  %v11241_v34 = vpack.c.bf16 %v1244_v56, %v1237_v54  ;;  %v9183_v54 = vpack.c.bf16 %v10884_v23, %v10882_v21  ;;  %v11256_v56 = vpack.c.bf16 %v1072_v26, %v1069_v11  ;;  %v14456_v21 = vld [vmem:[#allocation28_spill] sm:$0xff]  ;;  %v14457_v23 = vld [vmem:[#allocation29_spill] sm:$0xff] }
  0x99   :  { %9178 = vmatprep.subr.bf16.mxu1 %v9177_v22  ;;  %v11243_v46 = vpack.c.bf16 %v1132_v63, %v1125_v61  ;;  %v1138_v22 = vsub.f32 %v11228_v41, %v14139_v53  ;;  %v11258_v63 = vsub.f32 %v996_v25, %v1069_v11  ;;  %v11260_v61 = vsub.f32 %v997_v44, %v1072_v26  ;;  %v14459_v25 = vld [vmem:[#allocation32_spill] sm:$0xff]  ;;  %v14465_v3 = vld [vmem:[#allocation37_spill] sm:$0xff]  ;;  %v14467_v26 = vld [vmem:[#allocation18_spill] sm:$0xff] }
  0x9a   :  { %14451 = vst [vmem:[#allocation46_spill] sm:$0xff] %v11241_v34  ;;  %14453 = vst [vmem:[#allocation48_spill] sm:$0xff] %v11256_v56  ;;  %v1146_v53 = vand.u32 4294901760, %v1145_v33  ;;  %9302 = vmatprep.subr.bf16.mxu0 %v11256_v56  ;;  %v9193_v44 = vpack.c.bf16 %v14461_v31, %v14460_v30  ;;  %v14466_v11 = vld [vmem:[#allocation17_spill] sm:$0xff]  ;;  %v14469_v33 = vld [vmem:[#allocation20_spill] sm:$0xff] }
  0x9b   :  { %14452 = vst [vmem:[#allocation47_spill] sm:$0xff] %v11243_v46  ;;  %14454 = vst [vmem:[#allocation49_spill] sm:$0xff] %v11264_v10  ;;  %v1139_v28 = vand.u32 4294901760, %v1138_v22  ;;  %v14468_v22 = vld [vmem:[#allocation19_spill] sm:$0xff]  ;;  %v11304_v30 = vld [vmem:[#allocation7 + $0x1b0] sm:$0xff] }
  0x9c   :  { %9180 = vmatpush3.bf16.msra.mxu1 %v9179_v39  ;;  %v9189_v39 = vpack.c.bf16 %v14457_v23, %v14456_v21  ;;  %v14471_v21 = vld [vmem:[#allocation22_spill] sm:$0xff]  ;;  %v14472_v23 = vld [vmem:[#allocation23_spill] sm:$0xff]  ;;  %v11306_v31 = vld [vmem:[#allocation7 + $0x1b8] sm:$0xff] }
  0x9d   :  { %9182 = vmatprep.subr.bf16.mxu1 %v9181_v55  ;;  %v11267_v4 = vpack.c.bf16 %v1146_v53, %v1139_v28  ;;  %v14458_v55 = vld [vmem:[#allocation31_spill] sm:$0xff]  ;;  %v9195_v53 = vpack.c.bf16 %v11060_v27, %v11055_v16  ;;  %v11288_v16 = vld [vmem:[#allocation7 + $0x120] sm:$0xff]  ;;  %v14475_v56 = vld [vmem:[#allocation25_spill] sm:$0xff] }
  0x9e   :  { %v9191_v29 = vpack.c.bf16 %v14459_v25, %v14458_v55  ;;  %v14462_v28 = vld [vmem:[#allocation15_spill] sm:$0xff]  ;;  %v14157_v25 = vand.u32 4294901760, %v11288_v16 }
  0x9f   :  { %14455 = vst [vmem:[#allocation50_spill] sm:$0xff] %v11267_v4  ;;  %v11290_v27 = vld [vmem:[#allocation7 + $0x128] sm:$0xff] }
  0xa0   :  { %9184 = vmatpush3.bf16.msra.mxu1 %v9183_v54  ;;  %v14470_v54 = vld [vmem:[#allocation21_spill] sm:$0xff] }
  0xa1   :  { %9186 = vmatprep.subr.bf16.mxu1 %v9185_v62  ;;  %v14143_v62 = vand.u32 4294901760, %v11258_v63 }
  0xa4   :  { %9188 = vmatpush3.bf16.msra.mxu1 %v9187_v5  ;;  %v14145_v5 = vand.u32 4294901760, %v11260_v61 }
  0xa5   :  { %9190 = vmatprep.subr.bf16.mxu1 %v9189_v39  ;;  %v1264_v39 = vsub.f32 %v11258_v63, %v14143_v62  ;;  %v11314_v62 = vld [vmem:[#allocation7 + $0x1c8] sm:$0xff] }
  0xa6   :  { %v1271_v55 = vsub.f32 %v11260_v61, %v14145_v5  ;;  %v14482_v4 = vand.u32 4294901760, %v11314_v62 }
  0xa8   :  { %9192 = vmatpush3.bf16.msra.mxu1 %v9191_v29  ;;  %v14156_v29 = vand.u32 4294901760, %v11290_v27  ;;  %v1272_v32 = vand.u32 4294901760, %v1271_v55  ;;  %v14160_v55 = vand.u32 4294901760, %v11306_v31 }
  0xa9   :  { %9194 = vmatprep.subr.bf16.mxu1 %v9193_v44  ;;  %v11308_v44 = vld [vmem:[#allocation7 + $0x130] sm:$0xff] }
  0xaa   :  { %v11321_v5 = vpack.c.bf16 %v14156_v29, %v14157_v25  ;;  %v11333_v29 = vld [vmem:[#allocation7 + $0x140] sm:$0xff]  ;;  %v11343_v25 = vld [vmem:[#allocation7 + $0x1d0] sm:$0xff]  ;;  %v14479_v52 = vand.u32 4294901760, %v11308_v44 }
  0xab   :  { %v14172_v10 = vand.u32 4294901760, %v11333_v29  ;;  %v14171_v34 = vand.u32 4294901760, %v11343_v25 }
  0xac   :  { %9196 = vmatpush3.bf16.msra.mxu1 %v9195_v53  ;;  %v1265_v53 = vand.u32 4294901760, %v1264_v39  ;;  %14474 = vst [vmem:[#allocation28_spill] sm:$0xff] %v11321_v5  ;;  %v14161_v39 = vand.u32 4294901760, %v11304_v30  ;;  %9304 = vmatpush3.bf16.msra.mxu0 %v11321_v5  ;;  %v11345_v5 = vld [vmem:[#allocation7 + $0x1d8] sm:$0xff] }
  0xad   :  { %9198 = vmatprep.subr.bf16.mxu1 %v14462_v28 }
  0xae   :  { %v11324_v40 = vpack.c.bf16 %v1272_v32, %v1265_v53  ;;  %v11339_v32 = vpack.c.bf16 %v14160_v55, %v14161_v39  ;;  %v11341_v53 = vld [vmem:[#allocation7 + $0x148] sm:$0xff] }
  0xaf   :  { %590 = vmatmul.mubr.f32.vlgmr.msra.gmra.mrb[4].mxu1 %v14463_v37  ;;  %v14484_v39 = vld [vmem:[#allocation27_spill] sm:$0xff]  ;;  %v14169_v46 = vand.u32 4294901760, %v11341_v53  ;;  %v11434_v37 = vld [vmem:[#allocation7 + $0x170] sm:$0xff] }
  0xb0   :  { %9200 = vmatpush3.bf16.msra.mxu1 %v14464_v38  ;;  %694 = vmatprep.mubr.f32.mxu1 %v14465_v3  ;;  %14476 = vst [vmem:[#allocation29_spill] sm:$0xff] %v11324_v40  ;;  %v14162_v3 = vand.u32 4294901760, %v11310_v15  ;;  %14477 = vst [vmem:[#allocation31_spill] sm:$0xff] %v11339_v32  ;;  %v14481_v40 = vand.u32 4294901760, %v11312_v51 }
  0xb1   :  { %9202 = vmatprep.subr.bf16.mxu1 %v14466_v11  ;;  %9306 = vmatprep.subr.bf16.mxu0 %v11339_v32 }
  0xb2   :  { %v11352_v7 = vpack.c.bf16 %v14162_v3, %v14479_v52  ;;  %v11358_v55 = vpack.c.bf16 %v14482_v4, %v14481_v40  ;;  %v14170_v52 = vand.u32 4294901760, %v11345_v5  ;;  %v11368_v3 = vld [vmem:[#allocation7 + $0x150] sm:$0xff]  ;;  %v11370_v40 = vld [vmem:[#allocation7 + $0x158] sm:$0xff]  ;;  %v14485_v4 = vld [vmem:[#allocation30_spill] sm:$0xff] }
  0xb4   :  { %9204 = vmatpush3.bf16.msra.mxu1 %v14467_v26  ;;  %14480 = vst [vmem:[#allocation32_spill] sm:$0xff] %v11352_v7  ;;  %14483 = vst [vmem:[#allocation38_spill] sm:$0xff] %v11358_v55  ;;  %9308 = vmatpush3.bf16.msra.mxu0 %v11352_v7  ;;  %v11377_v7 = vpack.c.bf16 %v14169_v46, %v14172_v10  ;;  %v11383_v32 = vpack.c.bf16 %v14170_v52, %v14171_v34  ;;  %v11397_v52 = vld [vmem:[#allocation7 + $0x1e0] sm:$0xff]  ;;  %v11399_v34 = vld [vmem:[#allocation7 + $0x1e8] sm:$0xff] }
  0xb5   :  { %9206 = vmatprep.subr.bf16.mxu1 %v14468_v22  ;;  %9310 = vmatprep.subr.bf16.mxu0 %v11358_v55  ;;  %v14178_v55 = vand.u32 4294901760, %v11368_v3  ;;  %v11403_v10 = vld [vmem:[#allocation7 + $0x160] sm:$0xff] }
  0xb6   :  { %14486 = vst [vmem:[#allocation41_spill] sm:$0xff] %v11377_v7  ;;  %14487 = vst [vmem:[#allocation15_spill] sm:$0xff] %v11383_v32 }
  0xb8   :  { %9208 = vmatpush3.bf16.msra.mxu1 %v14469_v33  ;;  %9312 = vmatpush3.bf16.msra.mxu0 %v11377_v7  ;;  %v11405_v7 = vld [vmem:[#allocation7 + $0x168] sm:$0xff] }
  0xb9   :  { %9210 = vmatprep.subr.bf16.mxu1 %v14470_v54  ;;  %9314 = vmatprep.subr.bf16.mxu0 %v11383_v32  ;;  %v14491_v32 = vld [vmem:[#allocation36_spill] sm:$0xff] }
  0xbc   :  { %9212 = vmatpush3.bf16.msra.mxu1 %v14471_v21 }
  0xbd   :  { %9214 = vmatprep.subr.bf16.mxu1 %v14472_v23 }
  0xc0   :  { %9216 = vmatpush3.bf16.msra.mxu1 %v14473_v14 }
  0xc1   :  { %9218 = vmatprep.subr.bf16.mxu1 %v14475_v56  ;;  %v11414_v56 = vld [vmem:[#allocation7 + $0x1f8] sm:$0xff] }
  0xc2   :  { %v14185_v14 = vand.u32 4294901760, %v11414_v56 }
  0xc4   :  { %9220 = vmatpush3.bf16.msra.mxu1 %v14478_v47  ;;  %v14489_v47 = vld [vmem:[#allocation39_spill] sm:$0xff] }
  0xc5   :  { %9222 = vmatprep.subr.bf16.mxu1 %v14484_v39  ;;  %v14488_v39 = vld [vmem:[#allocation33_spill] sm:$0xff] }
  0xc8   :  { %9224 = vmatpush3.bf16.msra.mxu1 %v14485_v4  ;;  %v14177_v4 = vand.u32 4294901760, %v11370_v40 }
  0xc9   :  { %9226 = vmatprep.subr.bf16.mxu1 %v14488_v39  ;;  %v14181_v39 = vand.u32 4294901760, %v11399_v34 }
  0xca   :  { %v11395_v46 = vpack.c.bf16 %v14177_v4, %v14178_v55  ;;  %v14492_v4 = vld [vmem:[#allocation34_spill] sm:$0xff]  ;;  %v11412_v55 = vld [vmem:[#allocation7 + $0x1f0] sm:$0xff] }
  0xcc   :  { %9228 = vmatpush3.bf16.msra.mxu1 %v14489_v47  ;;  %14490 = vst [vmem:[#allocation16_spill] sm:$0xff] %v11395_v46  ;;  %9316 = vmatpush3.bf16.msra.mxu0 %v11395_v46  ;;  %v14184_v47 = vand.u32 4294901760, %v11397_v52  ;;  %v14182_v46 = vand.u32 4294901760, %v11405_v7 }
  0xcd   :  { %9230 = vmatprep.subr.bf16.mxu1 %v11093_v57 }
  0xce   :  { %v11421_v57 = vpack.c.bf16 %v14181_v39, %v14184_v47  ;;  %v11436_v39 = vld [vmem:[#allocation7 + $0x178] sm:$0xff] }
  0xcf   :  { %698 = vmatmul.mubr.f32.vlgmr.msra.gmra.mrb[6].mxu1 %v14491_v32  ;;  %v14183_v32 = vand.u32 4294901760, %v11403_v10  ;;  %v14187_v47 = vand.u32 4294901760, %v11436_v39 }
  0xd0   :  { %9232 = vmatpush3.bf16.msra.mxu1 %v11099_v35  ;;  %864 = vmatprep.mubr.f32.mxu1 %v14492_v4 }
  0xd1   :  { %9234 = vmatprep.subr.bf16.mxu1 %v11105_v48  ;;  %9318 = vmatprep.subr.bf16.mxu0 %v11421_v57  ;;  %v11430_v35 = vpack.c.bf16 %v14182_v46, %v14183_v32  ;;  %v14186_v48 = vand.u32 4294901760, %v11412_v55  ;;  %v14188_v32 = vand.u32 4294901760, %v11434_v37 }
  0xd3   :  { %9320 = vmatpush3.bf16.msra.mxu0 %v11430_v35  ;;  %v11445_v46 = vpack.c.bf16 %v14185_v14, %v14186_v48  ;;  %v9359_v14 = vpack.c.bf16 %v11197_v6, %v11193_v60  ;;  %v9361_v48 = vpack.c.bf16 %v11207_v2, %v11201_v13 }
  0xd4   :  { %9236 = vmatpush3.bf16.msra.mxu1 %v11111_v0  ;;  %v11455_v0 = vpack.c.bf16 %v14187_v47, %v14188_v32  ;;  %v9365_v47 = vpack.c.bf16 %v11260_v61, %v11258_v63  ;;  %v14494_v32 = vand.u32 4294901760, %v11288_v16 }
  0xd5   :  { %9238 = vmatprep.subr.bf16.mxu1 %v11117_v59  ;;  %9322 = vmatprep.subr.bf16.mxu0 %v11445_v46  ;;  %v9357_v59 = vpack.c.bf16 %v11191_v50, %v11189_v9 }
  0xd7   :  { %9324 = vmatpush3.bf16.msra.mxu0 %v11455_v0 }
  0xd8   :  { %9240 = vmatpush3.bf16.msra.mxu1 %v11123_v17  ;;  %9358 = vmatprep.subr.bf16.mxu0 %v9357_v59  ;;  %v9363_v17 = vpack.c.bf16 %v11230_v43, %v11228_v41  ;;  %v14495_v59 = vand.u32 4294901760, %v11290_v27 }
  0xd9   :  { %9242 = vmatprep.subr.bf16.mxu1 %v11129_v49  ;;  %v14493_v49 = vld [vmem:[#allocation40_spill] sm:$0xff] }
  0xda   :  { %1115 = vmatmul.mubr.f32.vlgmr.msra.gmra.mrb[0].mxu0 %v14493_v49  ;;  %v14496_v49 = vand.u32 4294901760, %v11304_v30 }
  0xdb   :  { %9360 = vmatpush3.bf16.msra.mxu0 %v9359_v14  ;;  %1482 = vmatprep.mubr.f32.mxu0 %v10945_v24  ;;  %v14497_v24 = vand.u32 4294901760, %v11306_v31 }
  0xdc   :  { %9244 = vmatpush3.bf16.msra.mxu1 %v11135_v12  ;;  %9362 = vmatprep.subr.bf16.mxu0 %v9361_v48  ;;  %v11477_v12 = vsub.f32 %v11288_v16, %v14494_v32  ;;  %v11488_v14 = vsub.f32 %v11304_v30, %v14496_v49  ;;  %v14499_v32 = vand.u32 4294901760, %v11310_v15  ;;  %v14500_v48 = vand.u32 4294901760, %v11312_v51 }
  0xdd   :  { %9246 = vmatprep.subr.bf16.mxu1 %v11141_v19  ;;  %v11482_v19 = vsub.f32 %v11290_v27, %v14495_v59  ;;  %v14502_v59 = vand.u32 4294901760, %v11333_v29 }
  0xdf   :  { %9364 = vmatpush3.bf16.msra.mxu0 %v9363_v17  ;;  %v9367_v16 = vpack.c.bf16 %v11482_v19, %v11477_v12  ;;  %v14501_v17 = vand.u32 4294901760, %v11314_v62 }
  0xe0   :  { %9248 = vmatpush3.bf16.msra.mxu1 %v11147_v1  ;;  %v11493_v1 = vsub.f32 %v11306_v31, %v14497_v24  ;;  %9366 = vmatprep.subr.bf16.mxu0 %v9365_v47  ;;  %v11508_v31 = vsub.f32 %v11310_v15, %v14499_v32  ;;  %v11514_v47 = vsub.f32 %v11312_v51, %v14500_v48  ;;  %v14505_v24 = vand.u32 4294901760, %v11191_v50 }
  0xe1   :  { %9250 = vmatprep.subr.bf16.mxu1 %v11153_v42  ;;  %v14498_v42 = vand.u32 4294901760, %v11308_v44  ;;  %v11526_v15 = vsub.f32 %v11333_v29, %v14502_v59  ;;  %v14507_v29 = vand.u32 4294901760, %v11197_v6  ;;  %v14508_v48 = vand.u32 4294901760, %v11201_v13 }
  0xe2   :  { %v9369_v27 = vpack.c.bf16 %v11493_v1, %v11488_v14  ;;  %v14511_v59 = vand.u32 4294901760, %v11230_v43  ;;  %v14514_v13 = vand.u32 4294901760, %v11258_v63  ;;  %v14517_v63 = vand.u32 4294901760, %v11370_v40 }
  0xe3   :  { %v11503_v30 = vsub.f32 %v11308_v44, %v14498_v42  ;;  %9368 = vmatpush3.bf16.msra.mxu0 %v9367_v16  ;;  %v14506_v42 = vand.u32 4294901760, %v11193_v60  ;;  %v14513_v60 = vand.u32 4294901760, %v11345_v5 }
  0xe4   :  { %9252 = vmatpush3.bf16.msra.mxu1 %v11157_v45  ;;  %v11519_v45 = vsub.f32 %v11314_v62, %v14501_v17  ;;  %9370 = vmatprep.subr.bf16.mxu0 %v9369_v27  ;;  %v14504_v62 = vand.u32 4294901760, %v11189_v9  ;;  %v14510_v17 = vand.u32 4294901760, %v11228_v41  ;;  %v14512_v9 = vand.u32 4294901760, %v11343_v25 }
  0xe5   :  { %9254 = vmatprep.subr.bf16.mxu1 %v11159_v8  ;;  %v9371_v44 = vpack.c.bf16 %v11508_v31, %v11503_v30  ;;  %v14503_v8 = vand.u32 4294901760, %v11341_v53  ;;  %v9423_v32 = vpack.c.bf16 %v14507_v29, %v14506_v42  ;;  %v11561_v6 = vsub.f32 %v11345_v5, %v14513_v60 }
  0xe6   :  { %v9373_v51 = vpack.c.bf16 %v11519_v45, %v11514_v47  ;;  %v9421_v16 = vpack.c.bf16 %v14505_v24, %v14504_v62  ;;  %v11556_v50 = vsub.f32 %v11343_v25, %v14512_v9  ;;  %v14516_v25 = vand.u32 4294901760, %v11368_v3 }
  0xe7   :  { %v11531_v49 = vsub.f32 %v11341_v53, %v14503_v8  ;;  %v14509_v53 = vand.u32 4294901760, %v11207_v2  ;;  %v14515_v2 = vand.u32 4294901760, %v11260_v61  ;;  %9372 = vmatpush3.bf16.msra.mxu0 %v9371_v44  ;;  %v11580_v61 = vsub.f32 %v11370_v40, %v14517_v63 }
  0xe8   :  { %9256 = vmatpush3.bf16.msra.mxu1 %v11161_v18  ;;  %v9427_v18 = vpack.c.bf16 %v14511_v59, %v14510_v17  ;;  %9374 = vmatprep.subr.bf16.mxu0 %v9373_v51  ;;  %v11575_v5 = vsub.f32 %v11368_v3, %v14516_v25  ;;  %v14518_v44 = vand.u32 4294901760, %v11397_v52  ;;  %v14519_v51 = vand.u32 4294901760, %v11399_v34  ;;  %v14530_v59 = vld [vmem:[#allocation27_spill] sm:$0xff] }
  0xe9   :  { %v9425_v27 = vpack.c.bf16 %v14509_v53, %v14508_v48  ;;  %9258 = vmatprep.subr.bf16.mxu1 %v11163_v20  ;;  %v9429_v41 = vpack.c.bf16 %v14515_v2, %v14514_v13  ;;  %v9375_v43 = vpack.c.bf16 %v11531_v49, %v11526_v15  ;;  %v9377_v20 = vpack.c.bf16 %v11561_v6, %v11556_v50 }
  0xea   :  { %v11586_v8 = vsub.f32 %v11397_v52, %v14518_v44  ;;  %v9379_v3 = vpack.c.bf16 %v11580_v61, %v11575_v5  ;;  %v14520_v52 = vand.u32 4294901760, %v11403_v10  ;;  %v14522_v24 = vand.u32 4294901760, %v11412_v55 }
  0xeb   :  { %9376 = vmatpush3.bf16.msra.mxu0 %v9375_v43  ;;  %v14525_v48 = vand.u32 4294901760, %v11436_v39  ;;  %v1172_v17 = vand.u32 4294901760, %v11508_v31  ;;  %v1291_v9 = vand.u32 4294901760, %v11514_v47  ;;  %v1298_v60 = vand.u32 4294901760, %v11519_v45 }
  0xec   :  { %9260 = vmatpush3.bf16.msra.mxu1 %v11165_v36  ;;  %v11591_v36 = vsub.f32 %v11399_v34, %v14519_v51  ;;  %9378 = vmatprep.subr.bf16.mxu0 %v9377_v20  ;;  %v11603_v40 = vsub.f32 %v11403_v10, %v14520_v52  ;;  %v14521_v34 = vand.u32 4294901760, %v11405_v7  ;;  %v11614_v42 = vsub.f32 %v11412_v55, %v14522_v24  ;;  %v14532_v20 = vld [vmem:[#allocation33_spill] sm:$0xff]  ;;  %v14533_v52 = vld [vmem:[#allocation39_spill] sm:$0xff] }
  0xed   :  { %9262 = vmatprep.subr.bf16.mxu1 %v14462_v28  ;;  %v9437_v2 = vpack.c.bf16 %v1298_v60, %v1291_v9  ;;  %v1186_v43 = vand.u32 4294901760, %v11531_v49  ;;  %v1305_v25 = vand.u32 4294901760, %v11556_v50  ;;  %v1312_v63 = vand.u32 4294901760, %v11561_v6 }
  0xee   :  { %v9381_v28 = vpack.c.bf16 %v11591_v36, %v11586_v8  ;;  %v11608_v62 = vsub.f32 %v11405_v7, %v14521_v34 }
  0xef   :  { %866 = vmatmul.mubr.f32.vlgmr.msra.gmra.mrb[8].mxu1 %v10913_v58  ;;  %9380 = vmatpush3.bf16.msra.mxu0 %v9379_v3 }
  0xf0   :  { %9264 = vmatpush3.bf16.msra.mxu1 %v14464_v38  ;;  %968 = vmatprep.mubr.f32.mxu1 %v14492_v4  ;;  %v14523_v38 = vand.u32 4294901760, %v11414_v56  ;;  %v9383_v10 = vpack.c.bf16 %v11608_v62, %v11603_v40 }
  0xf1   :  { %9266 = vmatprep.subr.bf16.mxu1 %v14466_v11  ;;  %9382 = vmatprep.subr.bf16.mxu0 %v9381_v28  ;;  %v14524_v11 = vand.u32 4294901760, %v11434_v37  ;;  %v9441_v28 = vpack.c.bf16 %v1312_v63, %v1305_v25 }
  0xf2   :  { %v11619_v29 = vsub.f32 %v11414_v56, %v14523_v38  ;;  %v11634_v56 = vsub.f32 %v11436_v39, %v14525_v48  ;;  %v14528_v39 = vld [vmem:[#allocation25_spill] sm:$0xff]  ;;  %v1193_v38 = vand.u32 4294901760, %v11575_v5 }
  0xf3   :  { %v11629_v55 = vsub.f32 %v11434_v37, %v14524_v11  ;;  %9384 = vmatpush3.bf16.msra.mxu0 %v9383_v10  ;;  %v14526_v37 = vld [vmem:[#allocation35_spill] sm:$0xff]  ;;  %v1200_v10 = vand.u32 4294901760, %v11580_v61 }
  0xf4   :  { %v9385_v7 = vpack.c.bf16 %v11619_v29, %v11614_v42  ;;  %9268 = vmatpush3.bf16.msra.mxu1 %v14467_v26  ;;  %v14527_v26 = vld [vmem:[#allocation24_spill] sm:$0xff] }
  0xf5   :  { %9270 = vmatprep.subr.bf16.mxu1 %v14468_v22  ;;  %v9387_v53 = vpack.c.bf16 %v11634_v56, %v11629_v55  ;;  %v1151_v22 = vand.u32 4294901760, %v11477_v12 }
  0xf6   :  { %9386 = vmatprep.subr.bf16.mxu0 %v9385_v7  ;;  %v14534_v7 = vld [vmem:[#allocation46_spill] sm:$0xff] }
  0xf7   :  { %9388 = vmatpush3.bf16.msra.mxu0 %v9387_v53  ;;  %v1152_v44 = vsub.f32 %v11477_v12, %v1151_v22  ;;  %v1319_v12 = vand.u32 4294901760, %v11586_v8 }
  0xf8   :  { %9272 = vmatpush3.bf16.msra.mxu1 %v14469_v33  ;;  %9422 = vmatprep.subr.bf16.mxu0 %v9421_v16  ;;  %v1158_v33 = vand.u32 4294901760, %v11482_v19 }
  0xf9   :  { %9274 = vmatprep.subr.bf16.mxu1 %v14470_v54  ;;  %v1277_v54 = vand.u32 4294901760, %v11488_v14  ;;  %v1153_v11 = vand.u32 4294901760, %v1152_v44  ;;  %v14538_v44 = vld [vmem:[#allocation29_spill] sm:$0xff] }
  0xfa   :  { %1485 = vmatmul.mubr.f32.vlgmr.msra.gmra.mrb[2].mxu0 %v14526_v37  ;;  %v1159_v51 = vsub.f32 %v11482_v19, %v1158_v33  ;;  %v1326_v19 = vand.u32 4294901760, %v11591_v36  ;;  %v9443_v37 = vpack.c.bf16 %v1200_v10, %v1193_v38 }
  0xfb   :  { %9424 = vmatpush3.bf16.msra.mxu0 %v9423_v32  ;;  %1759 = vmatprep.mubr.f32.mxu0 %v14492_v4  ;;  %v14529_v32 = vld [vmem:[#allocation26_spill] sm:$0xff]  ;;  %v1278_v34 = vsub.f32 %v11488_v14, %v1277_v54  ;;  %v1173_v14 = vsub.f32 %v11508_v31, %v1172_v17  ;;  %v1333_v31 = vand.u32 4294901760, %v11614_v42 }
  0xfc   :  { %9276 = vmatpush3.bf16.msra.mxu1 %v14471_v21  ;;  %9426 = vmatprep.subr.bf16.mxu0 %v9425_v27  ;;  %v1284_v21 = vand.u32 4294901760, %v11493_v1  ;;  %v1165_v27 = vand.u32 4294901760, %v11503_v30  ;;  %v1160_v48 = vand.u32 4294901760, %v1159_v51 }
  0xfd   :  { %9278 = vmatprep.subr.bf16.mxu1 %v14472_v23  ;;  %v9431_v23 = vpack.c.bf16 %v1158_v33, %v1151_v22  ;;  %v1279_v22 = vand.u32 4294901760, %v1278_v34  ;;  %v1320_v34 = vsub.f32 %v11586_v8, %v1319_v12 }
  0xfe   :  { %v9433_v16 = vpack.c.bf16 %v1284_v21, %v1277_v54  ;;  %v9435_v13 = vpack.c.bf16 %v1172_v17, %v1165_v27  ;;  %v1285_v24 = vsub.f32 %v11493_v1, %v1284_v21  ;;  %v1166_v53 = vsub.f32 %v11503_v30, %v1165_v27  ;;  %v14536_v21 = vld [vmem:[#allocation49_spill] sm:$0xff] }
  0xff   :  { %9428 = vmatpush3.bf16.msra.mxu0 %v9427_v18  ;;  %v14531_v18 = vld [vmem:[#allocation30_spill] sm:$0xff]  ;;  %v9445_v1 = vpack.c.bf16 %v1326_v19, %v1319_v12  ;;  %v1214_v54 = vand.u32 4294901760, %v11608_v62  ;;  %v1292_v30 = vsub.f32 %v11514_v47, %v1291_v9  ;;  %v1306_v47 = vsub.f32 %v11556_v50, %v1305_v25 }
 0x100   :  { %9280 = vmatpush3.bf16.msra.mxu1 %v14527_v26  ;;  %9430 = vmatprep.subr.bf16.mxu0 %v9429_v41  ;;  %v1179_v41 = vand.u32 4294901760, %v11526_v15  ;;  %v14535_v26 = vld [vmem:[#allocation47_spill] sm:$0xff]  ;;  %v1286_v33 = vand.u32 4294901760, %v1285_v24  ;;  %v1167_v27 = vand.u32 4294901760, %v1166_v53  ;;  %v1221_v9 = vand.u32 4294901760, %v11629_v55 }
 0x101   :  { %9282 = vmatprep.subr.bf16.mxu1 %v14528_v39  ;;  %v1207_v39 = vand.u32 4294901760, %v11603_v40  ;;  %v1307_v25 = vand.u32 4294901760, %v1306_v47  ;;  %v1327_v24 = vsub.f32 %v11591_v36, %v1326_v19  ;;  %v1871_v47 = vld [vmem:[#allocation5] sm:$0xff] }
 0x102   :  { %v9439_v3 = vpack.c.bf16 %v1186_v43, %v1179_v41  ;;  %v9337_v51 = vpack.c.bf16 %v1286_v33, %v1279_v22  ;;  %v1222_v19 = vsub.f32 %v11629_v55, %v1221_v9  ;;  %v14540_v55 = vld [vmem:[#allocation43_spill] sm:$0xff] }
 0x103   :  { %9432 = vmatpush3.bf16.msra.mxu0 %v9431_v23  ;;  %v1299_v23 = vsub.f32 %v11519_v45, %v1298_v60  ;;  %v9447_v17 = vpack.c.bf16 %v1214_v54, %v1207_v39  ;;  %v1313_v45 = vsub.f32 %v11561_v6, %v1312_v63  ;;  %v1228_v60 = vand.u32 4294901760, %v11634_v56 }
 0x104   :  { %9284 = vmatpush3.bf16.msra.mxu1 %v14529_v32  ;;  %9434 = vmatprep.subr.bf16.mxu0 %v9433_v16  ;;  %v1340_v16 = vand.u32 4294901760, %v11619_v29  ;;  %v9335_v32 = vpack.c.bf16 %v1160_v48, %v1153_v11  ;;  %v1328_v53 = vand.u32 4294901760, %v1327_v24  ;;  %v1223_v33 = vand.u32 4294901760, %v1222_v19 }
 0x105   :  { %9286 = vmatprep.subr.bf16.mxu1 %v14530_v59  ;;  %v1174_v59 = vand.u32 4294901760, %v1173_v14  ;;  %v1314_v63 = vand.u32 4294901760, %v1313_v45  ;;  %v1872_v45 = vld [vmem:[#allocation5 + $0x8] sm:$0xff] }
 0x106   :  { %v1341_v14 = vsub.f32 %v11619_v29, %v1340_v16 }
 0x107   :  { %9436 = vmatpush3.bf16.msra.mxu0 %v9435_v13  ;;  %v1180_v13 = vsub.f32 %v11526_v15, %v1179_v41  ;;  %v9451_v15 = vpack.c.bf16 %v1228_v60, %v1221_v9  ;;  %v1194_v41 = vsub.f32 %v11575_v5, %v1193_v38  ;;  %v9345_v5 = vpack.c.bf16 %v1314_v63, %v1307_v25  ;;  %v1873_v9 = vld [vmem:[#allocation5 + $0x10] sm:$0xff]  ;;  %v1878_v25 = vld [vmem:[#allocation5 + $0x38] sm:$0xff] }
 0x108   :  { %9288 = vmatpush3.bf16.msra.mxu1 %v14531_v18  ;;  %9438 = vmatprep.subr.bf16.mxu0 %v9437_v2  ;;  %v1187_v2 = vsub.f32 %v11531_v49, %v1186_v43  ;;  %v9449_v18 = vpack.c.bf16 %v1340_v16, %v1333_v31  ;;  %v9339_v49 = vpack.c.bf16 %v1174_v59, %v1167_v27  ;;  %v14546_v16 = vld [vmem:[#allocation31_spill] sm:$0xff]  ;;  %v14548_v27 = vld [vmem:[#allocation38_spill] sm:$0xff] }
 0x109   :  { %9290 = vmatprep.subr.bf16.mxu1 %v14532_v20  ;;  %v14537_v20 = vld [vmem:[#allocation50_spill] sm:$0xff]  ;;  %v1201_v43 = vsub.f32 %v11580_v61, %v1200_v10  ;;  %v1181_v50 = vand.u32 4294901760, %v1180_v13  ;;  %v1208_v61 = vsub.f32 %v11603_v40, %v1207_v39  ;;  %v1215_v38 = vsub.f32 %v11608_v62, %v1214_v54  ;;  %v14550_v59 = vld [vmem:[#allocation15_spill] sm:$0xff] }
 0x10a   :  { %v1188_v6 = vand.u32 4294901760, %v1187_v2  ;;  %v1321_v10 = vand.u32 4294901760, %v1320_v34  ;;  %v14539_v54 = vld [vmem:[#allocation42_spill] sm:$0xff] }
 0x10b   :  { %9440 = vmatpush3.bf16.msra.mxu0 %v9439_v3  ;;  %v1293_v3 = vand.u32 4294901760, %v1292_v30  ;;  %v1202_v11 = vand.u32 4294901760, %v1201_v43  ;;  %v1209_v36 = vand.u32 4294901760, %v1208_v61  ;;  %v1216_v12 = vand.u32 4294901760, %v1215_v38  ;;  %v14543_v30 = vld [vmem:[#allocation45_spill] sm:$0xff] }
 0x10c   :  { %9292 = vmatpush3.bf16.msra.mxu1 %v14533_v52  ;;  %9442 = vmatprep.subr.bf16.mxu0 %v9441_v28  ;;  %v1300_v28 = vand.u32 4294901760, %v1299_v23  ;;  %v9343_v48 = vpack.c.bf16 %v1188_v6, %v1181_v50  ;;  %v9349_v40 = vpack.c.bf16 %v1328_v53, %v1321_v10  ;;  %v14544_v23 = vld [vmem:[#allocation48_spill] sm:$0xff]  ;;  %v1916_v38 = vand.u32 4294901760, %v1878_v25 }
 0x10d   :  { %9326 = vmatprep.subr.bf16.mxu1 %v14534_v7  ;;  %v1195_v7 = vand.u32 4294901760, %v1194_v41  ;;  %v9351_v22 = vpack.c.bf16 %v1216_v12, %v1209_v36  ;;  %v1877_v6 = vld [vmem:[#allocation5 + $0x30] sm:$0xff]  ;;  %v1880_v36 = vld [vmem:[#allocation5 + $0x48] sm:$0xff] }
 0x10e   :  { %v9341_v52 = vpack.c.bf16 %v1300_v28, %v1293_v3  ;;  %v1874_v3 = vld [vmem:[#allocation5 + $0x18] sm:$0xff]  ;;  %v1901_v28 = vand.u32 4294901760, %v1873_v9  ;;  %v1913_v61 = vand.u32 4294901760, %v1877_v6  ;;  %v11746_v53 = vsub.f32 %v1878_v25, %v1916_v38 }
 0x10f   :  { %970 = vmatmul.mubr.f32.vlgmr.msra.gmra.mrb[10].mxu1 %v10913_v58  ;;  %9444 = vmatpush3.bf16.msra.mxu0 %v9443_v37  ;;  %v1334_v37 = vsub.f32 %v11614_v42, %v1333_v31  ;;  %v9347_v8 = vpack.c.bf16 %v1202_v11, %v1195_v7  ;;  %v14545_v31 = vld [vmem:[#allocation28_spill] sm:$0xff]  ;;  %v1904_v41 = vand.u32 4294901760, %v1874_v3  ;;  %v1922_v19 = vand.u32 4294901760, %v1880_v36 }
 0x110   :  { %9328 = vmatpush3.bf16.msra.mxu1 %v14535_v26  ;;  %1345 = vmatprep.mubr.f32.mxu1 %v14492_v4  ;;  %v1342_v26 = vand.u32 4294901760, %v1341_v14  ;;  %v11730_v24 = vsub.f32 %v1873_v9, %v1901_v28  ;;  %v11744_v10 = vsub.f32 %v1877_v6, %v1913_v61 }
 0x111   :  { %9330 = vmatprep.subr.bf16.mxu1 %v14536_v21  ;;  %9446 = vmatprep.subr.bf16.mxu0 %v9445_v1  ;;  %v1229_v1 = vsub.f32 %v11634_v56, %v1228_v60  ;;  %v1335_v62 = vand.u32 4294901760, %v1334_v37  ;;  %v14541_v56 = vld [vmem:[#allocation37_spill] sm:$0xff]  ;;  %v14542_v21 = vld [vmem:[#allocation44_spill] sm:$0xff]  ;;  %v14236_v60 = vmov 0.0|0.0   ;;  %v11732_v7 = vsub.f32 %v1874_v3, %v1904_v41 }
 0x112   :  { %v14552_v37 = vld [vmem:[#allocation36_spill] sm:$0xff] }
 0x113   :  { %9448 = vmatpush3.bf16.msra.mxu0 %v9447_v17  ;;  %v1230_v42 = vand.u32 4294901760, %v1229_v1  ;;  %v9353_v29 = vpack.c.bf16 %v1342_v26, %v1335_v62  ;;  %v14549_v17 = vld [vmem:[#allocation41_spill] sm:$0xff]  ;;  %v1881_v26 = vld [vmem:[#allocation5 + $0x50] sm:$0xff] }
 0x114   :  { %9332 = vmatpush3.bf16.msra.mxu1 %v14537_v20  ;;  %9450 = vmatprep.subr.bf16.mxu0 %v9449_v18  ;;  %v14551_v20 = vld [vmem:[#allocation16_spill] sm:$0xff] }
 0x115   :  { %9334 = vmatprep.subr.bf16.mxu1 %v14538_v44  ;;  %v9355_v39 = vpack.c.bf16 %v1230_v42, %v1223_v33  ;;  %v1895_v44 = vand.u32 4294901760, %v1871_v47  ;;  %v1925_v42 = vand.u32 4294901760, %v1881_v26 }
 0x117   :  { %9452 = vmatpush3.bf16.msra.mxu0 %v9451_v15  ;;  %v1875_v15 = vld [vmem:[#allocation5 + $0x20] sm:$0xff] }
 0x118   :  { %9336 = vmatpush3.bf16.msra.mxu1 %v9335_v32  ;;  %v14547_v32 = vld [vmem:[#allocation32_spill] sm:$0xff]  ;;  %9485 = vmatprep.subr.bf16.mxu0 %v14236_v60  ;;  %v1907_v43 = vand.u32 4294901760, %v1875_v15 }
 0x119   :  { %9338 = vmatprep.subr.bf16.mxu1 %v9337_v51  ;;  %v1898_v51 = vand.u32 4294901760, %v1872_v45 }
 0x11a   :  { %1761 = vmatmul.mubr.f32.vlgmr.msra.gmra.mrb[4].mxu0 %v10913_v58  ;;  %v11734_v11 = vsub.f32 %v1875_v15, %v1907_v43 }
 0x11b   :  { %v11724_v63 = vpack.c.bf16 %v1898_v51, %v1895_v44  ;;  %v11728_v34 = vsub.f32 %v1872_v45, %v1898_v51  ;;  %v14230_v45 = vmov 0.0   ;;  %v14201_v51 = vand.u32 4294901760, %v11732_v7 }
 0x11c   :  { %9340 = vmatpush3.bf16.msra.mxu1 %v9339_v49  ;;  %v1876_v49 = vld [vmem:[#allocation5 + $0x28] sm:$0xff]  ;;  %7873 = vmatprep.mubr.msk.f32.mxu0 %vm10727_vm0, %v14230_v45  ;;  %v14200_v6 = vand.u32 4294901760, %v11734_v11 }
 0x11d   :  { %9342 = vmatprep.subr.bf16.mxu1 %v9341_v52  ;;  %v1910_v50 = vand.u32 4294901760, %v1876_v49  ;;  %v11726_v52 = vsub.f32 %v1871_v47, %v1895_v44  ;;  %9487 = vmatpush3.bf16.msra.mxu0 %v11724_v63 }
 0x11e   :  { %9488 = vmatprep.subr.bf16.mxu0 %v14236_v60 }
 0x11f   :  { %v11750_v14 = vpack.c.bf16 %v1910_v50, %v1907_v43 }
 0x120   :  { %9344 = vmatpush3.bf16.msra.mxu1 %v9343_v48  ;;  %v11737_v48 = vpack.c.bf16 %v1904_v41, %v1901_v28 }
 0x121   :  { %9346 = vmatprep.subr.bf16.mxu1 %v9345_v5  ;;  %v11739_v5 = vsub.f32 %v1876_v49, %v1910_v50  ;;  %v2010_v49 = vsub.f32 %v11732_v7, %v14201_v51 }
 0x122   :  { %9490 = vmatpush3.bf16.msra.mxu0 %v11737_v48 }
 0x123   :  { %9491 = vmatprep.subr.bf16.mxu0 %v14236_v60  ;;  %v2011_v50 = vand.u32 4294901760, %v2010_v49  ;;  %v14199_v25 = vand.u32 4294901760, %v11739_v5 }
 0x124   :  { %9348 = vmatpush3.bf16.msra.mxu1 %v9347_v8  ;;  %v11757_v8 = vpack.c.bf16 %v1916_v38, %v1913_v61  ;;  %v2017_v38 = vsub.f32 %v11734_v11, %v14200_v6 }
 0x125   :  { %9350 = vmatprep.subr.bf16.mxu1 %v9349_v40 }
 0x126   :  { %9493 = vmatpush3.bf16.msra.mxu0 %v11750_v14 }
 0x127   :  { %9494 = vmatprep.subr.bf16.mxu0 %v14236_v60 }
 0x128   :  { %9352 = vmatpush3.bf16.msra.mxu1 %v9351_v22  ;;  %v1882_v22 = vld [vmem:[#allocation5 + $0x58] sm:$0xff] }
 0x129   :  { %9354 = vmatprep.subr.bf16.mxu1 %v9353_v29  ;;  %v1928_v29 = vand.u32 4294901760, %v1882_v22 }
 0x12a   :  { %9496 = vmatpush3.bf16.msra.mxu0 %v11757_v8 }
 0x12b   :  { %9497 = vmatprep.subr.bf16.mxu0 %v14236_v60 }
 0x12c   :  { %9356 = vmatpush3.bf16.msra.mxu1 %v9355_v39 }
 0x12d   :  { %9390 = vmatprep.subr.bf16.mxu1 %v14539_v54 }
 0x12f   :  { %1347 = vmatmul.mubr.f32.vlgmr.msra.gmra.mrb[12].mxu1 %v10913_v58 }
 0x130   :  { %9392 = vmatpush3.bf16.msra.mxu1 %v14540_v55  ;;  %1589 = vmatprep.mubr.f32.mxu1 %v14541_v56  ;;  %v1884_v56 = vld [vmem:[#allocation5 + $0x68] sm:$0xff] }
 0x131   :  { %9394 = vmatprep.subr.bf16.mxu1 %v14542_v21 }
 0x134   :  { %9396 = vmatpush3.bf16.msra.mxu1 %v14543_v30 }
 0x135   :  { %9398 = vmatprep.subr.bf16.mxu1 %v14544_v23 }
 0x138   :  { %9400 = vmatpush3.bf16.msra.mxu1 %v14545_v31 }
 0x139   :  { %9402 = vmatprep.subr.bf16.mxu1 %v14546_v16 }
 0x13c   :  { %9404 = vmatpush3.bf16.msra.mxu1 %v14547_v32 }
 0x13d   :  { %9406 = vmatprep.subr.bf16.mxu1 %v14548_v27 }
 0x140   :  { %9408 = vmatpush3.bf16.msra.mxu1 %v14549_v17 }
 0x141   :  { %9410 = vmatprep.subr.bf16.mxu1 %v14550_v59 }
 0x142   :  { %v6841_v13 = vpop.f32.mrb[0].mxu1 }
 0x143   :  { %v6842_v2 = vpop.f32.mrb[1].mxu1 }
 0x144   :  { %v11717_v18 = vadd.f32 %v6842_v2, %v6841_v13  ;;  %9412 = vmatpush3.bf16.msra.mxu1 %v14551_v20  ;;  %v1995_v2 = vand.u32 4294901760, %v11728_v34 }
 0x145   :  { %9414 = vmatprep.subr.bf16.mxu1 %v11421_v57 }
 0x146   :  { %v1996_v44 = vsub.f32 %v11728_v34, %v1995_v2 }
 0x148   :  { %9416 = vmatpush3.bf16.msra.mxu1 %v11430_v35  ;;  %v1997_v28 = vand.u32 4294901760, %v1996_v44 }
 0x149   :  { %9418 = vmatprep.subr.bf16.mxu1 %v11445_v46 }
 0x14c   :  { %9420 = vmatpush3.bf16.msra.mxu1 %v11455_v0 }
 0x14d   :  { %9454 = vmatprep.subr.bf16.mxu1 %v14539_v54  ;;  %v11779_v54 = vpack.c.bf16 %v1928_v29, %v1925_v42 }
 0x14f   :  { %1593 = vmatmul.mubr.f32.vlgmr.msra.gmra.mrb[14].mxu1 %v14552_v37  ;;  %v2024_v37 = vsub.f32 %v11739_v5, %v14199_v25 }
 0x150   :  { %9456 = vmatpush3.bf16.msra.mxu1 %v14540_v55  ;;  %1863 = vmatprep.mubr.f32.mxu1 %v14492_v4  ;;  %v1879_v4 = vld [vmem:[#allocation5 + $0x40] sm:$0xff] }
 0x151   :  { %9458 = vmatprep.subr.bf16.mxu1 %v14542_v21  ;;  %v1919_v12 = vand.u32 4294901760, %v1879_v4  ;;  %v1883_v55 = vld [vmem:[#allocation5 + $0x60] sm:$0xff] }
 0x152   :  { %v1931_v21 = vand.u32 4294901760, %v1883_v55 }
 0x153   :  { %v11770_v40 = vpack.c.bf16 %v1922_v19, %v1919_v12 }
 0x154   :  { %9460 = vmatpush3.bf16.msra.mxu1 %v14543_v30  ;;  %v1934_v30 = vand.u32 4294901760, %v1884_v56 }
 0x155   :  { %9462 = vmatprep.subr.bf16.mxu1 %v14544_v23  ;;  %9499 = vmatpush3.bf16.msra.mxu0 %v11770_v40  ;;  %v1885_v23 = vld [vmem:[#allocation5 + $0x70] sm:$0xff] }
 0x156   :  { %9500 = vmatprep.subr.bf16.mxu0 %v14236_v60 }
 0x158   :  { %9464 = vmatpush3.bf16.msra.mxu1 %v14545_v31  ;;  %v1886_v31 = vld [vmem:[#allocation5 + $0x78] sm:$0xff] }
 0x159   :  { %9466 = vmatprep.subr.bf16.mxu1 %v14546_v16  ;;  %9502 = vmatpush3.bf16.msra.mxu0 %v11779_v54  ;;  %v11788_v16 = vsub.f32 %v1879_v4, %v1919_v12  ;;  %v1940_v13 = vand.u32 4294901760, %v1886_v31  ;;  %v2018_v4 = vand.u32 4294901760, %v2017_v38  ;;  %v14198_v12 = vand.u32 4294901760, %v11744_v10 }
 0x15a   :  { %9503 = vmatprep.subr.bf16.mxu0 %v14236_v60 }
 0x15b   :  { %v11810_v47 = vsub.f32 %v1886_v31, %v1940_v13 }
 0x15c   :  { %9468 = vmatpush3.bf16.msra.mxu1 %v14547_v32  ;;  %v11790_v32 = vsub.f32 %v1880_v36, %v1922_v19  ;;  %v2025_v36 = vand.u32 4294901760, %v2024_v37  ;;  %v14197_v19 = vand.u32 4294901760, %v11746_v53 }
 0x15d   :  { %9470 = vmatprep.subr.bf16.mxu1 %v14548_v27  ;;  %v11792_v27 = vsub.f32 %v1881_v26, %v1925_v42  ;;  %v14196_v42 = vand.u32 4294901760, %v11788_v16 }
 0x15e   :  { %v2038_v26 = vsub.f32 %v11746_v53, %v14197_v19 }
 0x15f   :  { %v14194_v31 = vand.u32 4294901760, %v11792_v27 }
 0x160   :  { %9472 = vmatpush3.bf16.msra.mxu1 %v14549_v17  ;;  %v11797_v17 = vsub.f32 %v1883_v55, %v1931_v21 }
 0x161   :  { %9474 = vmatprep.subr.bf16.mxu1 %v14550_v59  ;;  %v1937_v59 = vand.u32 4294901760, %v1885_v23 }
 0x162   :  { %v6876_v1 = vpop.f32.mrb[2].mxu1 }
 0x163   :  { %v6877_v62 = vpop.f32.mrb[3].mxu1 }
 0x164   :  { %v6878_v33 = vadd.f32 %v6877_v62, %v6876_v1  ;;  %9476 = vmatpush3.bf16.msra.mxu1 %v14551_v20  ;;  %v11808_v20 = vsub.f32 %v1885_v23, %v1937_v59  ;;  %v11846_v1 = vpack.c.bf16 %v2025_v36, %v2018_v4  ;;  %v2031_v62 = vsub.f32 %v11744_v10, %v14198_v12 }
 0x165   :  { %9478 = vmatprep.subr.bf16.mxu1 %v11421_v57  ;;  %v11785_v57 = vpack.c.bf16 %v1934_v30, %v1931_v21 }
 0x166   :  { %v11777_v39 = vadd.f32 %v6878_v33, %v11717_v18  ;;  %v11806_v18 = vpack.c.bf16 %v1940_v13, %v1937_v59  ;;  %v2039_v33 = vand.u32 4294901760, %v2038_v26 }
 0x167   :  { %9505 = vmatpush3.bf16.msra.mxu0 %v11785_v57 }
 0x168   :  { %9480 = vmatpush3.bf16.msra.mxu1 %v11430_v35  ;;  %v11794_v35 = vsub.f32 %v1882_v22, %v1928_v29  ;;  %9506 = vmatprep.subr.bf16.mxu0 %v14236_v60  ;;  %v2032_v22 = vand.u32 4294901760, %v2031_v62  ;;  %v14195_v29 = vand.u32 4294901760, %v11790_v32 }
 0x169   :  { %9482 = vmatprep.subr.bf16.mxu1 %v11445_v46  ;;  %v11799_v46 = vsub.f32 %v1884_v56, %v1934_v30  ;;  %v2045_v56 = vsub.f32 %v11788_v16, %v14196_v42 }
 0x16a   :  { %v11856_v55 = vpack.c.bf16 %v2039_v33, %v2032_v22  ;;  %v2052_v21 = vsub.f32 %v11790_v32, %v14195_v29  ;;  %v14193_v59 = vand.u32 4294901760, %v11794_v35  ;;  %v14190_v33 = vand.u32 4294901760, %v11808_v20 }
 0x16b   :  { %9508 = vmatpush3.bf16.msra.mxu0 %v11806_v18  ;;  %v2046_v30 = vand.u32 4294901760, %v2045_v56  ;;  %v14191_v38 = vand.u32 4294901760, %v11799_v46  ;;  %v14189_v56 = vand.u32 4294901760, %v11810_v47 }
 0x16c   :  { %9484 = vmatpush3.bf16.msra.mxu1 %v11455_v0  ;;  %v1988_v0 = vand.u32 4294901760, %v11726_v52  ;;  %9509 = vmatprep.subr.bf16.mxu0 %v14236_v60  ;;  %v2053_v23 = vand.u32 4294901760, %v2052_v21 }
 0x16d   :  { %9629 = vmatprep.subr.bf16.mxu1 %v14236_v60  ;;  %v2080_v62 = vsub.f32 %v11799_v46, %v14191_v38 }
 0x16e   :  { %v1989_v9 = vsub.f32 %v11726_v52, %v1988_v0  ;;  %v11866_v44 = vpack.c.bf16 %v2053_v23, %v2046_v30  ;;  %v2094_v30 = vsub.f32 %v11810_v47, %v14189_v56 }
 0x16f   :  { %1865 = vmatmul.mubr.f32.vlgmr.msra.gmra.mrb[16].mxu1 %v10913_v58  ;;  %v14202_v58 = vand.u32 4294901760, %v11730_v24  ;;  %v2081_v22 = vand.u32 4294901760, %v2080_v62 }
 0x170   :  { %8083 = vmatprep.mubr.msk.f32.mxu1 %vm10727_vm0, %v14230_v45  ;;  %v1990_v3 = vand.u32 4294901760, %v1989_v9 }
 0x171   :  { %v2003_v15 = vsub.f32 %v11730_v24, %v14202_v58 }
 0x172   :  { %v11832_v41 = vpack.c.bf16 %v1997_v28, %v1990_v3  ;;  %v2059_v3 = vsub.f32 %v11792_v27, %v14194_v31  ;;  %v2066_v28 = vsub.f32 %v11794_v35, %v14193_v59 }
 0x173   :  { %v2004_v43 = vand.u32 4294901760, %v2003_v15 }
 0x174   :  { %v2060_v49 = vand.u32 4294901760, %v2059_v3  ;;  %v9534_v3 = vpack.c.bf16 %v11728_v34, %v11726_v52  ;;  %v14557_v52 = vand.u32 4294901760, %v11734_v11  ;;  %v14558_v34 = vand.u32 4294901760, %v11739_v5 }
 0x175   :  { %v11836_v61 = vpack.c.bf16 %v2011_v50, %v2004_v43  ;;  %v2067_v43 = vand.u32 4294901760, %v2066_v28  ;;  %v14192_v50 = vand.u32 4294901760, %v11797_v17  ;;  %v9537_v28 = vpack.c.bf16 %v11732_v7, %v11730_v24 }
 0x177   :  { %v11877_v4 = vpack.c.bf16 %v2067_v43, %v2060_v49  ;;  %v2073_v36 = vsub.f32 %v11797_v17, %v14192_v50  ;;  %v9543_v49 = vpack.c.bf16 %v11746_v53, %v11744_v10 }
 0x179   :  { %v2074_v26 = vand.u32 4294901760, %v2073_v36  ;;  %v9546_v36 = vpack.c.bf16 %v11790_v32, %v11788_v16 }
 0x17b   :  { %v9528_v21 = vpack.c.bf16 %v2081_v22, %v2074_v26 }
 0x182   :  { %v6911_v13 = vpop.f32.mrb[4].mxu1 }
 0x183   :  { %v6912_v9 = vpop.f32.mrb[5].mxu1 }
 0x184   :  { %v6913_v15 = vadd.f32 %v6912_v9, %v6911_v13  ;;  %v2095_v13 = vand.u32 4294901760, %v2094_v30  ;;  %v9552_v30 = vpack.c.bf16 %v11799_v46, %v11797_v17 }
 0x186   :  { %v592_v37 = vadd.f32 %v6913_v15, %v11777_v39  ;;  %v2087_v39 = vsub.f32 %v11808_v20, %v14190_v33  ;;  %v9540_v15 = vpack.c.bf16 %v11739_v5, %v11734_v11  ;;  %v14563_v11 = vand.u32 4294901760, %v11792_v27 }
 0x187   :  { %v14564_v5 = vand.u32 4294901760, %v11794_v35 }
 0x188   :  { %v2088_v23 = vand.u32 4294901760, %v2087_v39  ;;  %v9549_v39 = vpack.c.bf16 %v11794_v35, %v11792_v27  ;;  %v2550_v27 = vld [vmem:[#allocation5 + $0xe8] sm:$0xff] }
 0x189   :  { %v2601_v35 = vand.u32 4294901760, %v2550_v27 }
 0x18a   :  { %v9531_v9 = vpack.c.bf16 %v2095_v13, %v2088_v23  ;;  %v9555_v23 = vpack.c.bf16 %v11810_v47, %v11808_v20 }
 0x1a2   :  { %v6946_v43 = vpop.f32.mrb[6].mxu1 }
 0x1a3   :  { %v6947_v62 = vpop.f32.mrb[7].mxu1 }
 0x1a4   :  { %v6948_v26 = vadd.f32 %v6947_v62, %v6946_v43 }
 0x1a6   :  { %v700_v22 = vadd.f32 %v6948_v26, %v592_v37 }
 0x1ad   :  { %v7051_v29 = vpop.f32.mrb[0].mxu0 }
 0x1ae   :  { %v7052_v37 = vpop.f32.mrb[1].mxu0 }
 0x1af   :  { %v7053_v43 = vadd.f32 %v7052_v37, %v7051_v29 }
 0x1c2   :  { %v6981_v13 = vpop.f32.mrb[8].mxu1 }
 0x1c3   :  { %v6982_v56 = vpop.f32.mrb[9].mxu1 }
 0x1c4   :  { %v6983_v33 = vadd.f32 %v6982_v56, %v6981_v13 }
 0x1c6   :  { %v868_v38 = vadd.f32 %v6983_v33, %v700_v22 }
 0x1cd   :  { %v7121_v62 = vpop.f32.mrb[2].mxu0 }
 0x1ce   :  { %v7122_v19 = vpop.f32.mrb[3].mxu0 }
 0x1cf   :  { %v7123_v25 = vadd.f32 %v7122_v19, %v7121_v62 }
 0x1e2   :  { %v7016_v50 = vpop.f32.mrb[10].mxu1 }
 0x1e3   :  { %v7017_v59 = vpop.f32.mrb[11].mxu1 }
 0x1e4   :  { %v7018_v31 = vadd.f32 %v7017_v59, %v7016_v50 }
 0x1e6   :  { %v11909_v42 = vadd.f32 %v7018_v31, %v868_v38 }
 0x1e8   :  { %v1870_v26 = vmax.f32 %v11909_v42, 0.0 }
 0x1ea   :  { %v11912_v12 = vand.u32 4294901760, %v1870_v26 }
 0x1ec   :  { %v11915_v6 = vsub.f32 %v1870_v26, %v11912_v12 }
 0x1ed   :  { %v7191_v31 = vpop.f32.mrb[4].mxu0 }
 0x1ee   :  { %v14203_v33 = vand.u32 4294901760, %v11915_v6  ;;  %v7192_v50 = vpop.f32.mrb[5].mxu0 }
 0x1ef   :  { %v11921_v29 = vadd.f32 %v7192_v50, %v7191_v31  ;;  %v2544_v31 = vld [vmem:[#allocation5 + $0xb8] sm:$0xff]  ;;  %v2545_v50 = vld [vmem:[#allocation5 + $0xc0] sm:$0xff] }
 0x1f0   :  { %v1978_v59 = vsub.f32 %v11915_v6, %v14203_v33 }
 0x1f2   :  { %v1979_v38 = vand.u32 4294901760, %v1978_v59  ;;  %v2543_v59 = vld [vmem:[#allocation5 + $0xb0] sm:$0xff] }
 0x1f4   :  { %7874 = vmatmul.mubr.f32.vlgmr.msra.gmra.mrb[6].mxu0 %v1979_v38 }
 0x1f5   :  { %9511 = vmatpush3.bf16.msra.mxu0 %v11832_v41  ;;  %7908 = vmatprep.mubr.msk.f32.mxu0 %vm10727_vm0, %v14230_v45 }
 0x1f6   :  { %9512 = vmatprep.subr.bf16.mxu0 %v14236_v60 }
 0x1f9   :  { %9514 = vmatpush3.bf16.msra.mxu0 %v11836_v61  ;;  %v2537_v61 = vld [vmem:[#allocation5 + $0x80] sm:$0xff] }
 0x1fa   :  { %9515 = vmatprep.subr.bf16.mxu0 %v14236_v60 }
 0x1fd   :  { %9517 = vmatpush3.bf16.msra.mxu0 %v11846_v1  ;;  %v2538_v1 = vld [vmem:[#allocation5 + $0x88] sm:$0xff] }
 0x1fe   :  { %9518 = vmatprep.subr.bf16.mxu0 %v14236_v60 }
 0x201   :  { %9520 = vmatpush3.bf16.msra.mxu0 %v11856_v55  ;;  %v2539_v55 = vld [vmem:[#allocation5 + $0x90] sm:$0xff] }
 0x202   :  { %9521 = vmatprep.subr.bf16.mxu0 %v14236_v60  ;;  %v7086_v19 = vpop.f32.mrb[12].mxu1  ;;  %v2568_v37 = vand.u32 4294901760, %v2539_v55 }
 0x203   :  { %v7087_v56 = vpop.f32.mrb[13].mxu1 }
 0x204   :  { %v7088_v41 = vadd.f32 %v7087_v56, %v7086_v19  ;;  %v11951_v56 = vsub.f32 %v2539_v55, %v2568_v37 }
 0x205   :  { %9523 = vmatpush3.bf16.msra.mxu0 %v11866_v44  ;;  %v2565_v44 = vand.u32 4294901760, %v2538_v1 }
 0x206   :  { %9524 = vmatprep.subr.bf16.mxu0 %v14236_v60  ;;  %v1349_v22 = vadd.f32 %v7088_v41, %v7053_v43  ;;  %v2541_v43 = vld [vmem:[#allocation5 + $0xa0] sm:$0xff]  ;;  %v2546_v41 = vld [vmem:[#allocation5 + $0xc8] sm:$0xff] }
 0x207   :  { %v2574_v62 = vand.u32 4294901760, %v2541_v43  ;;  %v11949_v19 = vsub.f32 %v2538_v1, %v2565_v44  ;;  %v2583_v1 = vand.u32 4294901760, %v2544_v31  ;;  %v2589_v55 = vand.u32 4294901760, %v2546_v41 }
 0x208   :  { %v11935_v13 = vadd.f32 %v7123_v25, %v1349_v22  ;;  %v2562_v25 = vand.u32 4294901760, %v2537_v61 }
 0x209   :  { %9526 = vmatpush3.bf16.msra.mxu0 %v11877_v4  ;;  %v2540_v4 = vld [vmem:[#allocation5 + $0x98] sm:$0xff]  ;;  %v11957_v58 = vsub.f32 %v2541_v43, %v2574_v62  ;;  %v11973_v43 = vsub.f32 %v2546_v41, %v2589_v55 }
 0x20a   :  { %9527 = vmatprep.subr.bf16.mxu0 %v14236_v60  ;;  %v11945_v38 = vpack.c.bf16 %v2565_v44, %v2562_v25 }
 0x20c   :  { %9631 = vmatpush3.bf16.msra.mxu1 %v11945_v38 }
 0x20d   :  { %9529 = vmatpush3.bf16.msra.mxu0 %v9528_v21  ;;  %v2542_v21 = vld [vmem:[#allocation5 + $0xa8] sm:$0xff]  ;;  %9632 = vmatprep.subr.bf16.mxu1 %v14236_v60 }
 0x20e   :  { %9530 = vmatprep.subr.bf16.mxu0 %v14236_v60  ;;  %v2577_v26 = vand.u32 4294901760, %v2542_v21 }
 0x210   :  { %v11963_v33 = vsub.f32 %v2542_v21, %v2577_v26 }
 0x211   :  { %9532 = vmatpush3.bf16.msra.mxu0 %v9531_v9  ;;  %v2571_v9 = vand.u32 4294901760, %v2540_v4 }
 0x212   :  { %9533 = vmatprep.subr.bf16.mxu0 %v14236_v60 }
 0x213   :  { %v11953_v22 = vpack.c.bf16 %v2571_v9, %v2568_v37  ;;  %v11955_v51 = vsub.f32 %v2540_v4, %v2571_v9  ;;  %v11969_v4 = vsub.f32 %v2544_v31, %v2583_v1  ;;  %v14555_v31 = vand.u32 4294901760, %v11730_v24 }
 0x214   :  { %7909 = vmatmul.mubr.f32.vlgmr.msra.gmra.mrb[6].mxu0 %v11912_v12  ;;  %v14560_v24 = vand.u32 4294901760, %v11746_v53  ;;  %v14566_v53 = vand.u32 4294901760, %v11799_v46  ;;  %v2551_v46 = vld [vmem:[#allocation5 + $0xf0] sm:$0xff] }
 0x215   :  { %9535 = vmatpush3.bf16.msra.mxu0 %v9534_v3  ;;  %7943 = vmatprep.mubr.msk.f32.mxu0 %vm10727_vm0, %v14230_v45  ;;  %v11947_v3 = vsub.f32 %v2537_v61, %v2562_v25  ;;  %v2580_v61 = vand.u32 4294901760, %v2543_v59  ;;  %v2586_v25 = vand.u32 4294901760, %v2545_v50 }
 0x216   :  { %9536 = vmatprep.subr.bf16.mxu0 %v14236_v60  ;;  %9634 = vmatpush3.bf16.msra.mxu1 %v11953_v22 }
 0x217   :  { %v11967_v44 = vsub.f32 %v2543_v59, %v2580_v61  ;;  %v11971_v37 = vsub.f32 %v2545_v50, %v2586_v25  ;;  %9635 = vmatprep.subr.bf16.mxu1 %v14236_v60  ;;  %v11987_v21 = vpack.c.bf16 %v2583_v1, %v2580_v61  ;;  %v14556_v50 = vand.u32 4294901760, %v11732_v7 }
 0x218   :  { %v14562_v61 = vand.u32 4294901760, %v11790_v32  ;;  %v14568_v32 = vand.u32 4294901760, %v11810_v47 }
 0x219   :  { %9538 = vmatpush3.bf16.msra.mxu0 %v9537_v28  ;;  %v11979_v28 = vpack.c.bf16 %v2577_v26, %v2574_v62  ;;  %v11995_v26 = vpack.c.bf16 %v2589_v55, %v2586_v25  ;;  %v9585_v41 = vpack.c.bf16 %v14556_v50, %v14555_v31  ;;  %v9597_v25 = vpack.c.bf16 %v14564_v5, %v14563_v11 }
 0x21a   :  { %9539 = vmatprep.subr.bf16.mxu0 %v14236_v60 }
 0x21b   :  { %9637 = vmatpush3.bf16.msra.mxu1 %v11979_v28 }
 0x21c   :  { %9638 = vmatprep.subr.bf16.mxu1 %v14236_v60 }
 0x21d   :  { %9541 = vmatpush3.bf16.msra.mxu0 %v9540_v15 }
 0x21e   :  { %9542 = vmatprep.subr.bf16.mxu0 %v14236_v60 }
 0x21f   :  { %9640 = vmatpush3.bf16.msra.mxu1 %v11987_v21 }
 0x220   :  { %9641 = vmatprep.subr.bf16.mxu1 %v14236_v60 }
 0x221   :  { %9544 = vmatpush3.bf16.msra.mxu0 %v9543_v49 }
 0x222   :  { %9545 = vmatprep.subr.bf16.mxu0 %v14236_v60  ;;  %v7156_v9 = vpop.f32.mrb[14].mxu1 }
 0x223   :  { %v7157_v15 = vpop.f32.mrb[15].mxu1  ;;  %9643 = vmatpush3.bf16.msra.mxu1 %v11995_v26 }
 0x224   :  { %v7158_v62 = vadd.f32 %v7157_v15, %v7156_v9  ;;  %9644 = vmatprep.subr.bf16.mxu1 %v14236_v60  ;;  %v2662_v15 = vand.u32 4294901760, %v11949_v19 }
 0x225   :  { %9547 = vmatpush3.bf16.msra.mxu0 %v9546_v36 }
 0x226   :  { %9548 = vmatprep.subr.bf16.mxu0 %v14236_v60  ;;  %v1595_v49 = vadd.f32 %v7158_v62, %v11935_v13  ;;  %v14554_v13 = vand.u32 4294901760, %v11915_v6 }
 0x228   :  { %v1763_v59 = vadd.f32 %v11921_v29, %v1595_v49  ;;  %v9582_v29 = vpack.c.bf16 %v1995_v2, %v1988_v0  ;;  %v9588_v0 = vpack.c.bf16 %v14558_v34, %v14557_v52  ;;  %v14559_v2 = vand.u32 4294901760, %v11744_v10 }
 0x229   :  { %9550 = vmatpush3.bf16.msra.mxu0 %v9549_v39  ;;  %v14565_v10 = vand.u32 4294901760, %v11797_v17  ;;  %v2669_v52 = vand.u32 4294901760, %v11951_v56  ;;  %v2676_v34 = vand.u32 4294901760, %v11955_v51 }
 0x22a   :  { %9551 = vmatprep.subr.bf16.mxu0 %v14236_v60  ;;  %v9591_v7 = vpack.c.bf16 %v14560_v24, %v14559_v2 }
 0x22b   :  { %v9600_v55 = vpack.c.bf16 %v14566_v53, %v14565_v10  ;;  %v2670_v2 = vsub.f32 %v11951_v56, %v2669_v52  ;;  %v2677_v24 = vsub.f32 %v11955_v51, %v2676_v34 }
 0x22d   :  { %9553 = vmatpush3.bf16.msra.mxu0 %v9552_v30 }
 0x22e   :  { %9554 = vmatprep.subr.bf16.mxu0 %v14236_v60 }
 0x231   :  { %9556 = vmatpush3.bf16.msra.mxu0 %v9555_v23 }
 0x232   :  { %9557 = vmatprep.subr.bf16.mxu0 %v14236_v60 }
 0x234   :  { %7944 = vmatmul.mubr.f32.vlgmr.msra.gmra.mrb[6].mxu0 %v11915_v6  ;;  %v14561_v6 = vand.u32 4294901760, %v11788_v16  ;;  %v14567_v16 = vand.u32 4294901760, %v11808_v20  ;;  %v2604_v20 = vand.u32 4294901760, %v2551_v46 }
 0x235   :  { %9559 = vmatpush3.bf16.msra.mxu0 %v11724_v63  ;;  %7978 = vmatprep.mubr.msk.f32.mxu0 %vm10727_vm0, %v14230_v45 }
 0x236   :  { %9560 = vmatprep.subr.bf16.mxu0 %v14236_v60  ;;  %v9594_v1 = vpack.c.bf16 %v14562_v61, %v14561_v6  ;;  %v9603_v9 = vpack.c.bf16 %v14568_v32, %v14567_v16  ;;  %v2690_v6 = vand.u32 4294901760, %v11963_v33  ;;  %v2671_v61 = vand.u32 4294901760, %v2670_v2 }
 0x237   :  { %v2704_v16 = vand.u32 4294901760, %v11969_v4 }
 0x238   :  { %v2691_v5 = vsub.f32 %v11963_v33, %v2690_v6 }
 0x239   :  { %9562 = vmatpush3.bf16.msra.mxu0 %v11737_v48 }
 0x23a   :  { %9563 = vmatprep.subr.bf16.mxu0 %v14236_v60  ;;  %v2692_v53 = vand.u32 4294901760, %v2691_v5 }
 0x23d   :  { %9565 = vmatpush3.bf16.msra.mxu0 %v11750_v14 }
 0x23e   :  { %9566 = vmatprep.subr.bf16.mxu0 %v14236_v60 }
 0x241   :  { %9568 = vmatpush3.bf16.msra.mxu0 %v11757_v8 }
 0x242   :  { %9569 = vmatprep.subr.bf16.mxu0 %v14236_v60  ;;  %v7226_v36 = vpop.f32.mrb[16].mxu1 }
 0x243   :  { %v7227_v39 = vpop.f32.mrb[17].mxu1 }
 0x244   :  { %v7228_v30 = vadd.f32 %v7227_v39, %v7226_v36 }
 0x245   :  { %9571 = vmatpush3.bf16.msra.mxu0 %v11770_v40 }
 0x246   :  { %9572 = vmatprep.subr.bf16.mxu0 %v14236_v60  ;;  %v12028_v23 = vadd.f32 %v7228_v30, %v1763_v59  ;;  %v2663_v59 = vsub.f32 %v11949_v19, %v2662_v15 }
 0x248   :  { %14553 = vst [vmem:[#allocation17_spill] sm:$0xff] %v12028_v23  ;;  %v5220_v23 = vld [vmem:[#allocation5 + $0x2f0] sm:$0xff] }
 0x249   :  { %9574 = vmatpush3.bf16.msra.mxu0 %v11779_v54 }
 0x24a   :  { %9575 = vmatprep.subr.bf16.mxu0 %v14236_v60 }
 0x24d   :  { %9577 = vmatpush3.bf16.msra.mxu0 %v11785_v57 }
 0x24e   :  { %9578 = vmatprep.subr.bf16.mxu0 %v14236_v60 }
 0x251   :  { %9580 = vmatpush3.bf16.msra.mxu0 %v11806_v18 }
 0x252   :  { %9581 = vmatprep.subr.bf16.mxu0 %v14236_v60 }
 0x254   :  { %7979 = vmatmul.mubr.f32.vlgmr.msra.gmra.mrb[6].mxu0 %v14554_v13  ;;  %v12129_v13 = vsub.f32 %v2551_v46, %v2604_v20 }
 0x255   :  { %9583 = vmatpush3.bf16.msra.mxu0 %v9582_v29  ;;  %8013 = vmatprep.mubr.msk.f32.mxu0 %vm10727_vm0, %v14230_v45  ;;  %v12126_v29 = vsub.f32 %v2550_v27, %v2601_v35 }
 0x256   :  { %9584 = vmatprep.subr.bf16.mxu0 %v14236_v60 }
 0x259   :  { %9586 = vmatpush3.bf16.msra.mxu0 %v9585_v41  ;;  %v2664_v41 = vand.u32 4294901760, %v2663_v59 }
 0x25a   :  { %9587 = vmatprep.subr.bf16.mxu0 %v14236_v60 }
 0x25d   :  { %9589 = vmatpush3.bf16.msra.mxu0 %v9588_v0 }
 0x25e   :  { %9590 = vmatprep.subr.bf16.mxu0 %v14236_v60 }
 0x261   :  { %9592 = vmatpush3.bf16.msra.mxu0 %v9591_v7  ;;  %v2683_v7 = vand.u32 4294901760, %v11957_v58 }
 0x262   :  { %9593 = vmatprep.subr.bf16.mxu0 %v14236_v60 }
 0x263   :  { %v2684_v11 = vsub.f32 %v11957_v58, %v2683_v7 }
 0x265   :  { %9595 = vmatpush3.bf16.msra.mxu0 %v9594_v1  ;;  %v2678_v1 = vand.u32 4294901760, %v2677_v24  ;;  %v2685_v10 = vand.u32 4294901760, %v2684_v11 }
 0x266   :  { %9596 = vmatprep.subr.bf16.mxu0 %v14236_v60 }
 0x267   :  { %v9660_v32 = vpack.c.bf16 %v2692_v53, %v2685_v10 }
 0x269   :  { %9598 = vmatpush3.bf16.msra.mxu0 %v9597_v25  ;;  %v9657_v25 = vpack.c.bf16 %v2678_v1, %v2671_v61  ;;  %v14206_v61 = vand.u32 4294901760, %v12126_v29 }
 0x26a   :  { %9599 = vmatprep.subr.bf16.mxu0 %v14236_v60 }
 0x26b   :  { %v2747_v5 = vsub.f32 %v12126_v29, %v14206_v61 }
 0x26d   :  { %9601 = vmatpush3.bf16.msra.mxu0 %v9600_v55  ;;  %v2697_v55 = vand.u32 4294901760, %v11967_v44  ;;  %v2748_v53 = vand.u32 4294901760, %v2747_v5 }
 0x26e   :  { %9602 = vmatprep.subr.bf16.mxu0 %v14236_v60 }
 0x271   :  { %9604 = vmatpush3.bf16.msra.mxu0 %v9603_v9  ;;  %v2698_v9 = vsub.f32 %v11967_v44, %v2697_v55 }
 0x272   :  { %9605 = vmatprep.subr.bf16.mxu0 %v14236_v60 }
 0x274   :  { %8014 = vmatmul.mubr.f32.vlgmr.msra.gmra.mrb[6].mxu0 %v11912_v12 }
 0x275   :  { %9607 = vmatpush3.bf16.msra.mxu0 %v11724_v63  ;;  %8048 = vmatprep.mubr.msk.f32.mxu0 %vm10727_vm0, %v14230_v45  ;;  %v2547_v63 = vld [vmem:[#allocation5 + $0xd0] sm:$0xff] }
 0x276   :  { %9608 = vmatprep.subr.bf16.mxu0 %v14236_v60 }
 0x279   :  { %9610 = vmatpush3.bf16.msra.mxu0 %v11737_v48  ;;  %v2548_v48 = vld [vmem:[#allocation5 + $0xd8] sm:$0xff] }
 0x27a   :  { %9611 = vmatprep.subr.bf16.mxu0 %v14236_v60 }
 0x27d   :  { %9613 = vmatpush3.bf16.msra.mxu0 %v11750_v14  ;;  %v2592_v14 = vand.u32 4294901760, %v2547_v63 }
 0x27e   :  { %9614 = vmatprep.subr.bf16.mxu0 %v14236_v60 }
 0x27f   :  { %v12120_v36 = vsub.f32 %v2547_v63, %v2592_v14  ;;  %v2705_v63 = vsub.f32 %v11969_v4, %v2704_v16 }
 0x281   :  { %9616 = vmatpush3.bf16.msra.mxu0 %v11757_v8  ;;  %v2595_v8 = vand.u32 4294901760, %v2548_v48 }
 0x282   :  { %9617 = vmatprep.subr.bf16.mxu0 %v14236_v60 }
 0x283   :  { %v12122_v39 = vsub.f32 %v2548_v48, %v2595_v8  ;;  %v2699_v48 = vand.u32 4294901760, %v2698_v9  ;;  %v14205_v9 = vand.u32 4294901760, %v12129_v13 }
 0x285   :  { %9619 = vmatpush3.bf16.msra.mxu0 %v11770_v40  ;;  %v12102_v40 = vpack.c.bf16 %v2595_v8, %v2592_v14  ;;  %v2706_v14 = vand.u32 4294901760, %v2705_v63  ;;  %v2711_v8 = vand.u32 4294901760, %v11971_v37  ;;  %v9693_v5 = vpack.c.bf16 %v12122_v39, %v12120_v36 }
 0x286   :  { %9620 = vmatprep.subr.bf16.mxu0 %v14236_v60 }
 0x287   :  { %9646 = vmatpush3.bf16.msra.mxu1 %v12102_v40  ;;  %v9663_v27 = vpack.c.bf16 %v2706_v14, %v2699_v48  ;;  %v2754_v14 = vsub.f32 %v12129_v13, %v14205_v9 }
 0x288   :  { %9647 = vmatprep.subr.bf16.mxu1 %v14236_v60 }
 0x289   :  { %9622 = vmatpush3.bf16.msra.mxu0 %v11779_v54  ;;  %v2549_v54 = vld [vmem:[#allocation5 + $0xe0] sm:$0xff] }
 0x28a   :  { %9623 = vmatprep.subr.bf16.mxu0 %v14236_v60 }
 0x28d   :  { %9625 = vmatpush3.bf16.msra.mxu0 %v11785_v57  ;;  %v2598_v57 = vand.u32 4294901760, %v2549_v54 }
 0x28e   :  { %9626 = vmatprep.subr.bf16.mxu0 %v14236_v60 }
 0x28f   :  { %v12106_v17 = vpack.c.bf16 %v2601_v35, %v2598_v57  ;;  %v12124_v30 = vsub.f32 %v2549_v54, %v2598_v57  ;;  %v2718_v54 = vand.u32 4294901760, %v11973_v43  ;;  %v2712_v57 = vsub.f32 %v11971_v37, %v2711_v8 }
 0x291   :  { %9628 = vmatpush3.bf16.msra.mxu0 %v11806_v18  ;;  %v2552_v18 = vld [vmem:[#allocation5 + $0xf8] sm:$0xff]  ;;  %9649 = vmatpush3.bf16.msra.mxu1 %v12106_v17  ;;  %v2719_v35 = vsub.f32 %v11973_v43, %v2718_v54  ;;  %v2713_v46 = vand.u32 4294901760, %v2712_v57  ;;  %v14207_v24 = vand.u32 4294901760, %v12124_v30 }
 0x292   :  { %9773 = vmatprep.subr.bf16.mxu0 %v14236_v60  ;;  %v2607_v47 = vand.u32 4294901760, %v2552_v18  ;;  %9650 = vmatprep.subr.bf16.mxu1 %v14236_v60 }
 0x293   :  { %v2740_v11 = vsub.f32 %v12124_v30, %v14207_v24 }
 0x294   :  { %8049 = vmatmul.mubr.f32.vlgmr.msra.gmra.mrb[6].mxu0 %v11912_v12  ;;  %v2655_v12 = vand.u32 4294901760, %v11947_v3  ;;  %v12112_v62 = vpack.c.bf16 %v2607_v47, %v2604_v20  ;;  %v12131_v31 = vsub.f32 %v2552_v18, %v2607_v47  ;;  %v2720_v18 = vand.u32 4294901760, %v2719_v35 }
 0x295   :  { %8293 = vmatprep.mubr.msk.f32.mxu0 %vm10727_vm0, %v14230_v45  ;;  %v14209_v20 = vand.u32 4294901760, %v12120_v36  ;;  %v14208_v47 = vand.u32 4294901760, %v12122_v39  ;;  %v2741_v10 = vand.u32 4294901760, %v2740_v11  ;;  %v2755_v35 = vand.u32 4294901760, %v2754_v14  ;;  %v6798_v14 = vld [vmem:[%s14063_s2] ss:$0 sm:$0xff] }
 0x296   :  { %v2656_v49 = vsub.f32 %v11947_v3, %v2655_v12  ;;  %9652 = vmatpush3.bf16.msra.mxu1 %v12112_v62  ;;  %v14204_v63 = vand.u32 4294901760, %v12131_v31  ;;  %v9690_v11 = vpack.c.bf16 %v11973_v43, %v11971_v37  ;;  %v14573_v37 = vand.u32 4294901760, %v12129_v13 }
 0x297   :  { %9653 = vmatprep.subr.bf16.mxu1 %v14236_v60  ;;  %v2726_v59 = vsub.f32 %v12120_v36, %v14209_v20  ;;  %v9672_v48 = vpack.c.bf16 %v2748_v53, %v2741_v10  ;;  %v9696_v10 = vpack.c.bf16 %v12126_v29, %v12124_v30  ;;  %v9699_v53 = vpack.c.bf16 %v12131_v31, %v12129_v13 }
 0x298   :  { %v2657_v50 = vand.u32 4294901760, %v2656_v49  ;;  %v9666_v49 = vpack.c.bf16 %v2720_v18, %v2713_v46  ;;  %v2761_v57 = vsub.f32 %v12131_v31, %v14204_v63  ;;  %v14574_v43 = vand.u32 4294901760, %v12131_v31 }
 0x29a   :  { %v12136_v0 = vpack.c.bf16 %v2664_v41, %v2657_v50  ;;  %v2733_v50 = vsub.f32 %v12122_v39, %v14208_v47  ;;  %v2727_v41 = vand.u32 4294901760, %v2726_v59  ;;  %v2762_v46 = vand.u32 4294901760, %v2761_v57 }
 0x29b   :  { %v9678_v59 = vpack.c.bf16 %v11949_v19, %v11947_v3  ;;  %v9732_v3 = vpack.c.bf16 %v2690_v6, %v2683_v7  ;;  %v9738_v19 = vpack.c.bf16 %v2718_v54, %v2711_v8 }
 0x29c   :  { %v2734_v2 = vand.u32 4294901760, %v2733_v50  ;;  %v9675_v18 = vpack.c.bf16 %v2762_v46, %v2755_v35  ;;  %v9681_v50 = vpack.c.bf16 %v11955_v51, %v11951_v56  ;;  %v9735_v51 = vpack.c.bf16 %v2704_v16, %v2697_v55 }
 0x29e   :  { %v9669_v1 = vpack.c.bf16 %v2734_v2, %v2727_v41  ;;  %v9684_v41 = vpack.c.bf16 %v11963_v33, %v11957_v58  ;;  %v9687_v2 = vpack.c.bf16 %v11969_v4, %v11967_v44  ;;  %v14569_v58 = vand.u32 4294901760, %v12120_v36 }
 0x29f   :  { %v14570_v33 = vand.u32 4294901760, %v12122_v39  ;;  %v14571_v44 = vand.u32 4294901760, %v12124_v30  ;;  %v14572_v4 = vand.u32 4294901760, %v12126_v29  ;;  %v3208_v39 = vld [vmem:[#allocation5 + $0x118] sm:$0xff]  ;;  %v3209_v30 = vld [vmem:[#allocation5 + $0x120] sm:$0xff]  ;;  %v3210_v29 = vld [vmem:[#allocation5 + $0x128] sm:$0xff] }
 0x2a0   :  { %v3239_v13 = vand.u32 4294901760, %v3208_v39  ;;  %v3245_v31 = vand.u32 4294901760, %v3210_v29 }
 0x2a1   :  { %v9741_v56 = vpack.c.bf16 %v14570_v33, %v14569_v58  ;;  %v3220_v58 = vld [vmem:[#allocation5 + $0x178] sm:$0xff] }
 0x367   :  { %v2531_v57 = vpop.f32.mrb[6].mxu0 }
 0x368   :  { %v10541_v35 = vadd.f32 %v6798_v14, %v2531_v57  ;;  %v8050_v46 = vpop.f32.mrb[7].mxu0 }
 0x369   :  { %v3217_v46 = vld [vmem:[#allocation5 + $0x160] sm:$0xff] }
 0x36a   :  { %v2535_v63 = vmax.f32 %v10541_v35, 0.0 }
 0x36c   :  { %v12211_v9 = vand.u32 4294901760, %v2535_v63 }
 0x36e   :  { %v2643_v61 = vsub.f32 %v2535_v63, %v12211_v9  ;;  %v3213_v63 = vld [vmem:[#allocation5 + $0x140] sm:$0xff] }
 0x370   :  { %v2644_v24 = vand.u32 4294901760, %v2643_v61 }
 0x372   :  { %v2645_v47 = vsub.f32 %v2643_v61, %v2644_v24 }
 0x374   :  { %v2646_v20 = vand.u32 4294901760, %v2645_v47 }
 0x376   :  { %8084 = vmatmul.mubr.f32.vlgmr.msra.gmra.mrb[18].mxu1 %v2646_v20 }
 0x377   :  { %9655 = vmatpush3.bf16.msra.mxu1 %v12136_v0  ;;  %8118 = vmatprep.mubr.msk.f32.mxu1 %vm10727_vm0, %v14230_v45  ;;  %v9726_v0 = vpack.c.bf16 %v2662_v15, %v2655_v12  ;;  %v9744_v12 = vpack.c.bf16 %v14572_v4, %v14571_v44  ;;  %v9747_v15 = vpack.c.bf16 %v14574_v43, %v14573_v37 }
 0x378   :  { %9656 = vmatprep.subr.bf16.mxu1 %v14236_v60 }
 0x37b   :  { %9658 = vmatpush3.bf16.msra.mxu1 %v9657_v25  ;;  %v9729_v25 = vpack.c.bf16 %v2676_v34, %v2669_v52  ;;  %v3211_v52 = vld [vmem:[#allocation5 + $0x130] sm:$0xff]  ;;  %v3212_v34 = vld [vmem:[#allocation5 + $0x138] sm:$0xff] }
 0x37c   :  { %9659 = vmatprep.subr.bf16.mxu1 %v14236_v60  ;;  %v3248_v20 = vand.u32 4294901760, %v3211_v52  ;;  %v3251_v47 = vand.u32 4294901760, %v3212_v34 }
 0x37f   :  { %9661 = vmatpush3.bf16.msra.mxu1 %v9660_v32  ;;  %v12326_v32 = vsub.f32 %v3208_v39, %v3239_v13 }
 0x380   :  { %9662 = vmatprep.subr.bf16.mxu1 %v14236_v60 }
 0x383   :  { %9664 = vmatpush3.bf16.msra.mxu1 %v9663_v27  ;;  %v12333_v27 = vsub.f32 %v3210_v29, %v3245_v31 }
 0x384   :  { %9665 = vmatprep.subr.bf16.mxu1 %v14236_v60 }
 0x387   :  { %9667 = vmatpush3.bf16.msra.mxu1 %v9666_v49  ;;  %v12336_v49 = vsub.f32 %v3211_v52, %v3248_v20 }
 0x388   :  { %9668 = vmatprep.subr.bf16.mxu1 %v14236_v60 }
 0x38b   :  { %9670 = vmatpush3.bf16.msra.mxu1 %v9669_v1  ;;  %v12345_v1 = vpack.c.bf16 %v3251_v47, %v3248_v20 }
 0x38c   :  { %9671 = vmatprep.subr.bf16.mxu1 %v14236_v60 }
 0x38f   :  { %9673 = vmatpush3.bf16.msra.mxu1 %v9672_v48  ;;  %v3214_v48 = vld [vmem:[#allocation5 + $0x148] sm:$0xff] }
 0x390   :  { %9674 = vmatprep.subr.bf16.mxu1 %v14236_v60 }
 0x393   :  { %9676 = vmatpush3.bf16.msra.mxu1 %v9675_v18  ;;  %v3254_v18 = vand.u32 4294901760, %v3213_v63 }
 0x394   :  { %9677 = vmatprep.subr.bf16.mxu1 %v14236_v60 }
 0x395   :  { %v12365_v33 = vsub.f32 %v3213_v63, %v3254_v18 }
 0x396   :  { %8119 = vmatmul.mubr.f32.vlgmr.msra.gmra.mrb[20].mxu1 %v12211_v9 }
 0x397   :  { %9679 = vmatpush3.bf16.msra.mxu1 %v9678_v59  ;;  %8153 = vmatprep.mubr.msk.f32.mxu1 %vm10727_vm0, %v14230_v45  ;;  %v3257_v59 = vand.u32 4294901760, %v3214_v48 }
 0x398   :  { %9680 = vmatprep.subr.bf16.mxu1 %v14236_v60 }
 0x39b   :  { %9682 = vmatpush3.bf16.msra.mxu1 %v9681_v50 }
 0x39c   :  { %9683 = vmatprep.subr.bf16.mxu1 %v14236_v60 }
 0x39f   :  { %9685 = vmatpush3.bf16.msra.mxu1 %v9684_v41  ;;  %v12353_v41 = vpack.c.bf16 %v3257_v59, %v3254_v18 }
 0x3a0   :  { %9686 = vmatprep.subr.bf16.mxu1 %v14236_v60 }
 0x3a3   :  { %9688 = vmatpush3.bf16.msra.mxu1 %v9687_v2 }
 0x3a4   :  { %9689 = vmatprep.subr.bf16.mxu1 %v14236_v60 }
 0x3a7   :  { %9691 = vmatpush3.bf16.msra.mxu1 %v9690_v11  ;;  %v3215_v11 = vld [vmem:[#allocation5 + $0x150] sm:$0xff] }
 0x3a8   :  { %9692 = vmatprep.subr.bf16.mxu1 %v14236_v60  ;;  %v3260_v14 = vand.u32 4294901760, %v3215_v11 }
 0x3aa   :  { %v12369_v44 = vsub.f32 %v3215_v11, %v3260_v14 }
 0x3ab   :  { %9694 = vmatpush3.bf16.msra.mxu1 %v9693_v5  ;;  %v3216_v5 = vld [vmem:[#allocation5 + $0x158] sm:$0xff] }
 0x3ac   :  { %9695 = vmatprep.subr.bf16.mxu1 %v14236_v60  ;;  %v3263_v57 = vand.u32 4294901760, %v3216_v5 }
 0x3ae   :  { %v12359_v35 = vpack.c.bf16 %v3263_v57, %v3260_v14  ;;  %v12371_v4 = vsub.f32 %v3216_v5, %v3263_v57 }
 0x3af   :  { %9697 = vmatpush3.bf16.msra.mxu1 %v9696_v10 }
 0x3b0   :  { %9698 = vmatprep.subr.bf16.mxu1 %v14236_v60 }
 0x3b3   :  { %9700 = vmatpush3.bf16.msra.mxu1 %v9699_v53 }
 0x3b4   :  { %9701 = vmatprep.subr.bf16.mxu1 %v14236_v60 }
 0x3b6   :  { %8154 = vmatmul.mubr.f32.vlgmr.msra.gmra.mrb[22].mxu1 %v2643_v61 }
 0x3b7   :  { %9703 = vmatpush3.bf16.msra.mxu1 %v11945_v38  ;;  %8188 = vmatprep.mubr.msk.f32.mxu1 %vm10727_vm0, %v14230_v45 }
 0x3b8   :  { %9704 = vmatprep.subr.bf16.mxu1 %v14236_v60 }
 0x3bb   :  { %9706 = vmatpush3.bf16.msra.mxu1 %v11953_v22 }
 0x3bc   :  { %9707 = vmatprep.subr.bf16.mxu1 %v14236_v60 }
 0x3bf   :  { %9709 = vmatpush3.bf16.msra.mxu1 %v11979_v28 }
 0x3c0   :  { %9710 = vmatprep.subr.bf16.mxu1 %v14236_v60 }
 0x3c3   :  { %9712 = vmatpush3.bf16.msra.mxu1 %v11987_v21 }
 0x3c4   :  { %9713 = vmatprep.subr.bf16.mxu1 %v14236_v60 }
 0x3c7   :  { %9715 = vmatpush3.bf16.msra.mxu1 %v11995_v26 }
 0x3c8   :  { %9716 = vmatprep.subr.bf16.mxu1 %v14236_v60 }
 0x3cb   :  { %9718 = vmatpush3.bf16.msra.mxu1 %v12102_v40 }
 0x3cc   :  { %9719 = vmatprep.subr.bf16.mxu1 %v14236_v60 }
 0x3cf   :  { %9721 = vmatpush3.bf16.msra.mxu1 %v12106_v17 }
 0x3d0   :  { %9722 = vmatprep.subr.bf16.mxu1 %v14236_v60 }
 0x3d3   :  { %9724 = vmatpush3.bf16.msra.mxu1 %v12112_v62 }
 0x3d4   :  { %9725 = vmatprep.subr.bf16.mxu1 %v14236_v60 }
 0x3d6   :  { %8189 = vmatmul.mubr.f32.vlgmr.msra.gmra.mrb[24].mxu1 %v2644_v24  ;;  %v12338_v24 = vsub.f32 %v3212_v34, %v3251_v47  ;;  %v14220_v47 = vand.u32 4294901760, %v12333_v27 }
 0x3d7   :  { %9727 = vmatpush3.bf16.msra.mxu1 %v9726_v0  ;;  %8223 = vmatprep.mubr.msk.f32.mxu1 %vm10727_vm0, %v14230_v45  ;;  %v3218_v0 = vld [vmem:[#allocation5 + $0x168] sm:$0xff] }
 0x3d8   :  { %9728 = vmatprep.subr.bf16.mxu1 %v14236_v60 }
 0x3db   :  { %9730 = vmatpush3.bf16.msra.mxu1 %v9729_v25  ;;  %v3266_v25 = vand.u32 4294901760, %v3217_v46 }
 0x3dc   :  { %9731 = vmatprep.subr.bf16.mxu1 %v14236_v60 }
 0x3df   :  { %9733 = vmatpush3.bf16.msra.mxu1 %v9732_v3  ;;  %v3269_v3 = vand.u32 4294901760, %v3218_v0 }
 0x3e0   :  { %9734 = vmatprep.subr.bf16.mxu1 %v14236_v60 }
 0x3e1   :  { %v12376_v37 = vsub.f32 %v3218_v0, %v3269_v3 }
 0x3e3   :  { %9736 = vmatpush3.bf16.msra.mxu1 %v9735_v51  ;;  %v12363_v51 = vpack.c.bf16 %v3269_v3, %v3266_v25 }
 0x3e4   :  { %9737 = vmatprep.subr.bf16.mxu1 %v14236_v60 }
 0x3e7   :  { %9739 = vmatpush3.bf16.msra.mxu1 %v9738_v19  ;;  %v3219_v19 = vld [vmem:[#allocation5 + $0x170] sm:$0xff] }
 0x3e8   :  { %9740 = vmatprep.subr.bf16.mxu1 %v14236_v60  ;;  %v3272_v43 = vand.u32 4294901760, %v3219_v19 }
 0x3eb   :  { %9742 = vmatpush3.bf16.msra.mxu1 %v9741_v56  ;;  %v12367_v56 = vsub.f32 %v3214_v48, %v3257_v59  ;;  %v3359_v48 = vsub.f32 %v12333_v27, %v14220_v47 }
 0x3ec   :  { %9743 = vmatprep.subr.bf16.mxu1 %v14236_v60 }
 0x3ed   :  { %v3360_v59 = vand.u32 4294901760, %v3359_v48  ;;  %v14216_v0 = vand.u32 4294901760, %v12367_v56 }
 0x3ef   :  { %9745 = vmatpush3.bf16.msra.mxu1 %v9744_v12  ;;  %v12374_v12 = vsub.f32 %v3217_v46, %v3266_v25  ;;  %v14217_v46 = vand.u32 4294901760, %v12365_v33 }
 0x3f0   :  { %9746 = vmatprep.subr.bf16.mxu1 %v14236_v60 }
 0x3f1   :  { %v3380_v3 = vsub.f32 %v12365_v33, %v14217_v46  ;;  %v14213_v48 = vand.u32 4294901760, %v12374_v12 }
 0x3f3   :  { %9748 = vmatpush3.bf16.msra.mxu1 %v9747_v15  ;;  %v3275_v15 = vand.u32 4294901760, %v3220_v58 }
 0x3f4   :  { %9749 = vmatprep.subr.bf16.mxu1 %v14236_v60 }
 0x3f6   :  { %8224 = vmatmul.mubr.f32.vlgmr.msra.gmra.mrb[26].mxu1 %v12211_v9 }
 0x3f7   :  { %9751 = vmatpush3.bf16.msra.mxu1 %v11945_v38  ;;  %8258 = vmatprep.mubr.msk.f32.mxu1 %vm10727_vm0, %v14230_v45 }
 0x3f8   :  { %9752 = vmatprep.subr.bf16.mxu1 %v14236_v60 }
 0x3fb   :  { %9754 = vmatpush3.bf16.msra.mxu1 %v11953_v22 }
 0x3fc   :  { %9755 = vmatprep.subr.bf16.mxu1 %v14236_v60 }
 0x3ff   :  { %9757 = vmatpush3.bf16.msra.mxu1 %v11979_v28  ;;  %v3205_v28 = vld [vmem:[#allocation5 + $0x100] sm:$0xff] }
 0x400   :  { %9758 = vmatprep.subr.bf16.mxu1 %v14236_v60 }
 0x403   :  { %9760 = vmatpush3.bf16.msra.mxu1 %v11987_v21  ;;  %v3206_v21 = vld [vmem:[#allocation5 + $0x108] sm:$0xff] }
 0x404   :  { %9761 = vmatprep.subr.bf16.mxu1 %v14236_v60  ;;  %v3233_v36 = vand.u32 4294901760, %v3206_v21 }
 0x406   :  { %v12322_v55 = vsub.f32 %v3206_v21, %v3233_v36  ;;  %v12383_v21 = vsub.f32 %v3219_v19, %v3272_v43  ;;  %v3387_v19 = vsub.f32 %v12367_v56, %v14216_v0 }
 0x407   :  { %9763 = vmatpush3.bf16.msra.mxu1 %v11995_v26  ;;  %v3207_v26 = vld [vmem:[#allocation5 + $0x110] sm:$0xff] }
 0x408   :  { %9764 = vmatprep.subr.bf16.mxu1 %v14236_v60 }
 0x40b   :  { %9766 = vmatpush3.bf16.msra.mxu1 %v12102_v40  ;;  %v3230_v40 = vand.u32 4294901760, %v3205_v28 }
 0x40c   :  { %9767 = vmatprep.subr.bf16.mxu1 %v14236_v60 }
 0x40d   :  { %v12318_v7 = vpack.c.bf16 %v3233_v36, %v3230_v40  ;;  %v12320_v6 = vsub.f32 %v3205_v28, %v3230_v40  ;;  %v12381_v28 = vpack.c.bf16 %v3275_v15, %v3272_v43  ;;  %v3388_v43 = vand.u32 4294901760, %v3387_v19 }
 0x40f   :  { %9769 = vmatpush3.bf16.msra.mxu1 %v12106_v17  ;;  %v3236_v17 = vand.u32 4294901760, %v3207_v26  ;;  %9775 = vmatpush3.bf16.msra.mxu0 %v12318_v7 }
 0x410   :  { %9770 = vmatprep.subr.bf16.mxu1 %v14236_v60  ;;  %9776 = vmatprep.subr.bf16.mxu0 %v14236_v60 }
 0x411   :  { %v12324_v16 = vsub.f32 %v3207_v26, %v3236_v17  ;;  %v12331_v54 = vpack.c.bf16 %v3239_v13, %v3236_v17  ;;  %v12385_v26 = vsub.f32 %v3220_v58, %v3275_v15  ;;  %v14222_v17 = vand.u32 4294901760, %v12326_v32 }
 0x412   :  { %v3381_v58 = vand.u32 4294901760, %v3380_v3  ;;  %v14215_v15 = vand.u32 4294901760, %v12369_v44 }
 0x413   :  { %9772 = vmatpush3.bf16.msra.mxu1 %v12112_v62  ;;  %v3242_v62 = vand.u32 4294901760, %v3209_v30  ;;  %9778 = vmatpush3.bf16.msra.mxu0 %v12331_v54  ;;  %v14223_v39 = vand.u32 4294901760, %v12324_v16  ;;  %v14210_v3 = vand.u32 4294901760, %v12385_v26 }
 0x414   :  { %9917 = vmatprep.subr.bf16.mxu1 %v14236_v60  ;;  %9779 = vmatprep.subr.bf16.mxu0 %v14236_v60 }
 0x415   :  { %v12328_v8 = vsub.f32 %v3209_v30, %v3242_v62  ;;  %v12341_v61 = vpack.c.bf16 %v3245_v31, %v3242_v62  ;;  %v3338_v13 = vsub.f32 %v12324_v16, %v14223_v39  ;;  %v3345_v62 = vsub.f32 %v12326_v32, %v14222_v17 }
 0x416   :  { %8259 = vmatmul.mubr.f32.vlgmr.msra.gmra.mrb[28].mxu1 %v12211_v9  ;;  %v6800_v9 = vld [vmem:[%s14063_s2 + $0x1] ss:$0 sm:$0xff] }
 0x417   :  { %8503 = vmatprep.mubr.msk.f32.mxu1 %vm10727_vm0, %v14230_v45  ;;  %9781 = vmatpush3.bf16.msra.mxu0 %v12341_v61  ;;  %v3339_v52 = vand.u32 4294901760, %v3338_v13  ;;  %v3346_v34 = vand.u32 4294901760, %v3345_v62  ;;  %v14221_v20 = vand.u32 4294901760, %v12328_v8 }
 0x418   :  { %9782 = vmatprep.subr.bf16.mxu0 %v14236_v60 }
 0x419   :  { %v3352_v63 = vsub.f32 %v12328_v8, %v14221_v20 }
 0x41b   :  { %9784 = vmatpush3.bf16.msra.mxu0 %v12345_v1  ;;  %v3353_v18 = vand.u32 4294901760, %v3352_v63 }
 0x41c   :  { %9785 = vmatprep.subr.bf16.mxu0 %v14236_v60 }
 0x41d   :  { %v12417_v11 = vpack.c.bf16 %v3360_v59, %v3353_v18  ;;  %v14212_v18 = vand.u32 4294901760, %v12376_v37 }
 0x41f   :  { %9787 = vmatpush3.bf16.msra.mxu0 %v12353_v41 }
 0x420   :  { %9788 = vmatprep.subr.bf16.mxu0 %v14236_v60 }
 0x423   :  { %9790 = vmatpush3.bf16.msra.mxu0 %v12359_v35 }
 0x424   :  { %9791 = vmatprep.subr.bf16.mxu0 %v14236_v60 }
 0x427   :  { %9793 = vmatpush3.bf16.msra.mxu0 %v12363_v51 }
 0x428   :  { %9794 = vmatprep.subr.bf16.mxu0 %v14236_v60 }
 0x42b   :  { %9796 = vmatpush3.bf16.msra.mxu0 %v12381_v28 }
 0x42c   :  { %9797 = vmatprep.subr.bf16.mxu0 %v14236_v60 }
 0x449   :  { %v2648_v38 = vpop.f32.mrb[18].mxu1 }
 0x44a   :  { %v8085_v22 = vpop.f32.mrb[19].mxu1  ;;  %v2649_v50 = vadd.f32 %v6800_v9, %v2648_v38  ;;  %v3323_v38 = vand.u32 4294901760, %v12320_v6  ;;  %v12407_v9 = vpack.c.bf16 %v3346_v34, %v3339_v52 }
 0x44b   :  { %v3330_v22 = vand.u32 4294901760, %v12322_v55 }
 0x44c   :  { %v3324_v40 = vsub.f32 %v12320_v6, %v3323_v38 }
 0x44d   :  { %v3331_v36 = vsub.f32 %v12322_v55, %v3330_v22 }
 0x44e   :  { %v3325_v30 = vand.u32 4294901760, %v3324_v40  ;;  %v14214_v40 = vand.u32 4294901760, %v12371_v4 }
 0x44f   :  { %v3332_v29 = vand.u32 4294901760, %v3331_v36 }
 0x450   :  { %v3401_v13 = vsub.f32 %v12371_v4, %v14214_v40 }
 0x451   :  { %v12403_v31 = vpack.c.bf16 %v3332_v29, %v3325_v30  ;;  %v9810_v30 = vpack.c.bf16 %v3388_v43, %v3381_v58  ;;  %v3394_v29 = vsub.f32 %v12369_v44, %v14215_v15  ;;  %v3429_v43 = vsub.f32 %v12385_v26, %v14210_v3 }
 0x452   :  { %v3402_v63 = vand.u32 4294901760, %v3401_v13 }
 0x453   :  { %v3395_v34 = vand.u32 4294901760, %v3394_v29  ;;  %v3430_v29 = vand.u32 4294901760, %v3429_v43  ;;  %v9837_v43 = vpack.c.bf16 %v12371_v4, %v12369_v44 }
 0x455   :  { %v9813_v59 = vpack.c.bf16 %v3402_v63, %v3395_v34  ;;  %v9825_v34 = vpack.c.bf16 %v12326_v32, %v12324_v16  ;;  %v9828_v63 = vpack.c.bf16 %v12333_v27, %v12328_v8 }
 0x469   :  { %v2799_v2 = vpop.f32.mrb[20].mxu1 }
 0x46a   :  { %v12355_v10 = vadd.f32 %v2799_v2, %v2649_v50  ;;  %v8120_v53 = vpop.f32.mrb[21].mxu1  ;;  %v14219_v50 = vand.u32 4294901760, %v12336_v49  ;;  %v14218_v2 = vand.u32 4294901760, %v12338_v24 }
 0x46c   :  { %v3366_v5 = vsub.f32 %v12336_v49, %v14219_v50  ;;  %v3373_v53 = vsub.f32 %v12338_v24, %v14218_v2  ;;  %v3881_v50 = vld [vmem:[#allocation5 + $0x1c8] sm:$0xff] }
 0x46e   :  { %v3367_v14 = vand.u32 4294901760, %v3366_v5  ;;  %v3374_v57 = vand.u32 4294901760, %v3373_v53  ;;  %v3408_v5 = vsub.f32 %v12374_v12, %v14213_v48  ;;  %v3415_v53 = vsub.f32 %v12376_v37, %v14212_v18 }
 0x470   :  { %v9807_v25 = vpack.c.bf16 %v3374_v57, %v3367_v14  ;;  %v3409_v14 = vand.u32 4294901760, %v3408_v5  ;;  %v3416_v57 = vand.u32 4294901760, %v3415_v53  ;;  %v9831_v5 = vpack.c.bf16 %v12338_v24, %v12336_v49 }
 0x471   :  { %v9834_v53 = vpack.c.bf16 %v12367_v56, %v12365_v33 }
 0x472   :  { %v9816_v19 = vpack.c.bf16 %v3416_v57, %v3409_v14 }
 0x489   :  { %v2903_v36 = vpop.f32.mrb[22].mxu1 }
 0x48a   :  { %v2904_v62 = vadd.f32 %v2903_v36, %v12355_v10  ;;  %v8155_v52 = vpop.f32.mrb[23].mxu1  ;;  %v14211_v10 = vand.u32 4294901760, %v12383_v21 }
 0x48b   :  { %v9822_v52 = vpack.c.bf16 %v12322_v55, %v12320_v6  ;;  %v14577_v6 = vand.u32 4294901760, %v12328_v8  ;;  %v14578_v55 = vand.u32 4294901760, %v12333_v27  ;;  %v14583_v8 = vand.u32 4294901760, %v12369_v44  ;;  %v3885_v44 = vld [vmem:[#allocation5 + $0x1e8] sm:$0xff] }
 0x48c   :  { %v3422_v58 = vsub.f32 %v12383_v21, %v14211_v10  ;;  %v14584_v27 = vand.u32 4294901760, %v12371_v4  ;;  %v3936_v4 = vand.u32 4294901760, %v3885_v44 }
 0x48e   :  { %v3423_v36 = vand.u32 4294901760, %v3422_v58 }
 0x490   :  { %v9819_v13 = vpack.c.bf16 %v3430_v29, %v3423_v36  ;;  %v9840_v36 = vpack.c.bf16 %v12376_v37, %v12374_v12  ;;  %v9843_v29 = vpack.c.bf16 %v12385_v26, %v12383_v21 }
 0x4a9   :  { %v2992_v14 = vpop.f32.mrb[24].mxu1 }
 0x4aa   :  { %v2993_v57 = vadd.f32 %v2992_v14, %v2904_v62  ;;  %v8190_v58 = vpop.f32.mrb[25].mxu1 }
 0x4c9   :  { %v3111_v3 = vpop.f32.mrb[26].mxu1 }
 0x4ca   :  { %v3112_v10 = vadd.f32 %v3111_v3, %v2993_v57  ;;  %v8225_v18 = vpop.f32.mrb[27].mxu1  ;;  %v3879_v57 = vld [vmem:[#allocation5 + $0x1b8] sm:$0xff] }
 0x4e9   :  { %v3198_v48 = vpop.f32.mrb[28].mxu1 }
 0x4ea   :  { %v3199_v40 = vadd.f32 %v3198_v48, %v3112_v10  ;;  %v8260_v15 = vpop.f32.mrb[29].mxu1  ;;  %v3877_v48 = vld [vmem:[#allocation5 + $0x1a8] sm:$0xff] }
 0x4eb   :  { %v3875_v15 = vld [vmem:[#allocation5 + $0x198] sm:$0xff] }
 0x4ec   :  { %v12475_v0 = vadd.f32 %v3199_v40, %v11909_v42  ;;  %v3872_v42 = vld [vmem:[#allocation5 + $0x180] sm:$0xff] }
 0x4ee   :  { %v3203_v62 = vmax.f32 %v12475_v0, 0.0 }
 0x4f0   :  { %v12478_v14 = vand.u32 4294901760, %v3203_v62 }
 0x4f2   :  { %v12481_v58 = vsub.f32 %v3203_v62, %v12478_v14  ;;  %v3880_v62 = vld [vmem:[#allocation5 + $0x1c0] sm:$0xff] }
 0x4f4   :  { %v3312_v46 = vand.u32 4294901760, %v12481_v58 }
 0x4f6   :  { %v3313_v3 = vsub.f32 %v12481_v58, %v3312_v46 }
 0x4f8   :  { %v3314_v18 = vand.u32 4294901760, %v3313_v3 }
 0x4fa   :  { %8294 = vmatmul.mubr.f32.vlgmr.msra.gmra.mrb[8].mxu0 %v3314_v18 }
 0x4fb   :  { %9799 = vmatpush3.bf16.msra.mxu0 %v12403_v31  ;;  %8328 = vmatprep.mubr.msk.f32.mxu0 %vm10727_vm0, %v14230_v45  ;;  %v3873_v31 = vld [vmem:[#allocation5 + $0x188] sm:$0xff] }
 0x4fc   :  { %9800 = vmatprep.subr.bf16.mxu0 %v14236_v60 }
 0x4ff   :  { %9802 = vmatpush3.bf16.msra.mxu0 %v12407_v9  ;;  %v3874_v9 = vld [vmem:[#allocation5 + $0x190] sm:$0xff] }
 0x500   :  { %9803 = vmatprep.subr.bf16.mxu0 %v14236_v60  ;;  %v3903_v40 = vand.u32 4294901760, %v3874_v9 }
 0x502   :  { %v12510_v2 = vsub.f32 %v3874_v9, %v3903_v40  ;;  %v3924_v9 = vand.u32 4294901760, %v3881_v50 }
 0x503   :  { %9805 = vmatpush3.bf16.msra.mxu0 %v12417_v11  ;;  %v3897_v11 = vand.u32 4294901760, %v3872_v42 }
 0x504   :  { %9806 = vmatprep.subr.bf16.mxu0 %v14236_v60 }
 0x507   :  { %9808 = vmatpush3.bf16.msra.mxu0 %v9807_v25  ;;  %v3900_v25 = vand.u32 4294901760, %v3873_v31 }
 0x508   :  { %9809 = vmatprep.subr.bf16.mxu0 %v14236_v60 }
 0x509   :  { %v12504_v3 = vpack.c.bf16 %v3900_v25, %v3897_v11  ;;  %v12508_v18 = vsub.f32 %v3873_v31, %v3900_v25  ;;  %v3918_v31 = vand.u32 4294901760, %v3879_v57 }
 0x50b   :  { %9811 = vmatpush3.bf16.msra.mxu0 %v9810_v30  ;;  %v3876_v30 = vld [vmem:[#allocation5 + $0x1a0] sm:$0xff]  ;;  %9919 = vmatpush3.bf16.msra.mxu1 %v12504_v3 }
 0x50c   :  { %9812 = vmatprep.subr.bf16.mxu0 %v14236_v60  ;;  %v3909_v10 = vand.u32 4294901760, %v3876_v30  ;;  %9920 = vmatprep.subr.bf16.mxu1 %v14236_v60 }
 0x50e   :  { %v12516_v17 = vsub.f32 %v3876_v30, %v3909_v10  ;;  %v12532_v30 = vsub.f32 %v3881_v50, %v3924_v9 }
 0x50f   :  { %9814 = vmatpush3.bf16.msra.mxu0 %v9813_v59  ;;  %v3906_v59 = vand.u32 4294901760, %v3875_v15 }
 0x510   :  { %9815 = vmatprep.subr.bf16.mxu0 %v14236_v60 }
 0x511   :  { %v12512_v47 = vpack.c.bf16 %v3906_v59, %v3903_v40  ;;  %v12514_v20 = vsub.f32 %v3875_v15, %v3906_v59  ;;  %v12528_v15 = vsub.f32 %v3879_v57, %v3918_v31 }
 0x513   :  { %9817 = vmatpush3.bf16.msra.mxu0 %v9816_v19  ;;  %v3912_v19 = vand.u32 4294901760, %v3877_v48  ;;  %9922 = vmatpush3.bf16.msra.mxu1 %v12512_v47 }
 0x514   :  { %9818 = vmatprep.subr.bf16.mxu0 %v14236_v60  ;;  %9923 = vmatprep.subr.bf16.mxu1 %v14236_v60 }
 0x515   :  { %v12522_v39 = vsub.f32 %v3877_v48, %v3912_v19  ;;  %v9885_v48 = vpack.c.bf16 %v14584_v27, %v14583_v8 }
 0x517   :  { %9820 = vmatpush3.bf16.msra.mxu0 %v9819_v13  ;;  %v3878_v13 = vld [vmem:[#allocation5 + $0x1b0] sm:$0xff] }
 0x518   :  { %9821 = vmatprep.subr.bf16.mxu0 %v14236_v60 }
 0x51a   :  { %8329 = vmatmul.mubr.f32.vlgmr.msra.gmra.mrb[8].mxu0 %v12478_v14 }
 0x51b   :  { %9823 = vmatpush3.bf16.msra.mxu0 %v9822_v52  ;;  %8363 = vmatprep.mubr.msk.f32.mxu0 %vm10727_vm0, %v14230_v45  ;;  %v12506_v52 = vsub.f32 %v3872_v42, %v3897_v11  ;;  %v3915_v42 = vand.u32 4294901760, %v3878_v13  ;;  %v3921_v11 = vand.u32 4294901760, %v3880_v62 }
 0x51c   :  { %9824 = vmatprep.subr.bf16.mxu0 %v14236_v60 }
 0x51d   :  { %v12526_v25 = vsub.f32 %v3878_v13, %v3915_v42  ;;  %v12530_v40 = vsub.f32 %v3880_v62, %v3921_v11  ;;  %v12546_v50 = vpack.c.bf16 %v3918_v31, %v3915_v42 }
 0x51f   :  { %9826 = vmatpush3.bf16.msra.mxu0 %v9825_v34  ;;  %v12538_v34 = vpack.c.bf16 %v3912_v19, %v3909_v10  ;;  %v3997_v19 = vand.u32 4294901760, %v12508_v18 }
 0x520   :  { %9827 = vmatprep.subr.bf16.mxu0 %v14236_v60 }
 0x521   :  { %9925 = vmatpush3.bf16.msra.mxu1 %v12538_v34  ;;  %v3998_v62 = vsub.f32 %v12508_v18, %v3997_v19 }
 0x522   :  { %9926 = vmatprep.subr.bf16.mxu1 %v14236_v60 }
 0x523   :  { %9829 = vmatpush3.bf16.msra.mxu0 %v9828_v63  ;;  %v12554_v63 = vpack.c.bf16 %v3924_v9, %v3921_v11  ;;  %v12681_v9 = vsub.f32 %v3885_v44, %v3936_v4 }
 0x524   :  { %9830 = vmatprep.subr.bf16.mxu0 %v14236_v60 }
 0x525   :  { %9928 = vmatpush3.bf16.msra.mxu1 %v12546_v50 }
 0x526   :  { %9929 = vmatprep.subr.bf16.mxu1 %v14236_v60 }
 0x527   :  { %9832 = vmatpush3.bf16.msra.mxu0 %v9831_v5  ;;  %v9870_v5 = vpack.c.bf16 %v3330_v22, %v3323_v38  ;;  %v9876_v38 = vpack.c.bf16 %v14578_v55, %v14577_v6  ;;  %v14579_v22 = vand.u32 4294901760, %v12336_v49  ;;  %v14585_v49 = vand.u32 4294901760, %v12374_v12 }
 0x528   :  { %9833 = vmatprep.subr.bf16.mxu0 %v14236_v60  ;;  %v4004_v6 = vand.u32 4294901760, %v12510_v2  ;;  %v4011_v55 = vand.u32 4294901760, %v12514_v20 }
 0x529   :  { %9931 = vmatpush3.bf16.msra.mxu1 %v12554_v63 }
 0x52a   :  { %9932 = vmatprep.subr.bf16.mxu1 %v14236_v60 }
 0x52b   :  { %9835 = vmatpush3.bf16.msra.mxu0 %v9834_v53  ;;  %v14575_v53 = vand.u32 4294901760, %v12324_v16  ;;  %v14580_v16 = vand.u32 4294901760, %v12338_v24  ;;  %v14586_v24 = vand.u32 4294901760, %v12376_v37  ;;  %v3886_v37 = vld [vmem:[#allocation5 + $0x1f0] sm:$0xff] }
 0x52c   :  { %9836 = vmatprep.subr.bf16.mxu0 %v14236_v60 }
 0x52d   :  { %v9888_v59 = vpack.c.bf16 %v14586_v24, %v14585_v49 }
 0x52f   :  { %9838 = vmatpush3.bf16.msra.mxu0 %v9837_v43  ;;  %v14576_v43 = vand.u32 4294901760, %v12326_v32  ;;  %v9879_v32 = vpack.c.bf16 %v14580_v16, %v14579_v22  ;;  %v4005_v22 = vsub.f32 %v12510_v2, %v4004_v6  ;;  %v4012_v16 = vsub.f32 %v12514_v20, %v4011_v55 }
 0x530   :  { %9839 = vmatprep.subr.bf16.mxu0 %v14236_v60 }
 0x533   :  { %9841 = vmatpush3.bf16.msra.mxu0 %v9840_v36  ;;  %v9873_v36 = vpack.c.bf16 %v14576_v43, %v14575_v53 }
 0x534   :  { %9842 = vmatprep.subr.bf16.mxu0 %v14236_v60 }
 0x537   :  { %9844 = vmatpush3.bf16.msra.mxu0 %v9843_v29  ;;  %v14582_v29 = vand.u32 4294901760, %v12367_v56  ;;  %v14588_v56 = vand.u32 4294901760, %v12385_v26 }
 0x538   :  { %9845 = vmatprep.subr.bf16.mxu0 %v14236_v60 }
 0x53a   :  { %8364 = vmatmul.mubr.f32.vlgmr.msra.gmra.mrb[8].mxu0 %v12481_v58 }
 0x53b   :  { %9847 = vmatpush3.bf16.msra.mxu0 %v12318_v7  ;;  %8398 = vmatprep.mubr.msk.f32.mxu0 %vm10727_vm0, %v14230_v45 }
 0x53c   :  { %9848 = vmatprep.subr.bf16.mxu0 %v14236_v60 }
 0x53f   :  { %9850 = vmatpush3.bf16.msra.mxu0 %v12331_v54 }
 0x540   :  { %9851 = vmatprep.subr.bf16.mxu0 %v14236_v60 }
 0x543   :  { %9853 = vmatpush3.bf16.msra.mxu0 %v12341_v61 }
 0x544   :  { %9854 = vmatprep.subr.bf16.mxu0 %v14236_v60 }
 0x547   :  { %9856 = vmatpush3.bf16.msra.mxu0 %v12345_v1 }
 0x548   :  { %9857 = vmatprep.subr.bf16.mxu0 %v14236_v60 }
 0x54b   :  { %9859 = vmatpush3.bf16.msra.mxu0 %v12353_v41 }
 0x54c   :  { %9860 = vmatprep.subr.bf16.mxu0 %v14236_v60 }
 0x54f   :  { %9862 = vmatpush3.bf16.msra.mxu0 %v12359_v35 }
 0x550   :  { %9863 = vmatprep.subr.bf16.mxu0 %v14236_v60 }
 0x553   :  { %9865 = vmatpush3.bf16.msra.mxu0 %v12363_v51 }
 0x554   :  { %9866 = vmatprep.subr.bf16.mxu0 %v14236_v60 }
 0x557   :  { %9868 = vmatpush3.bf16.msra.mxu0 %v12381_v28 }
 0x558   :  { %9869 = vmatprep.subr.bf16.mxu0 %v14236_v60 }
 0x55a   :  { %8399 = vmatmul.mubr.f32.vlgmr.msra.gmra.mrb[8].mxu0 %v3312_v46  ;;  %v14581_v46 = vand.u32 4294901760, %v12365_v33  ;;  %v14587_v33 = vand.u32 4294901760, %v12383_v21  ;;  %v3939_v21 = vand.u32 4294901760, %v3886_v37 }
 0x55b   :  { %9871 = vmatpush3.bf16.msra.mxu0 %v9870_v5  ;;  %8433 = vmatprep.mubr.msk.f32.mxu0 %vm10727_vm0, %v14230_v45 }
 0x55c   :  { %9872 = vmatprep.subr.bf16.mxu0 %v14236_v60  ;;  %v9882_v58 = vpack.c.bf16 %v14582_v29, %v14581_v46  ;;  %v9891_v10 = vpack.c.bf16 %v14588_v56, %v14587_v33  ;;  %v12684_v5 = vsub.f32 %v3886_v37, %v3939_v21  ;;  %v4025_v46 = vand.u32 4294901760, %v12522_v39 }
 0x55d   :  { %v4006_v29 = vand.u32 4294901760, %v4005_v22  ;;  %v4039_v33 = vand.u32 4294901760, %v12528_v15 }
 0x55e   :  { %v4026_v27 = vsub.f32 %v12522_v39, %v4025_v46 }
 0x55f   :  { %9874 = vmatpush3.bf16.msra.mxu0 %v9873_v36  ;;  %v3999_v36 = vand.u32 4294901760, %v3998_v62 }
 0x560   :  { %9875 = vmatprep.subr.bf16.mxu0 %v14236_v60  ;;  %v4027_v24 = vand.u32 4294901760, %v4026_v27 }
 0x563   :  { %9877 = vmatpush3.bf16.msra.mxu0 %v9876_v38 }
 0x564   :  { %9878 = vmatprep.subr.bf16.mxu0 %v14236_v60 }
 0x567   :  { %9880 = vmatpush3.bf16.msra.mxu0 %v9879_v32  ;;  %v4018_v32 = vand.u32 4294901760, %v12516_v17 }
 0x568   :  { %9881 = vmatprep.subr.bf16.mxu0 %v14236_v60 }
 0x569   :  { %v4019_v8 = vsub.f32 %v12516_v17, %v4018_v32 }
 0x56b   :  { %9883 = vmatpush3.bf16.msra.mxu0 %v9882_v58  ;;  %v4013_v58 = vand.u32 4294901760, %v4012_v16  ;;  %v4020_v49 = vand.u32 4294901760, %v4019_v8 }
 0x56c   :  { %9884 = vmatprep.subr.bf16.mxu0 %v14236_v60 }
 0x56d   :  { %v9948_v56 = vpack.c.bf16 %v4027_v24, %v4020_v49 }
 0x56f   :  { %9886 = vmatpush3.bf16.msra.mxu0 %v9885_v48  ;;  %v9945_v48 = vpack.c.bf16 %v4013_v58, %v4006_v29  ;;  %v14226_v29 = vand.u32 4294901760, %v12681_v9 }
 0x570   :  { %9887 = vmatprep.subr.bf16.mxu0 %v14236_v60 }
 0x571   :  { %v4082_v27 = vsub.f32 %v12681_v9, %v14226_v29 }
 0x573   :  { %9889 = vmatpush3.bf16.msra.mxu0 %v9888_v59  ;;  %v4032_v59 = vand.u32 4294901760, %v12526_v25  ;;  %v4083_v24 = vand.u32 4294901760, %v4082_v27 }
 0x574   :  { %9890 = vmatprep.subr.bf16.mxu0 %v14236_v60 }
 0x577   :  { %9892 = vmatpush3.bf16.msra.mxu0 %v9891_v10  ;;  %v4033_v10 = vsub.f32 %v12526_v25, %v4032_v59 }
 0x578   :  { %9893 = vmatprep.subr.bf16.mxu0 %v14236_v60 }
 0x57a   :  { %8434 = vmatmul.mubr.f32.vlgmr.msra.gmra.mrb[8].mxu0 %v12478_v14 }
 0x57b   :  { %9895 = vmatpush3.bf16.msra.mxu0 %v12318_v7  ;;  %8468 = vmatprep.mubr.msk.f32.mxu0 %vm10727_vm0, %v14230_v45  ;;  %v3882_v7 = vld [vmem:[#allocation5 + $0x1d0] sm:$0xff] }
 0x57c   :  { %9896 = vmatprep.subr.bf16.mxu0 %v14236_v60 }
 0x57f   :  { %9898 = vmatpush3.bf16.msra.mxu0 %v12331_v54  ;;  %v3883_v54 = vld [vmem:[#allocation5 + $0x1d8] sm:$0xff] }
 0x580   :  { %9899 = vmatprep.subr.bf16.mxu0 %v14236_v60 }
 0x583   :  { %9901 = vmatpush3.bf16.msra.mxu0 %v12341_v61  ;;  %v3927_v61 = vand.u32 4294901760, %v3882_v7 }
 0x584   :  { %9902 = vmatprep.subr.bf16.mxu0 %v14236_v60 }
 0x585   :  { %v12675_v42 = vsub.f32 %v3882_v7, %v3927_v61  ;;  %v4040_v7 = vsub.f32 %v12528_v15, %v4039_v33 }
 0x587   :  { %9904 = vmatpush3.bf16.msra.mxu0 %v12345_v1  ;;  %v3930_v1 = vand.u32 4294901760, %v3883_v54 }
 0x588   :  { %9905 = vmatprep.subr.bf16.mxu0 %v14236_v60 }
 0x589   :  { %v12677_v31 = vsub.f32 %v3883_v54, %v3930_v1  ;;  %v4034_v54 = vand.u32 4294901760, %v4033_v10  ;;  %v14225_v10 = vand.u32 4294901760, %v12684_v5 }
 0x58b   :  { %9907 = vmatpush3.bf16.msra.mxu0 %v12353_v41  ;;  %v12657_v41 = vpack.c.bf16 %v3930_v1, %v3927_v61  ;;  %v4041_v61 = vand.u32 4294901760, %v4040_v7  ;;  %v4046_v1 = vand.u32 4294901760, %v12530_v40  ;;  %v9981_v27 = vpack.c.bf16 %v12677_v31, %v12675_v42 }
 0x58c   :  { %9908 = vmatprep.subr.bf16.mxu0 %v14236_v60 }
 0x58d   :  { %9934 = vmatpush3.bf16.msra.mxu1 %v12657_v41  ;;  %v9951_v44 = vpack.c.bf16 %v4041_v61, %v4034_v54  ;;  %v4089_v61 = vsub.f32 %v12684_v5, %v14225_v10 }
 0x58e   :  { %9935 = vmatprep.subr.bf16.mxu1 %v14236_v60 }
 0x58f   :  { %9910 = vmatpush3.bf16.msra.mxu0 %v12359_v35  ;;  %v3884_v35 = vld [vmem:[#allocation5 + $0x1e0] sm:$0xff] }
 0x590   :  { %9911 = vmatprep.subr.bf16.mxu0 %v14236_v60 }
 0x593   :  { %9913 = vmatpush3.bf16.msra.mxu0 %v12363_v51  ;;  %v3933_v51 = vand.u32 4294901760, %v3884_v35 }
 0x594   :  { %9914 = vmatprep.subr.bf16.mxu0 %v14236_v60 }
 0x595   :  { %v12661_v12 = vpack.c.bf16 %v3936_v4, %v3933_v51  ;;  %v12679_v11 = vsub.f32 %v3884_v35, %v3933_v51  ;;  %v4053_v35 = vand.u32 4294901760, %v12532_v30  ;;  %v4047_v51 = vsub.f32 %v12530_v40, %v4046_v1 }
 0x597   :  { %9916 = vmatpush3.bf16.msra.mxu0 %v12381_v28  ;;  %v3887_v28 = vld [vmem:[#allocation5 + $0x1f8] sm:$0xff]  ;;  %9937 = vmatpush3.bf16.msra.mxu1 %v12661_v12  ;;  %v4054_v4 = vsub.f32 %v12532_v30, %v4053_v35  ;;  %v4048_v37 = vand.u32 4294901760, %v4047_v51  ;;  %v14227_v16 = vand.u32 4294901760, %v12679_v11 }
 0x598   :  { %10061 = vmatprep.subr.bf16.mxu0 %v14236_v60  ;;  %v3942_v26 = vand.u32 4294901760, %v3887_v28  ;;  %9938 = vmatprep.subr.bf16.mxu1 %v14236_v60 }
 0x599   :  { %v4075_v8 = vsub.f32 %v12679_v11, %v14227_v16 }
 0x59a   :  { %8469 = vmatmul.mubr.f32.vlgmr.msra.gmra.mrb[8].mxu0 %v12478_v14  ;;  %v3990_v14 = vand.u32 4294901760, %v12506_v52  ;;  %v12667_v13 = vpack.c.bf16 %v3942_v26, %v3939_v21  ;;  %v12686_v53 = vsub.f32 %v3887_v28, %v3942_v26  ;;  %v4055_v28 = vand.u32 4294901760, %v4054_v4 }
 0x59b   :  { %8713 = vmatprep.mubr.msk.f32.mxu0 %vm10727_vm0, %v14230_v45  ;;  %v14229_v21 = vand.u32 4294901760, %v12675_v42  ;;  %v14228_v26 = vand.u32 4294901760, %v12677_v31  ;;  %v4076_v49 = vand.u32 4294901760, %v4075_v8  ;;  %v4090_v4 = vand.u32 4294901760, %v4089_v61  ;;  %v6802_v61 = vld [vmem:[%s14063_s2 + $0x2] ss:$0 sm:$0xff] }
 0x59c   :  { %v3991_v57 = vsub.f32 %v12506_v52, %v3990_v14  ;;  %9940 = vmatpush3.bf16.msra.mxu1 %v12667_v13  ;;  %v14224_v7 = vand.u32 4294901760, %v12686_v53  ;;  %v9978_v8 = vpack.c.bf16 %v12532_v30, %v12530_v40  ;;  %v14593_v40 = vand.u32 4294901760, %v12684_v5 }
 0x59d   :  { %9941 = vmatprep.subr.bf16.mxu1 %v14236_v60  ;;  %v4061_v62 = vsub.f32 %v12675_v42, %v14229_v21  ;;  %v9960_v54 = vpack.c.bf16 %v4083_v24, %v4076_v49  ;;  %v9984_v49 = vpack.c.bf16 %v12681_v9, %v12679_v11  ;;  %v9987_v24 = vpack.c.bf16 %v12686_v53, %v12684_v5 }
 0x59e   :  { %v3992_v43 = vand.u32 4294901760, %v3991_v57  ;;  %v9954_v57 = vpack.c.bf16 %v4055_v28, %v4048_v37  ;;  %v4096_v51 = vsub.f32 %v12686_v53, %v14224_v7  ;;  %v14594_v30 = vand.u32 4294901760, %v12686_v53 }
 0x5a0   :  { %v12691_v38 = vpack.c.bf16 %v3999_v36, %v3992_v43  ;;  %v4068_v43 = vsub.f32 %v12677_v31, %v14228_v26  ;;  %v4062_v36 = vand.u32 4294901760, %v4061_v62  ;;  %v4097_v37 = vand.u32 4294901760, %v4096_v51 }
 0x5a1   :  { %v9966_v62 = vpack.c.bf16 %v12508_v18, %v12506_v52  ;;  %v10020_v52 = vpack.c.bf16 %v4025_v46, %v4018_v32  ;;  %v4544_v32 = vld [vmem:[#allocation5 + $0x220] sm:$0xff] }
 0x5a2   :  { %v4069_v22 = vand.u32 4294901760, %v4068_v43  ;;  %v9963_v28 = vpack.c.bf16 %v4097_v37, %v4090_v4  ;;  %v9969_v43 = vpack.c.bf16 %v12514_v20, %v12510_v2  ;;  %v10023_v20 = vpack.c.bf16 %v4039_v33, %v4032_v59 }
 0x5a3   :  { %v10026_v2 = vpack.c.bf16 %v4053_v35, %v4046_v1  ;;  %v4545_v1 = vld [vmem:[#allocation5 + $0x228] sm:$0xff]  ;;  %v5210_v35 = vld [vmem:[#allocation5 + $0x2a0] sm:$0xff] }
 0x5a4   :  { %v9957_v58 = vpack.c.bf16 %v4069_v22, %v4062_v36  ;;  %v9972_v36 = vpack.c.bf16 %v12522_v39, %v12516_v17  ;;  %v9975_v22 = vpack.c.bf16 %v12528_v15, %v12526_v25  ;;  %v14589_v39 = vand.u32 4294901760, %v12675_v42 }
 0x5a5   :  { %v14590_v17 = vand.u32 4294901760, %v12677_v31  ;;  %v14591_v25 = vand.u32 4294901760, %v12679_v11  ;;  %v14592_v15 = vand.u32 4294901760, %v12681_v9  ;;  %v4542_v11 = vld [vmem:[#allocation5 + $0x210] sm:$0xff]  ;;  %v4543_v9 = vld [vmem:[#allocation5 + $0x218] sm:$0xff] }
 0x5a6   :  { %v4571_v5 = vand.u32 4294901760, %v4542_v11  ;;  %v4574_v53 = vand.u32 4294901760, %v4543_v9 }
 0x5a7   :  { %v10029_v18 = vpack.c.bf16 %v14590_v17, %v14589_v39 }
 0x66d   :  { %v3866_v51 = vpop.f32.mrb[8].mxu0 }
 0x66e   :  { %v10542_v4 = vadd.f32 %v6802_v61, %v3866_v51  ;;  %v8470_v37 = vpop.f32.mrb[9].mxu0  ;;  %v5213_v51 = vld [vmem:[#allocation5 + $0x2b8] sm:$0xff] }
 0x66f   :  { %v5252_v17 = vand.u32 4294901760, %v5213_v51 }
 0x670   :  { %v3870_v7 = vmax.f32 %v10542_v4, 0.0 }
 0x672   :  { %v12766_v10 = vand.u32 4294901760, %v3870_v7 }
 0x674   :  { %v3978_v29 = vsub.f32 %v3870_v7, %v12766_v10 }
 0x676   :  { %v3979_v16 = vand.u32 4294901760, %v3978_v29 }
 0x678   :  { %v3980_v26 = vsub.f32 %v3978_v29, %v3979_v16 }
 0x67a   :  { %v3981_v21 = vand.u32 4294901760, %v3980_v26 }
 0x67c   :  { %8504 = vmatmul.mubr.f32.vlgmr.msra.gmra.mrb[30].mxu1 %v3981_v21 }
 0x67d   :  { %9943 = vmatpush3.bf16.msra.mxu1 %v12691_v38  ;;  %8538 = vmatprep.mubr.msk.f32.mxu1 %vm10727_vm0, %v14230_v45  ;;  %v10014_v38 = vpack.c.bf16 %v3997_v19, %v3990_v14  ;;  %v10032_v14 = vpack.c.bf16 %v14592_v15, %v14591_v25  ;;  %v10035_v19 = vpack.c.bf16 %v14594_v30, %v14593_v40  ;;  %v6804_v30 = vld [vmem:[%s14063_s2 + $0x3] ss:$0 sm:$0xff] }
 0x67e   :  { %9944 = vmatprep.subr.bf16.mxu1 %v14236_v60  ;;  %v12925_v15 = vsub.f32 %v5213_v51, %v5252_v17 }
 0x681   :  { %9946 = vmatpush3.bf16.msra.mxu1 %v9945_v48  ;;  %v10017_v48 = vpack.c.bf16 %v4011_v55, %v4004_v6  ;;  %v5208_v6 = vld [vmem:[#allocation5 + $0x290] sm:$0xff]  ;;  %v5209_v55 = vld [vmem:[#allocation5 + $0x298] sm:$0xff] }
 0x682   :  { %9947 = vmatprep.subr.bf16.mxu1 %v14236_v60  ;;  %v5240_v7 = vand.u32 4294901760, %v5209_v55 }
 0x685   :  { %9949 = vmatpush3.bf16.msra.mxu1 %v9948_v56 }
 0x686   :  { %9950 = vmatprep.subr.bf16.mxu1 %v14236_v60 }
 0x689   :  { %9952 = vmatpush3.bf16.msra.mxu1 %v9951_v44  ;;  %v5211_v44 = vld [vmem:[#allocation5 + $0x2a8] sm:$0xff] }
 0x68a   :  { %9953 = vmatprep.subr.bf16.mxu1 %v14236_v60 }
 0x68d   :  { %9955 = vmatpush3.bf16.msra.mxu1 %v9954_v57  ;;  %v12887_v57 = vpack.c.bf16 %v4574_v53, %v4571_v5 }
 0x68e   :  { %9956 = vmatprep.subr.bf16.mxu1 %v14236_v60 }
 0x68f   :  { %14597 = vst [vmem:[#allocation20_spill] sm:$0xff] %v12887_v57 }
 0x691   :  { %9958 = vmatpush3.bf16.msra.mxu1 %v9957_v58  ;;  %v12892_v58 = vsub.f32 %v4543_v9, %v4574_v53  ;;  %v4551_v53 = vld [vmem:[#allocation5 + $0x258] sm:$0xff] }
 0x692   :  { %9959 = vmatprep.subr.bf16.mxu1 %v14236_v60 }
 0x695   :  { %9961 = vmatpush3.bf16.msra.mxu1 %v9960_v54  ;;  %v4577_v54 = vand.u32 4294901760, %v4544_v32 }
 0x696   :  { %9962 = vmatprep.subr.bf16.mxu1 %v14236_v60 }
 0x697   :  { %v12903_v61 = vsub.f32 %v4544_v32, %v4577_v54 }
 0x699   :  { %9964 = vmatpush3.bf16.msra.mxu1 %v9963_v28  ;;  %v4580_v28 = vand.u32 4294901760, %v4545_v1 }
 0x69a   :  { %9965 = vmatprep.subr.bf16.mxu1 %v14236_v60 }
 0x69b   :  { %v12905_v4 = vpack.c.bf16 %v4580_v28, %v4577_v54  ;;  %v12907_v37 = vsub.f32 %v4545_v1, %v4580_v28  ;;  %v4552_v54 = vld [vmem:[#allocation5 + $0x260] sm:$0xff]  ;;  %v4553_v28 = vld [vmem:[#allocation5 + $0x268] sm:$0xff] }
 0x69c   :  { %8539 = vmatmul.mubr.f32.vlgmr.msra.gmra.mrb[32].mxu1 %v12766_v10 }
 0x69d   :  { %9967 = vmatpush3.bf16.msra.mxu1 %v9966_v62  ;;  %8573 = vmatprep.mubr.msk.f32.mxu1 %vm10727_vm0, %v14230_v45  ;;  %v5243_v62 = vand.u32 4294901760, %v5210_v35  ;;  %14599 = vst [vmem:[#allocation22_spill] sm:$0xff] %v12905_v4 }
 0x69e   :  { %9968 = vmatprep.subr.bf16.mxu1 %v14236_v60 }
 0x6a1   :  { %9970 = vmatpush3.bf16.msra.mxu1 %v9969_v43  ;;  %v5246_v43 = vand.u32 4294901760, %v5211_v44 }
 0x6a2   :  { %9971 = vmatprep.subr.bf16.mxu1 %v14236_v60 }
 0x6a3   :  { %v12918_v39 = vpack.c.bf16 %v5246_v43, %v5243_v62 }
 0x6a5   :  { %9973 = vmatpush3.bf16.msra.mxu1 %v9972_v36  ;;  %v4547_v36 = vld [vmem:[#allocation5 + $0x238] sm:$0xff]  ;;  %14600 = vst [vmem:[#allocation23_spill] sm:$0xff] %v12918_v39 }
 0x6a6   :  { %9974 = vmatprep.subr.bf16.mxu1 %v14236_v60 }
 0x6a9   :  { %9976 = vmatpush3.bf16.msra.mxu1 %v9975_v22 }
 0x6aa   :  { %9977 = vmatprep.subr.bf16.mxu1 %v14236_v60 }
 0x6ad   :  { %9979 = vmatpush3.bf16.msra.mxu1 %v9978_v8  ;;  %v5212_v8 = vld [vmem:[#allocation5 + $0x2b0] sm:$0xff] }
 0x6ae   :  { %9980 = vmatprep.subr.bf16.mxu1 %v14236_v60 }
 0x6b1   :  { %9982 = vmatpush3.bf16.msra.mxu1 %v9981_v27 }
 0x6b2   :  { %9983 = vmatprep.subr.bf16.mxu1 %v14236_v60 }
 0x6b5   :  { %9985 = vmatpush3.bf16.msra.mxu1 %v9984_v49 }
 0x6b6   :  { %9986 = vmatprep.subr.bf16.mxu1 %v14236_v60 }
 0x6b9   :  { %9988 = vmatpush3.bf16.msra.mxu1 %v9987_v24  ;;  %v12901_v24 = vsub.f32 %v5209_v55, %v5240_v7 }
 0x6ba   :  { %9989 = vmatprep.subr.bf16.mxu1 %v14236_v60 }
 0x6bc   :  { %8574 = vmatmul.mubr.f32.vlgmr.msra.gmra.mrb[34].mxu1 %v3978_v29  ;;  %v4546_v29 = vld [vmem:[#allocation5 + $0x230] sm:$0xff] }
 0x6bd   :  { %9991 = vmatpush3.bf16.msra.mxu1 %v12504_v3  ;;  %8608 = vmatprep.mubr.msk.f32.mxu1 %vm10727_vm0, %v14230_v45  ;;  %v4583_v22 = vand.u32 4294901760, %v4546_v29 }
 0x6be   :  { %9992 = vmatprep.subr.bf16.mxu1 %v14236_v60 }
 0x6c1   :  { %9994 = vmatpush3.bf16.msra.mxu1 %v12512_v47 }
 0x6c2   :  { %9995 = vmatprep.subr.bf16.mxu1 %v14236_v60 }
 0x6c5   :  { %9997 = vmatpush3.bf16.msra.mxu1 %v12538_v34 }
 0x6c6   :  { %9998 = vmatprep.subr.bf16.mxu1 %v14236_v60 }
 0x6c9   :  { %10000 = vmatpush3.bf16.msra.mxu1 %v12546_v50 }
 0x6ca   :  { %10001 = vmatprep.subr.bf16.mxu1 %v14236_v60 }
 0x6cd   :  { %10003 = vmatpush3.bf16.msra.mxu1 %v12554_v63 }
 0x6ce   :  { %10004 = vmatprep.subr.bf16.mxu1 %v14236_v60 }
 0x6d1   :  { %10006 = vmatpush3.bf16.msra.mxu1 %v12657_v41 }
 0x6d2   :  { %10007 = vmatprep.subr.bf16.mxu1 %v14236_v60 }
 0x6d5   :  { %10009 = vmatpush3.bf16.msra.mxu1 %v12661_v12 }
 0x6d6   :  { %10010 = vmatprep.subr.bf16.mxu1 %v14236_v60 }
 0x6d9   :  { %10012 = vmatpush3.bf16.msra.mxu1 %v12667_v13 }
 0x6da   :  { %10013 = vmatprep.subr.bf16.mxu1 %v14236_v60 }
 0x6dc   :  { %8609 = vmatmul.mubr.f32.vlgmr.msra.gmra.mrb[36].mxu1 %v3979_v16  ;;  %v12889_v16 = vsub.f32 %v4542_v11, %v4571_v5  ;;  %v4550_v5 = vld [vmem:[#allocation5 + $0x250] sm:$0xff] }
 0x6dd   :  { %10015 = vmatpush3.bf16.msra.mxu1 %v10014_v38  ;;  %8643 = vmatprep.mubr.msk.f32.mxu1 %vm10727_vm0, %v14230_v45  ;;  %v12909_v38 = vsub.f32 %v5210_v35, %v5243_v62  ;;  %v4595_v1 = vand.u32 4294901760, %v4550_v5  ;;  %v4598_v35 = vand.u32 4294901760, %v4551_v53  ;;  %v5218_v62 = vld [vmem:[#allocation5 + $0x2e0] sm:$0xff] }
 0x6de   :  { %10016 = vmatprep.subr.bf16.mxu1 %v14236_v60 }
 0x6e1   :  { %10018 = vmatpush3.bf16.msra.mxu1 %v10017_v48  ;;  %v12912_v48 = vsub.f32 %v5211_v44, %v5246_v43  ;;  %v5217_v44 = vld [vmem:[#allocation5 + $0x2d8] sm:$0xff]  ;;  %v4601_v43 = vand.u32 4294901760, %v4552_v54 }
 0x6e2   :  { %10019 = vmatprep.subr.bf16.mxu1 %v14236_v60 }
 0x6e5   :  { %10021 = vmatpush3.bf16.msra.mxu1 %v10020_v52  ;;  %v4586_v52 = vand.u32 4294901760, %v4547_v36 }
 0x6e6   :  { %10022 = vmatprep.subr.bf16.mxu1 %v14236_v60 }
 0x6e9   :  { %10024 = vmatpush3.bf16.msra.mxu1 %v10023_v20  ;;  %v12914_v20 = vsub.f32 %v4546_v29, %v4583_v22 }
 0x6ea   :  { %10025 = vmatprep.subr.bf16.mxu1 %v14236_v60 }
 0x6ed   :  { %10027 = vmatpush3.bf16.msra.mxu1 %v10026_v2  ;;  %v5249_v2 = vand.u32 4294901760, %v5212_v8 }
 0x6ee   :  { %10028 = vmatprep.subr.bf16.mxu1 %v14236_v60 }
 0x6ef   :  { %v12923_v25 = vsub.f32 %v5212_v8, %v5249_v2  ;;  %v12932_v40 = vpack.c.bf16 %v5252_v17, %v5249_v2  ;;  %v5267_v8 = vand.u32 4294901760, %v5218_v62  ;;  %v4554_v17 = vld [vmem:[#allocation5 + $0x270] sm:$0xff] }
 0x6f1   :  { %10030 = vmatpush3.bf16.msra.mxu1 %v10029_v18  ;;  %v12921_v18 = vsub.f32 %v4547_v36, %v4586_v52  ;;  %14602 = vst [vmem:[#allocation40_spill] sm:$0xff] %v12932_v40  ;;  %v4604_v36 = vand.u32 4294901760, %v4553_v28 }
 0x6f2   :  { %10031 = vmatprep.subr.bf16.mxu1 %v14236_v60 }
 0x6f5   :  { %10033 = vmatpush3.bf16.msra.mxu1 %v10032_v14  ;;  %v12928_v14 = vpack.c.bf16 %v4586_v52, %v4583_v22  ;;  %v5219_v22 = vld [vmem:[#allocation5 + $0x2e8] sm:$0xff]  ;;  %v12961_v52 = vpack.c.bf16 %v4604_v36, %v4601_v43 }
 0x6f6   :  { %10034 = vmatprep.subr.bf16.mxu1 %v14236_v60  ;;  %v5270_v51 = vand.u32 4294901760, %v5219_v22 }
 0x6f7   :  { %14601 = vst [vmem:[#allocation34_spill] sm:$0xff] %v12928_v14  ;;  %14607 = vst [vmem:[#allocation27_spill] sm:$0xff] %v12961_v52 }
 0x6f8   :  { %v12963_v2 = vpack.c.bf16 %v5270_v51, %v5267_v8 }
 0x6f9   :  { %10036 = vmatpush3.bf16.msra.mxu1 %v10035_v19  ;;  %v4548_v19 = vld [vmem:[#allocation5 + $0x240] sm:$0xff] }
 0x6fa   :  { %10037 = vmatprep.subr.bf16.mxu1 %v14236_v60  ;;  %14608 = vst [vmem:[#allocation30_spill] sm:$0xff] %v12963_v2 }
 0x6fc   :  { %8644 = vmatmul.mubr.f32.vlgmr.msra.gmra.mrb[38].mxu1 %v12766_v10 }
 0x6fd   :  { %10039 = vmatpush3.bf16.msra.mxu1 %v12504_v3  ;;  %8678 = vmatprep.mubr.msk.f32.mxu1 %vm10727_vm0, %v14230_v45 }
 0x6fe   :  { %10040 = vmatprep.subr.bf16.mxu1 %v14236_v60 }
 0x701   :  { %10042 = vmatpush3.bf16.msra.mxu1 %v12512_v47 }
 0x702   :  { %10043 = vmatprep.subr.bf16.mxu1 %v14236_v60 }
 0x705   :  { %10045 = vmatpush3.bf16.msra.mxu1 %v12538_v34  ;;  %v4540_v34 = vld [vmem:[#allocation5 + $0x200] sm:$0xff] }
 0x706   :  { %10046 = vmatprep.subr.bf16.mxu1 %v14236_v60 }
 0x709   :  { %10048 = vmatpush3.bf16.msra.mxu1 %v12546_v50  ;;  %v4541_v50 = vld [vmem:[#allocation5 + $0x208] sm:$0xff] }
 0x70a   :  { %10049 = vmatprep.subr.bf16.mxu1 %v14236_v60  ;;  %v4568_v42 = vand.u32 4294901760, %v4541_v50 }
 0x70c   :  { %v12879_v33 = vsub.f32 %v4541_v50, %v4568_v42  ;;  %v4589_v50 = vand.u32 4294901760, %v4548_v19 }
 0x70d   :  { %10051 = vmatpush3.bf16.msra.mxu1 %v12554_v63  ;;  %v5206_v63 = vld [vmem:[#allocation5 + $0x280] sm:$0xff] }
 0x70e   :  { %10052 = vmatprep.subr.bf16.mxu1 %v14236_v60  ;;  %v5231_v31 = vand.u32 4294901760, %v5206_v63 }
 0x710   :  { %v12881_v56 = vsub.f32 %v5206_v63, %v5231_v31 }
 0x711   :  { %10054 = vmatpush3.bf16.msra.mxu1 %v12657_v41  ;;  %v4565_v41 = vand.u32 4294901760, %v4540_v34 }
 0x712   :  { %10055 = vmatprep.subr.bf16.mxu1 %v14236_v60 }
 0x713   :  { %v12875_v46 = vpack.c.bf16 %v4568_v42, %v4565_v41  ;;  %v12877_v59 = vsub.f32 %v4540_v34, %v4565_v41  ;;  %v5214_v34 = vld [vmem:[#allocation5 + $0x2c0] sm:$0xff]  ;;  %v5215_v41 = vld [vmem:[#allocation5 + $0x2c8] sm:$0xff] }
 0x714   :  { %v5255_v42 = vand.u32 4294901760, %v5214_v34 }
 0x715   :  { %10057 = vmatpush3.bf16.msra.mxu1 %v12661_v12  ;;  %v5207_v12 = vld [vmem:[#allocation5 + $0x288] sm:$0xff]  ;;  %14595 = vst [vmem:[#allocation18_spill] sm:$0xff] %v12875_v46  ;;  %10063 = vmatpush3.bf16.msra.mxu0 %v12875_v46 }
 0x716   :  { %10058 = vmatprep.subr.bf16.mxu1 %v14236_v60  ;;  %10064 = vmatprep.subr.bf16.mxu0 %v14236_v60 }
 0x719   :  { %10060 = vmatpush3.bf16.msra.mxu1 %v12667_v13  ;;  %v5234_v13 = vand.u32 4294901760, %v5207_v12  ;;  %10066 = vmatpush3.bf16.msra.mxu0 %v12887_v57 }
 0x71a   :  { %10205 = vmatprep.subr.bf16.mxu1 %v14236_v60  ;;  %10067 = vmatprep.subr.bf16.mxu0 %v14236_v60 }
 0x71b   :  { %v12883_v21 = vpack.c.bf16 %v5234_v13, %v5231_v31  ;;  %v12885_v26 = vsub.f32 %v5207_v12, %v5234_v13  ;;  %v5258_v12 = vand.u32 4294901760, %v5215_v41 }
 0x71c   :  { %8679 = vmatmul.mubr.f32.vlgmr.msra.gmra.mrb[40].mxu1 %v12766_v10  ;;  %v5237_v10 = vand.u32 4294901760, %v5208_v6 }
 0x71d   :  { %8923 = vmatprep.mubr.msk.f32.mxu1 %vm10727_vm0, %v14230_v45  ;;  %14596 = vst [vmem:[#allocation19_spill] sm:$0xff] %v12883_v21  ;;  %10207 = vmatpush3.bf16.msra.mxu1 %v12883_v21  ;;  %v12945_v13 = vpack.c.bf16 %v5258_v12, %v5255_v42  ;;  %v4555_v45 = vld [vmem:[#allocation5 + $0x278] sm:$0xff] }
 0x71e   :  { %10208 = vmatprep.subr.bf16.mxu1 %v14236_v60  ;;  %v12897_v27 = vpack.c.bf16 %v5240_v7, %v5237_v10  ;;  %v12899_v49 = vsub.f32 %v5208_v6, %v5237_v10  ;;  %10069 = vmatpush3.bf16.msra.mxu0 %v12905_v4  ;;  %v5216_v6 = vld [vmem:[#allocation5 + $0x2d0] sm:$0xff]  ;;  %v12953_v10 = vpack.c.bf16 %v4598_v35, %v4595_v1 }
 0x71f   :  { %10070 = vmatprep.subr.bf16.mxu0 %v14236_v60  ;;  %14604 = vst [vmem:[#allocation24_spill] sm:$0xff] %v12945_v13  ;;  %v5261_v29 = vand.u32 4294901760, %v5216_v6 }
 0x720   :  { %14598 = vst [vmem:[#allocation21_spill] sm:$0xff] %v12897_v27  ;;  %14605 = vst [vmem:[#allocation25_spill] sm:$0xff] %v12953_v10 }
 0x721   :  { %10210 = vmatpush3.bf16.msra.mxu1 %v12897_v27 }
 0x722   :  { %10211 = vmatprep.subr.bf16.mxu1 %v14236_v60  ;;  %10072 = vmatpush3.bf16.msra.mxu0 %v12928_v14 }
 0x723   :  { %10073 = vmatprep.subr.bf16.mxu0 %v14236_v60 }
 0x725   :  { %10213 = vmatpush3.bf16.msra.mxu1 %v12918_v39 }
 0x726   :  { %10214 = vmatprep.subr.bf16.mxu1 %v14236_v60 }
 0x729   :  { %10216 = vmatpush3.bf16.msra.mxu1 %v12932_v40 }
 0x72a   :  { %10217 = vmatprep.subr.bf16.mxu1 %v14236_v60 }
 0x72d   :  { %10219 = vmatpush3.bf16.msra.mxu1 %v12945_v13  ;;  %v12978_v13 = vsub.f32 %v5216_v6, %v5261_v29  ;;  %v14244_v6 = vand.u32 4294901760, %v12879_v33 }
 0x72e   :  { %10220 = vmatprep.subr.bf16.mxu1 %v14236_v60 }
 0x74f   :  { %v12873_v47 = vpop.f32.mrb[30].mxu1 }
 0x750   :  { %v8505_v3 = vpop.f32.mrb[31].mxu1  ;;  %v3984_v31 = vadd.f32 %v6804_v30, %v12873_v47  ;;  %v5264_v47 = vand.u32 4294901760, %v5217_v44  ;;  %v12965_v30 = vsub.f32 %v4548_v19, %v4589_v50  ;;  %v12983_v19 = vsub.f32 %v4552_v54, %v4601_v43 }
 0x751   :  { %v4549_v3 = vld [vmem:[#allocation5 + $0x248] sm:$0xff] }
 0x752   :  { %v4592_v63 = vand.u32 4294901760, %v4549_v3  ;;  %v12955_v7 = vpack.c.bf16 %v5264_v47, %v5261_v29 }
 0x754   :  { %v12943_v11 = vpack.c.bf16 %v4592_v63, %v4589_v50  ;;  %14606 = vst [vmem:[#allocation26_spill] sm:$0xff] %v12955_v7  ;;  %10222 = vmatpush3.bf16.msra.mxu1 %v12955_v7  ;;  %v5221_v7 = vld [vmem:[#allocation5 + $0x2f8] sm:$0xff]  ;;  %v12989_v50 = vsub.f32 %v5219_v22, %v5270_v51  ;;  %v14249_v22 = vand.u32 4294901760, %v12892_v58 }
 0x755   :  { %10223 = vmatprep.subr.bf16.mxu1 %v14236_v60 }
 0x756   :  { %14603 = vst [vmem:[#allocation35_spill] sm:$0xff] %v12943_v11  ;;  %10075 = vmatpush3.bf16.msra.mxu0 %v12943_v11  ;;  %v12980_v11 = vsub.f32 %v5217_v44, %v5264_v47 }
 0x757   :  { %10076 = vmatprep.subr.bf16.mxu0 %v14236_v60 }
 0x758   :  { %10225 = vmatpush3.bf16.msra.mxu1 %v12963_v2 }
 0x75a   :  { %10078 = vmatpush3.bf16.msra.mxu0 %v12953_v10  ;;  %v12974_v10 = vsub.f32 %v4550_v5, %v4595_v1  ;;  %v5276_v5 = vand.u32 4294901760, %v5221_v7  ;;  %v14243_v1 = vand.u32 4294901760, %v12881_v56 }
 0x75b   :  { %10079 = vmatprep.subr.bf16.mxu0 %v14236_v60  ;;  %v12976_v60 = vsub.f32 %v4551_v53, %v4598_v35  ;;  %v14246_v53 = vand.u32 4294901760, %v12877_v59  ;;  %v14242_v35 = vand.u32 4294901760, %v12885_v26 }
 0x75d   :  { %v4659_v43 = vsub.f32 %v12877_v59, %v14246_v53  ;;  %v14253_v53 = vand.u32 4294901760, %v12907_v37 }
 0x75e   :  { %10081 = vmatpush3.bf16.msra.mxu0 %v12961_v52 }
 0x76f   :  { %v4134_v9 = vpop.f32.mrb[32].mxu1 }
 0x770   :  { %v12947_v55 = vadd.f32 %v4134_v9, %v3984_v31  ;;  %v8540_v32 = vpop.f32.mrb[33].mxu1  ;;  %v12967_v31 = vsub.f32 %v4549_v3, %v4592_v63  ;;  %v12969_v9 = vsub.f32 %v5214_v34, %v5255_v42  ;;  %v12985_v3 = vsub.f32 %v4553_v28, %v4604_v36 }
 0x771   :  { %v12971_v32 = vsub.f32 %v5215_v41, %v5258_v12  ;;  %v12987_v34 = vsub.f32 %v5218_v62, %v5267_v8  ;;  %v14609_v63 = vmov 0.0|0.0   ;;  %v4607_v41 = vand.u32 4294901760, %v4554_v17 }
 0x772   :  { %10082 = vmatprep.subr.bf16.mxu0 %v14609_v63  ;;  %10226 = vmatprep.subr.bf16.mxu1 %v14609_v63  ;;  %v4610_v42 = vand.u32 4294901760, %v4555_v45  ;;  %v5273_v12 = vand.u32 4294901760, %v5220_v23  ;;  %v13007_v62 = vsub.f32 %v5221_v7, %v5276_v5  ;;  %v4666_v36 = vsub.f32 %v12879_v33, %v14244_v6 }
 0x773   :  { %v12999_v29 = vsub.f32 %v4554_v17, %v4607_v41  ;;  %v14245_v7 = vand.u32 4294901760, %v12889_v16  ;;  %v4660_v8 = vand.u32 4294901760, %v4659_v43  ;;  %v14250_v17 = vand.u32 4294901760, %v12899_v49 }
 0x774   :  { %v12997_v44 = vpack.c.bf16 %v4610_v42, %v4607_v41  ;;  %v13001_v47 = vsub.f32 %v4555_v45, %v4610_v42  ;;  %v13003_v54 = vpack.c.bf16 %v5276_v5, %v5273_v12  ;;  %v13005_v28 = vsub.f32 %v5220_v23, %v5273_v12 }
 0x775   :  { %v5325_v45 = vsub.f32 %v12881_v56, %v14243_v1  ;;  %v5332_v23 = vsub.f32 %v12885_v26, %v14242_v35  ;;  %v4667_v51 = vand.u32 4294901760, %v4666_v36  ;;  %v14251_v41 = vand.u32 4294901760, %v12901_v24 }
 0x776   :  { %14610 = vst [vmem:[#allocation33_spill] sm:$0xff] %v12997_v44  ;;  %14611 = vst [vmem:[#allocation39_spill] sm:$0xff] %v13003_v54  ;;  %10084 = vmatpush3.bf16.msra.mxu0 %v12997_v44  ;;  %10228 = vmatpush3.bf16.msra.mxu1 %v13003_v54  ;;  %v4673_v5 = vsub.f32 %v12889_v16, %v14245_v7  ;;  %v4680_v35 = vsub.f32 %v12892_v58, %v14249_v22  ;;  %v14271_v52 = vand.u32 4294901760, %v12967_v31 }
 0x777   :  { %10085 = vmatprep.subr.bf16.mxu0 %v14609_v63  ;;  %10229 = vmatprep.subr.bf16.mxu1 %v14609_v63  ;;  %v5326_v42 = vand.u32 4294901760, %v5325_v45  ;;  %v5333_v12 = vand.u32 4294901760, %v5332_v23  ;;  %v13035_v1 = vpack.c.bf16 %v4667_v51, %v4660_v8  ;;  %v5339_v43 = vsub.f32 %v12899_v49, %v14250_v17 }
 0x778   :  { %v5346_v36 = vsub.f32 %v12901_v24, %v14251_v41  ;;  %v14252_v45 = vand.u32 4294901760, %v12903_v61  ;;  %v4674_v6 = vand.u32 4294901760, %v4673_v5  ;;  %v4681_v7 = vand.u32 4294901760, %v4680_v35 }
 0x779   :  { %v13044_v23 = vpack.c.bf16 %v5333_v12, %v5326_v42  ;;  %v5340_v54 = vand.u32 4294901760, %v5339_v43  ;;  %v14254_v51 = vand.u32 4294901760, %v12909_v38  ;;  %v4694_v41 = vsub.f32 %v12907_v37, %v14253_v53 }
 0x77a   :  { %v5347_v22 = vand.u32 4294901760, %v5346_v36  ;;  %v4687_v8 = vsub.f32 %v12903_v61, %v14252_v45  ;;  %v13051_v17 = vpack.c.bf16 %v4681_v7, %v4674_v6  ;;  %v14257_v42 = vand.u32 4294901760, %v12912_v48 }
 0x77b   :  { %v14260_v35 = vand.u32 4294901760, %v12914_v20  ;;  %v5353_v43 = vsub.f32 %v12909_v38, %v14254_v51  ;;  %v14263_v36 = vand.u32 4294901760, %v12921_v18  ;;  %v4695_v45 = vand.u32 4294901760, %v4694_v41 }
 0x77c   :  { %v13058_v12 = vpack.c.bf16 %v5347_v22, %v5340_v54  ;;  %v4688_v5 = vand.u32 4294901760, %v4687_v8  ;;  %v5360_v6 = vsub.f32 %v12912_v48, %v14257_v42  ;;  %v14268_v53 = vand.u32 4294901760, %v12923_v25 }
 0x77d   :  { %v4701_v7 = vsub.f32 %v12914_v20, %v14260_v35  ;;  %v5354_v54 = vand.u32 4294901760, %v5353_v43  ;;  %v4708_v22 = vsub.f32 %v12921_v18, %v14263_v36  ;;  %v14266_v8 = vand.u32 4294901760, %v12925_v15 }
 0x77e   :  { %v13075_v51 = vpack.c.bf16 %v4695_v45, %v4688_v5  ;;  %v5361_v41 = vand.u32 4294901760, %v5360_v6  ;;  %v5367_v42 = vsub.f32 %v12923_v25, %v14268_v53  ;;  %v14267_v43 = vand.u32 4294901760, %v12965_v30 }
 0x77f   :  { %v4702_v44 = vand.u32 4294901760, %v4701_v7  ;;  %v4709_v2 = vand.u32 4294901760, %v4708_v22  ;;  %v5374_v35 = vsub.f32 %v12925_v15, %v14266_v8  ;;  %v14274_v45 = vand.u32 4294901760, %v12969_v9 }
 0x780   :  { %v13085_v36 = vpack.c.bf16 %v5361_v41, %v5354_v54  ;;  %v5368_v40 = vand.u32 4294901760, %v5367_v42  ;;  %v14275_v5 = vand.u32 4294901760, %v12971_v32  ;;  %v4715_v22 = vsub.f32 %v12965_v30, %v14267_v43 }
 0x781   :  { %v13089_v6 = vpack.c.bf16 %v4709_v2, %v4702_v44  ;;  %v5375_v7 = vand.u32 4294901760, %v5374_v35  ;;  %v4722_v8 = vsub.f32 %v12967_v31, %v14271_v52  ;;  %v5381_v54 = vsub.f32 %v12969_v9, %v14274_v45 }
 0x782   :  { %v5388_v42 = vsub.f32 %v12971_v32, %v14275_v5  ;;  %v14280_v2 = vand.u32 4294901760, %v12974_v10  ;;  %v14286_v44 = vand.u32 4294901760, %v12976_v60  ;;  %v4716_v41 = vand.u32 4294901760, %v4715_v22 }
 0x783   :  { %v13105_v35 = vpack.c.bf16 %v5375_v7, %v5368_v40  ;;  %v4723_v43 = vand.u32 4294901760, %v4722_v8  ;;  %v14285_v53 = vand.u32 4294901760, %v12978_v13  ;;  %v5382_v52 = vand.u32 4294901760, %v5381_v54 }
 0x784   :  { %v5389_v39 = vand.u32 4294901760, %v5388_v42  ;;  %v4729_v45 = vsub.f32 %v12974_v10, %v14280_v2  ;;  %v4736_v5 = vsub.f32 %v12976_v60, %v14286_v44  ;;  %v14284_v7 = vand.u32 4294901760, %v12980_v11 }
 0x785   :  { %v13115_v40 = vpack.c.bf16 %v4723_v43, %v4716_v41  ;;  %v5395_v8 = vsub.f32 %v12978_v13, %v14285_v53  ;;  %v14283_v2 = vand.u32 4294901760, %v12983_v19  ;;  %v14297_v44 = vand.u32 4294901760, %v13005_v28 }
 0x786   :  { %v13121_v22 = vpack.c.bf16 %v5389_v39, %v5382_v52  ;;  %v4730_v54 = vand.u32 4294901760, %v4729_v45  ;;  %v4737_v42 = vand.u32 4294901760, %v4736_v5  ;;  %v14289_v52 = vand.u32 4294901760, %v12989_v50 }
 0x787   :  { %v5396_v57 = vand.u32 4294901760, %v5395_v8  ;;  %v4743_v39 = vsub.f32 %v12983_v19, %v14283_v2  ;;  %v14295_v2 = vand.u32 4294901760, %v13001_v47 }
 0x788   :  { %v13129_v43 = vpack.c.bf16 %v4737_v42, %v4730_v54  ;;  %v5416_v54 = vsub.f32 %v12989_v50, %v14289_v52  ;;  %v14292_v42 = vand.u32 4294901760, %v12999_v29  ;;  %v14296_v52 = vand.u32 4294901760, %v13007_v62 }
 0x789   :  { %v4744_v8 = vand.u32 4294901760, %v4743_v39  ;;  %v4764_v39 = vsub.f32 %v13001_v47, %v14295_v2 }
 0x78f   :  { %v4238_v14 = vpop.f32.mrb[34].mxu1 }
 0x790   :  { %v4239_v4 = vadd.f32 %v4238_v14, %v12947_v55  ;;  %v8575_v27 = vpop.f32.mrb[35].mxu1  ;;  %v5402_v14 = vsub.f32 %v12980_v11, %v14284_v7  ;;  %v14288_v55 = vand.u32 4294901760, %v12987_v34 }
 0x791   :  { %v14287_v27 = vand.u32 4294901760, %v12985_v3 }
 0x792   :  { %v5403_v45 = vand.u32 4294901760, %v5402_v14  ;;  %v5409_v41 = vsub.f32 %v12987_v34, %v14288_v55  ;;  %v4757_v55 = vsub.f32 %v12999_v29, %v14292_v42 }
 0x793   :  { %v4750_v5 = vsub.f32 %v12985_v3, %v14287_v27  ;;  %v5417_v27 = vand.u32 4294901760, %v5416_v54  ;;  %v5430_v54 = vsub.f32 %v13007_v62, %v14296_v52 }
 0x794   :  { %v13146_v7 = vpack.c.bf16 %v5403_v45, %v5396_v57  ;;  %v5410_v53 = vand.u32 4294901760, %v5409_v41  ;;  %v5423_v57 = vsub.f32 %v13005_v28, %v14297_v44  ;;  %v4765_v41 = vand.u32 4294901760, %v4764_v39 }
 0x795   :  { %v4751_v14 = vand.u32 4294901760, %v4750_v5  ;;  %v4758_v5 = vand.u32 4294901760, %v4757_v55  ;;  %v5431_v2 = vand.u32 4294901760, %v5430_v54 }
 0x796   :  { %14612 = vst [vmem:[#allocation46_spill] sm:$0xff] %v13146_v7  ;;  %v13161_v45 = vpack.c.bf16 %v5417_v27, %v5410_v53  ;;  %v5424_v42 = vand.u32 4294901760, %v5423_v57 }
 0x797   :  { %v13156_v21 = vpack.c.bf16 %v4751_v14, %v4744_v8  ;;  %v13166_v46 = vpack.c.bf16 %v4765_v41, %v4758_v5  ;;  %v10110_v8 = vpack.c.bf16 %v12879_v33, %v12877_v59 }
 0x798   :  { %v13168_v7 = vpack.c.bf16 %v5431_v2, %v5424_v42 }
 0x7af   :  { %v4327_v5 = vpop.f32.mrb[36].mxu1 }
 0x7b0   :  { %v4328_v54 = vadd.f32 %v4327_v5, %v4239_v4  ;;  %v8610_v52 = vpop.f32.mrb[37].mxu1 }
 0x7cf   :  { %v4446_v4 = vpop.f32.mrb[38].mxu1 }
 0x7d0   :  { %v4447_v52 = vadd.f32 %v4446_v4, %v4328_v54  ;;  %v8645_v5 = vpop.f32.mrb[39].mxu1  ;;  %v14638_v54 = vld [vmem:[#allocation35_spill] sm:$0xff]  ;;  %v14639_v4 = vld [vmem:[#allocation24_spill] sm:$0xff] }
 0x7d1   :  { %v14641_v5 = vld [vmem:[#allocation26_spill] sm:$0xff] }
 0x7ef   :  { %v4533_v55 = vpop.f32.mrb[40].mxu1 }
 0x7f0   :  { %v4534_v44 = vadd.f32 %v4533_v55, %v4447_v52  ;;  %v8680_v27 = vpop.f32.mrb[41].mxu1  ;;  %v14633_v55 = vld [vmem:[#allocation21_spill] sm:$0xff] }
 0x7f1   :  { %v14632_v27 = vld [vmem:[#allocation20_spill] sm:$0xff]  ;;  %v14640_v52 = vld [vmem:[#allocation25_spill] sm:$0xff] }
 0x7f2   :  { %v4537_v39 = vadd.f32 %v4534_v44, %v12475_v0  ;;  %v14613_v0 = vmov 0.0   ;;  %v14623_v44 = vpack.c.bf16 %v12971_v32, %v12969_v9 }
 0x7f4   :  { %v4538_v53 = vmax.f32 %v4537_v39, 0.0  ;;  %v14634_v39 = vld [vmem:[#allocation22_spill] sm:$0xff] }
 0x7f6   :  { %v13203_v14 = vand.u32 4294901760, %v4538_v53 }
 0x7f8   :  { %v13206_v2 = vsub.f32 %v4538_v53, %v13203_v14  ;;  %v14631_v53 = vld [vmem:[#allocation19_spill] sm:$0xff] }
 0x7fa   :  { %v13209_v42 = vand.u32 4294901760, %v13206_v2 }
 0x7fc   :  { %v4648_v41 = vsub.f32 %v13206_v2, %v13209_v42 }
 0x7fe   :  { %v4649_v57 = vand.u32 4294901760, %v4648_v41  ;;  %v14637_v41 = vld [vmem:[#allocation40_spill] sm:$0xff] }
 0x800   :  { %8714 = vmatmul.mubr.f32.vlgmr.msra.gmra.mrb[10].mxu0 %v4649_v57  ;;  %8924 = vmatmul.mubr.f32.vlgmr.msra.gmra.mrb[42].mxu1 %v4649_v57  ;;  %v14636_v57 = vld [vmem:[#allocation34_spill] sm:$0xff] }
 0x801   :  { %10087 = vmatpush3.bf16.msra.mxu0 %v13035_v1  ;;  %10231 = vmatpush3.bf16.msra.mxu1 %v13044_v23  ;;  %v14614_v1 = vld [vmem:[#allocation46_spill] sm:$0xff]  ;;  %v14618_v23 = vpack.c.bf16 %v12907_v37, %v12903_v61 }
 0x802   :  { %10088 = vmatprep.subr.bf16.mxu0 %v14609_v63  ;;  %10232 = vmatprep.subr.bf16.mxu1 %v14609_v63 }
 0x803   :  { %8748 = vmatprep.mubr.msk.f32.mxu0 %vm10727_vm0, %v14613_v0  ;;  %8958 = vmatprep.mubr.msk.f32.mxu1 %vm10727_vm0, %v14613_v0 }
 0x805   :  { %10090 = vmatpush3.bf16.msra.mxu0 %v13051_v17  ;;  %10234 = vmatpush3.bf16.msra.mxu1 %v13058_v12  ;;  %v14617_v17 = vpack.c.bf16 %v12901_v24, %v12899_v49  ;;  %v14620_v12 = vpack.c.bf16 %v12921_v18, %v12914_v20 }
 0x806   :  { %10091 = vmatprep.subr.bf16.mxu0 %v14609_v63  ;;  %10235 = vmatprep.subr.bf16.mxu1 %v14609_v63 }
 0x809   :  { %10093 = vmatpush3.bf16.msra.mxu0 %v13075_v51  ;;  %10237 = vmatpush3.bf16.msra.mxu1 %v13085_v36  ;;  %v14619_v51 = vpack.c.bf16 %v12912_v48, %v12909_v38  ;;  %v14621_v36 = vpack.c.bf16 %v12925_v15, %v12923_v25 }
 0x80a   :  { %10094 = vmatprep.subr.bf16.mxu0 %v14609_v63  ;;  %10238 = vmatprep.subr.bf16.mxu1 %v14609_v63 }
 0x80d   :  { %10096 = vmatpush3.bf16.msra.mxu0 %v13089_v6  ;;  %10240 = vmatpush3.bf16.msra.mxu1 %v13105_v35  ;;  %v14622_v6 = vpack.c.bf16 %v12967_v31, %v12965_v30  ;;  %v14624_v35 = vpack.c.bf16 %v12976_v60, %v12974_v10 }
 0x80e   :  { %10097 = vmatprep.subr.bf16.mxu0 %v14609_v63  ;;  %10241 = vmatprep.subr.bf16.mxu1 %v14609_v63 }
 0x811   :  { %10099 = vmatpush3.bf16.msra.mxu0 %v13115_v40  ;;  %10243 = vmatpush3.bf16.msra.mxu1 %v13121_v22  ;;  %v14625_v40 = vpack.c.bf16 %v12980_v11, %v12978_v13  ;;  %v14627_v22 = vpack.c.bf16 %v12989_v50, %v12987_v34 }
 0x812   :  { %10100 = vmatprep.subr.bf16.mxu0 %v14609_v63  ;;  %10244 = vmatprep.subr.bf16.mxu1 %v14609_v63 }
 0x815   :  { %10102 = vmatpush3.bf16.msra.mxu0 %v13129_v43  ;;  %10246 = vmatpush3.bf16.msra.mxu1 %v14614_v1  ;;  %v14628_v43 = vpack.c.bf16 %v13001_v47, %v12999_v29  ;;  %v14642_v1 = vld [vmem:[#allocation27_spill] sm:$0xff] }
 0x816   :  { %10103 = vmatprep.subr.bf16.mxu0 %v14609_v63  ;;  %10247 = vmatprep.subr.bf16.mxu1 %v14609_v63 }
 0x819   :  { %10105 = vmatpush3.bf16.msra.mxu0 %v13156_v21  ;;  %10249 = vmatpush3.bf16.msra.mxu1 %v13161_v45  ;;  %v14615_v21 = vpack.c.bf16 %v12885_v26, %v12881_v56  ;;  %v14629_v45 = vpack.c.bf16 %v13007_v62, %v13005_v28 }
 0x81a   :  { %10106 = vmatprep.subr.bf16.mxu0 %v14609_v63  ;;  %10250 = vmatprep.subr.bf16.mxu1 %v14609_v63 }
 0x81d   :  { %10108 = vmatpush3.bf16.msra.mxu0 %v13166_v46  ;;  %10252 = vmatpush3.bf16.msra.mxu1 %v13168_v7  ;;  %v14616_v46 = vpack.c.bf16 %v12892_v58, %v12889_v16  ;;  %v14626_v7 = vpack.c.bf16 %v12985_v3, %v12983_v19 }
 0x81e   :  { %10109 = vmatprep.subr.bf16.mxu0 %v14609_v63  ;;  %10253 = vmatprep.subr.bf16.mxu1 %v14609_v63 }
 0x820   :  { %8749 = vmatmul.mubr.f32.vlgmr.msra.gmra.mrb[10].mxu0 %v13203_v14  ;;  %8959 = vmatmul.mubr.f32.vlgmr.msra.gmra.mrb[44].mxu1 %v13203_v14 }
 0x821   :  { %10111 = vmatpush3.bf16.msra.mxu0 %v10110_v8  ;;  %10255 = vmatpush3.bf16.msra.mxu1 %v14615_v21  ;;  %v14630_v8 = vld [vmem:[#allocation18_spill] sm:$0xff] }
 0x822   :  { %10112 = vmatprep.subr.bf16.mxu0 %v14609_v63  ;;  %10256 = vmatprep.subr.bf16.mxu1 %v14609_v63  ;;  %v14643_v21 = vld [vmem:[#allocation30_spill] sm:$0xff] }
 0x823   :  { %8783 = vmatprep.mubr.msk.f32.mxu0 %vm10727_vm0, %v14613_v0  ;;  %8993 = vmatprep.mubr.msk.f32.mxu1 %vm10727_vm0, %v14613_v0 }
 0x825   :  { %10114 = vmatpush3.bf16.msra.mxu0 %v14616_v46  ;;  %10258 = vmatpush3.bf16.msra.mxu1 %v14617_v17  ;;  %v14644_v46 = vld [vmem:[#allocation33_spill] sm:$0xff]  ;;  %v14645_v17 = vld [vmem:[#allocation39_spill] sm:$0xff] }
 0x826   :  { %10115 = vmatprep.subr.bf16.mxu0 %v14609_v63  ;;  %10259 = vmatprep.subr.bf16.mxu1 %v14609_v63 }
 0x829   :  { %10117 = vmatpush3.bf16.msra.mxu0 %v14618_v23  ;;  %10261 = vmatpush3.bf16.msra.mxu1 %v14619_v51  ;;  %v14646_v23 = vand.u32 4294901760, %v12877_v59  ;;  %v14647_v51 = vand.u32 4294901760, %v12879_v33  ;;  %v14650_v59 = vand.u32 4294901760, %v12889_v16  ;;  %v14651_v33 = vand.u32 4294901760, %v12892_v58 }
 0x82a   :  { %10118 = vmatprep.subr.bf16.mxu0 %v14609_v63  ;;  %10262 = vmatprep.subr.bf16.mxu1 %v14609_v63  ;;  %v14654_v16 = vand.u32 4294901760, %v12903_v61  ;;  %v14655_v58 = vand.u32 4294901760, %v12907_v37  ;;  %v14660_v61 = vand.u32 4294901760, %v12923_v25  ;;  %v14661_v37 = vand.u32 4294901760, %v12925_v15 }
 0x82b   :  { %v14666_v25 = vand.u32 4294901760, %v12974_v10  ;;  %v14667_v15 = vand.u32 4294901760, %v12976_v60  ;;  %v14672_v10 = vand.u32 4294901760, %v12987_v34  ;;  %v14673_v60 = vand.u32 4294901760, %v12989_v50 }
 0x82d   :  { %10120 = vmatpush3.bf16.msra.mxu0 %v14620_v12  ;;  %10264 = vmatpush3.bf16.msra.mxu1 %v14621_v36  ;;  %v10158_v12 = vpack.c.bf16 %v14647_v51, %v14646_v23  ;;  %v14648_v36 = vand.u32 4294901760, %v12881_v56  ;;  %v14652_v56 = vand.u32 4294901760, %v12899_v49  ;;  %v10164_v49 = vpack.c.bf16 %v14655_v58, %v14654_v16  ;;  %v13529_v16 = vld [vmem:[#allocation8 + $0x48] sm:$0xff]  ;;  %v13531_v58 = vld [vmem:[#allocation8 + $0x58] sm:$0xff] }
 0x82e   :  { %10121 = vmatprep.subr.bf16.mxu0 %v14609_v63  ;;  %10265 = vmatprep.subr.bf16.mxu1 %v14609_v63  ;;  %v10311_v23 = vpack.c.bf16 %v14661_v37, %v14660_v61 }
 0x831   :  { %10123 = vmatpush3.bf16.msra.mxu0 %v14622_v6  ;;  %10267 = vmatpush3.bf16.msra.mxu1 %v14623_v44  ;;  %v14649_v6 = vand.u32 4294901760, %v12885_v26  ;;  %v14653_v26 = vand.u32 4294901760, %v12901_v24  ;;  %v14656_v24 = vand.u32 4294901760, %v12909_v38  ;;  %v14662_v38 = vand.u32 4294901760, %v12965_v30 }
 0x832   :  { %10124 = vmatprep.subr.bf16.mxu0 %v14609_v63  ;;  %10268 = vmatprep.subr.bf16.mxu1 %v14609_v63  ;;  %v14668_v30 = vand.u32 4294901760, %v12978_v13  ;;  %v14675_v13 = vand.u32 4294901760, %v13001_v47  ;;  %v13484_v47 = vld [vmem:[#allocation8 + $0x18] sm:$0xff] }
 0x833   :  { %v10302_v44 = vpack.c.bf16 %v14649_v6, %v14648_v36  ;;  %v10173_v36 = vpack.c.bf16 %v14667_v15, %v14666_v25 }
 0x835   :  { %10126 = vmatpush3.bf16.msra.mxu0 %v14624_v35  ;;  %10270 = vmatpush3.bf16.msra.mxu1 %v14625_v40  ;;  %v10161_v35 = vpack.c.bf16 %v14651_v33, %v14650_v59  ;;  %v10305_v40 = vpack.c.bf16 %v14653_v26, %v14652_v56  ;;  %v10320_v59 = vpack.c.bf16 %v14673_v60, %v14672_v10  ;;  %v13592_v10 = vld [vmem:[#allocation8 + $0x90] sm:$0xff] }
 0x836   :  { %10127 = vmatprep.subr.bf16.mxu0 %v14609_v63  ;;  %10271 = vmatprep.subr.bf16.mxu1 %v14609_v63 }
 0x839   :  { %10129 = vmatpush3.bf16.msra.mxu0 %v14626_v7  ;;  %10273 = vmatpush3.bf16.msra.mxu1 %v14627_v22  ;;  %v14658_v22 = vand.u32 4294901760, %v12914_v20  ;;  %v14664_v20 = vand.u32 4294901760, %v12969_v9  ;;  %v14670_v9 = vand.u32 4294901760, %v12983_v19  ;;  %v14676_v19 = vand.u32 4294901760, %v13005_v28  ;;  %v5888_v28 = vld [vmem:[#allocation8] sm:$0xff] }
 0x83a   :  { %10130 = vmatprep.subr.bf16.mxu0 %v14609_v63  ;;  %10274 = vmatprep.subr.bf16.mxu1 %v14609_v63 }
 0x83d   :  { %10132 = vmatpush3.bf16.msra.mxu0 %v14628_v43  ;;  %10276 = vmatpush3.bf16.msra.mxu1 %v14629_v45  ;;  %v14659_v43 = vand.u32 4294901760, %v12921_v18  ;;  %v14665_v18 = vand.u32 4294901760, %v12971_v32  ;;  %v14671_v32 = vand.u32 4294901760, %v12985_v3  ;;  %v14677_v3 = vand.u32 4294901760, %v13007_v62 }
 0x83e   :  { %10133 = vmatprep.subr.bf16.mxu0 %v14609_v63  ;;  %10277 = vmatprep.subr.bf16.mxu1 %v14609_v63 }
 0x83f   :  { %v10167_v45 = vpack.c.bf16 %v14659_v43, %v14658_v22  ;;  %v13538_v22 = vld [vmem:[#allocation8 + $0x40] sm:$0xff]  ;;  %v13540_v43 = vld [vmem:[#allocation8 + $0x50] sm:$0xff] }
 0x840   :  { %8784 = vmatmul.mubr.f32.vlgmr.msra.gmra.mrb[10].mxu0 %v13206_v2  ;;  %8994 = vmatmul.mubr.f32.vlgmr.msra.gmra.mrb[46].mxu1 %v13206_v2  ;;  %v14635_v2 = vld [vmem:[#allocation23_spill] sm:$0xff]  ;;  %v14304_v61 = vand.u32 4294901760, %v13540_v43 }
 0x841   :  { %10135 = vmatpush3.bf16.msra.mxu0 %v14630_v8  ;;  %10279 = vmatpush3.bf16.msra.mxu1 %v14631_v53 }
 0x842   :  { %10136 = vmatprep.subr.bf16.mxu0 %v14609_v63  ;;  %10280 = vmatprep.subr.bf16.mxu1 %v14609_v63 }
 0x843   :  { %8818 = vmatprep.mubr.msk.f32.mxu0 %vm10727_vm0, %v14613_v0  ;;  %9028 = vmatprep.mubr.msk.f32.mxu1 %vm10727_vm0, %v14613_v0 }
 0x845   :  { %10138 = vmatpush3.bf16.msra.mxu0 %v14632_v27  ;;  %10282 = vmatpush3.bf16.msra.mxu1 %v14633_v55 }
 0x846   :  { %10139 = vmatprep.subr.bf16.mxu0 %v14609_v63  ;;  %10283 = vmatprep.subr.bf16.mxu1 %v14609_v63 }
 0x849   :  { %10141 = vmatpush3.bf16.msra.mxu0 %v14634_v39  ;;  %10285 = vmatpush3.bf16.msra.mxu1 %v14635_v2 }
 0x84a   :  { %10142 = vmatprep.subr.bf16.mxu0 %v14609_v63  ;;  %10286 = vmatprep.subr.bf16.mxu1 %v14609_v63 }
 0x84d   :  { %10144 = vmatpush3.bf16.msra.mxu0 %v14636_v57  ;;  %10288 = vmatpush3.bf16.msra.mxu1 %v14637_v41 }
 0x84e   :  { %10145 = vmatprep.subr.bf16.mxu0 %v14609_v63  ;;  %10289 = vmatprep.subr.bf16.mxu1 %v14609_v63 }
 0x851   :  { %10147 = vmatpush3.bf16.msra.mxu0 %v14638_v54  ;;  %10291 = vmatpush3.bf16.msra.mxu1 %v14639_v4 }
 0x852   :  { %10148 = vmatprep.subr.bf16.mxu0 %v14609_v63  ;;  %10292 = vmatprep.subr.bf16.mxu1 %v14609_v63 }
 0x855   :  { %10150 = vmatpush3.bf16.msra.mxu0 %v14640_v52  ;;  %10294 = vmatpush3.bf16.msra.mxu1 %v14641_v5 }
 0x856   :  { %10151 = vmatprep.subr.bf16.mxu0 %v14609_v63  ;;  %10295 = vmatprep.subr.bf16.mxu1 %v14609_v63 }
 0x859   :  { %10153 = vmatpush3.bf16.msra.mxu0 %v14642_v1  ;;  %10297 = vmatpush3.bf16.msra.mxu1 %v14643_v21 }
 0x85a   :  { %10154 = vmatprep.subr.bf16.mxu0 %v14609_v63  ;;  %10298 = vmatprep.subr.bf16.mxu1 %v14609_v63 }
 0x85d   :  { %10156 = vmatpush3.bf16.msra.mxu0 %v14644_v46  ;;  %10300 = vmatpush3.bf16.msra.mxu1 %v14645_v17 }
 0x85e   :  { %10157 = vmatprep.subr.bf16.mxu0 %v14609_v63  ;;  %10301 = vmatprep.subr.bf16.mxu1 %v14609_v63 }
 0x860   :  { %8819 = vmatmul.mubr.f32.vlgmr.msra.gmra.mrb[10].mxu0 %v13209_v42  ;;  %9029 = vmatmul.mubr.f32.vlgmr.msra.gmra.mrb[48].mxu1 %v13209_v42  ;;  %v14657_v42 = vand.u32 4294901760, %v12912_v48  ;;  %v14663_v48 = vand.u32 4294901760, %v12967_v31  ;;  %v14669_v31 = vand.u32 4294901760, %v12980_v11  ;;  %v14674_v11 = vand.u32 4294901760, %v12999_v29  ;;  %v13482_v29 = vld [vmem:[#allocation8 + $0x8] sm:$0xff] }
 0x861   :  { %10159 = vmatpush3.bf16.msra.mxu0 %v10158_v12  ;;  %10303 = vmatpush3.bf16.msra.mxu1 %v10302_v44  ;;  %v10314_v12 = vpack.c.bf16 %v14665_v18, %v14664_v20  ;;  %v10176_v44 = vpack.c.bf16 %v14671_v32, %v14670_v9  ;;  %v5920_v62 = vand.u32 4294901760, %v13482_v29  ;;  %v13564_v18 = vld [vmem:[#allocation8 + $0x60] sm:$0xff] }
 0x862   :  { %10160 = vmatprep.subr.bf16.mxu0 %v14609_v63  ;;  %10304 = vmatprep.subr.bf16.mxu1 %v14609_v63  ;;  %v10308_v7 = vpack.c.bf16 %v14657_v42, %v14656_v24  ;;  %v10170_v51 = vpack.c.bf16 %v14663_v48, %v14662_v38  ;;  %v10317_v6 = vpack.c.bf16 %v14669_v31, %v14668_v30  ;;  %v14307_v42 = vand.u32 4294901760, %v13529_v16  ;;  %v13557_v38 = vld [vmem:[#allocation8 + $0x68] sm:$0xff]  ;;  %v13559_v48 = vld [vmem:[#allocation8 + $0x78] sm:$0xff] }
 0x863   :  { %8853 = vmatprep.mubr.msk.f32.mxu0 %vm10727_vm0, %v14613_v0  ;;  %9063 = vmatprep.mubr.msk.f32.mxu1 %vm10727_vm0, %v14613_v0  ;;  %v10179_v33 = vpack.c.bf16 %v14675_v13, %v14674_v11  ;;  %v14302_v20 = vand.u32 4294901760, %v13559_v48  ;;  %v14301_v25 = vand.u32 4294901760, %v13564_v18  ;;  %v13583_v31 = vld [vmem:[#allocation8 + $0x88] sm:$0xff] }
 0x864   :  { %v14299_v9 = vand.u32 4294901760, %v13583_v31 }
 0x865   :  { %10162 = vmatpush3.bf16.msra.mxu0 %v10161_v35  ;;  %10306 = vmatpush3.bf16.msra.mxu1 %v10305_v40  ;;  %v10323_v35 = vpack.c.bf16 %v14677_v3, %v14676_v19  ;;  %v5911_v19 = vld [vmem:[#allocation8 + $0xb8] sm:$0xff] }
 0x866   :  { %10163 = vmatprep.subr.bf16.mxu0 %v14609_v63  ;;  %10307 = vmatprep.subr.bf16.mxu1 %v14609_v63 }
 0x869   :  { %10165 = vmatpush3.bf16.msra.mxu0 %v10164_v49  ;;  %10309 = vmatpush3.bf16.msra.mxu1 %v10308_v7  ;;  %v14306_v7 = vand.u32 4294901760, %v13531_v58 }
 0x86a   :  { %10166 = vmatprep.subr.bf16.mxu0 %v14609_v63  ;;  %10310 = vmatprep.subr.bf16.mxu1 %v14609_v63 }
 0x86b   :  { %v13549_v37 = vpack.c.bf16 %v14306_v7, %v14307_v42  ;;  %v5916_v7 = vld [vmem:[#allocation8 + $0xe0] sm:$0xff]  ;;  %v5918_v42 = vld [vmem:[#allocation8 + $0xf0] sm:$0xff] }
 0x86d   :  { %10168 = vmatpush3.bf16.msra.mxu0 %v10167_v45  ;;  %10312 = vmatpush3.bf16.msra.mxu1 %v10311_v23  ;;  %v14305_v45 = vand.u32 4294901760, %v13538_v22  ;;  %14682 = vst [vmem:[#allocation42_spill] sm:$0xff] %v13549_v37 }
 0x86e   :  { %10169 = vmatprep.subr.bf16.mxu0 %v14609_v63  ;;  %10313 = vmatprep.subr.bf16.mxu1 %v14609_v63 }
 0x86f   :  { %v13555_v23 = vpack.c.bf16 %v14304_v61, %v14305_v45 }
 0x871   :  { %10171 = vmatpush3.bf16.msra.mxu0 %v10170_v51  ;;  %10315 = vmatpush3.bf16.msra.mxu1 %v10314_v12  ;;  %14683 = vst [vmem:[#allocation43_spill] sm:$0xff] %v13555_v23  ;;  %v14303_v51 = vand.u32 4294901760, %v13557_v38  ;;  %v13566_v12 = vld [vmem:[#allocation8 + $0x70] sm:$0xff] }
 0x872   :  { %10172 = vmatprep.subr.bf16.mxu0 %v14609_v63  ;;  %10316 = vmatprep.subr.bf16.mxu1 %v14609_v63  ;;  %v14300_v15 = vand.u32 4294901760, %v13566_v12 }
 0x874   :  { %v13581_v30 = vpack.c.bf16 %v14300_v15, %v14301_v25  ;;  %v5912_v15 = vld [vmem:[#allocation8 + $0xc0] sm:$0xff]  ;;  %v5914_v25 = vld [vmem:[#allocation8 + $0xd0] sm:$0xff] }
 0x875   :  { %10174 = vmatpush3.bf16.msra.mxu0 %v10173_v36  ;;  %10318 = vmatpush3.bf16.msra.mxu1 %v10317_v6  ;;  %v13575_v36 = vpack.c.bf16 %v14302_v20, %v14303_v51  ;;  %v13585_v6 = vld [vmem:[#allocation8 + $0x98] sm:$0xff]  ;;  %v5970_v20 = vand.u32 4294901760, %v5912_v15  ;;  %v5974_v51 = vand.u32 4294901760, %v5914_v25 }
 0x876   :  { %10175 = vmatprep.subr.bf16.mxu0 %v14609_v63  ;;  %10319 = vmatprep.subr.bf16.mxu1 %v14609_v63  ;;  %14685 = vst [vmem:[#allocation44_spill] sm:$0xff] %v13581_v30  ;;  %v14298_v32 = vand.u32 4294901760, %v13585_v6 }
 0x877   :  { %14684 = vst [vmem:[#allocation37_spill] sm:$0xff] %v13575_v36  ;;  %v13625_v45 = vpack.c.bf16 %v5974_v51, %v5970_v20 }
 0x878   :  { %v13601_v11 = vpack.c.bf16 %v14298_v32, %v14299_v9 }
 0x879   :  { %10177 = vmatpush3.bf16.msra.mxu0 %v10176_v44  ;;  %10321 = vmatpush3.bf16.msra.mxu1 %v10320_v59  ;;  %v13590_v44 = vld [vmem:[#allocation8 + $0x80] sm:$0xff]  ;;  %v5958_v59 = vand.u32 4294901760, %v13592_v10  ;;  %14691 = vst [vmem:[#allocation38_spill] sm:$0xff] %v13625_v45 }
 0x87a   :  { %10178 = vmatprep.subr.bf16.mxu0 %v14609_v63  ;;  %10322 = vmatprep.subr.bf16.mxu1 %v14609_v63  ;;  %v5954_v60 = vand.u32 4294901760, %v13590_v44  ;;  %14686 = vst [vmem:[#allocation45_spill] sm:$0xff] %v13601_v11 }
 0x87c   :  { %v13603_v13 = vpack.c.bf16 %v5958_v59, %v5954_v60 }
 0x87d   :  { %10180 = vmatpush3.bf16.msra.mxu0 %v10179_v33  ;;  %10324 = vmatpush3.bf16.msra.mxu1 %v10323_v35  ;;  %v5909_v33 = vld [vmem:[#allocation8 + $0xa8] sm:$0xff]  ;;  %v5964_v35 = vand.u32 4294901760, %v5911_v19 }
 0x87e   :  { %10181 = vmatprep.subr.bf16.mxu0 %v14609_v63  ;;  %10325 = vmatprep.subr.bf16.mxu1 %v14609_v63  ;;  %14687 = vst [vmem:[#allocation48_spill] sm:$0xff] %v13603_v13  ;;  %v5960_v3 = vand.u32 4294901760, %v5909_v33 }
 0x880   :  { %8854 = vmatmul.mubr.f32.vlgmr.msra.gmra.mrb[10].mxu0 %v13203_v14  ;;  %9064 = vmatmul.mubr.f32.vlgmr.msra.gmra.mrb[50].mxu1 %v13203_v14 }
 0x881   :  { %10183 = vmatpush3.bf16.msra.mxu0 %v14630_v8  ;;  %10327 = vmatpush3.bf16.msra.mxu1 %v14631_v53  ;;  %v5890_v8 = vld [vmem:[#allocation8 + $0x10] sm:$0xff]  ;;  %v5922_v53 = vand.u32 4294901760, %v5888_v28 }
 0x882   :  { %10184 = vmatprep.subr.bf16.mxu0 %v14609_v63  ;;  %10328 = vmatprep.subr.bf16.mxu1 %v14609_v63 }
 0x883   :  { %8888 = vmatprep.mubr.msk.f32.mxu0 %vm10727_vm0, %v14613_v0  ;;  %9098 = vmatprep.mubr.msk.f32.mxu1 %vm10727_vm0, %v14613_v0 }
 0x885   :  { %10186 = vmatpush3.bf16.msra.mxu0 %v14632_v27  ;;  %10330 = vmatpush3.bf16.msra.mxu1 %v14633_v55  ;;  %v5926_v27 = vand.u32 4294901760, %v5890_v8  ;;  %v13494_v55 = vsub.f32 %v5888_v28, %v5922_v53 }
 0x886   :  { %10187 = vmatprep.subr.bf16.mxu0 %v14609_v63  ;;  %10331 = vmatprep.subr.bf16.mxu1 %v14609_v63 }
 0x889   :  { %10189 = vmatpush3.bf16.msra.mxu0 %v14634_v39  ;;  %10333 = vmatpush3.bf16.msra.mxu1 %v14635_v2  ;;  %v13496_v39 = vpack.c.bf16 %v5926_v27, %v5922_v53  ;;  %v13498_v2 = vsub.f32 %v5890_v8, %v5926_v27  ;;  %v13607_v53 = vpack.c.bf16 %v5964_v35, %v5960_v3 }
 0x88a   :  { %10190 = vmatprep.subr.bf16.mxu0 %v14609_v63  ;;  %10334 = vmatprep.subr.bf16.mxu1 %v14609_v63 }
 0x88b   :  { %14679 = vst [vmem:[#allocation49_spill] sm:$0xff] %v13496_v39  ;;  %14688 = vst [vmem:[#allocation28_spill] sm:$0xff] %v13607_v53 }
 0x88d   :  { %10192 = vmatpush3.bf16.msra.mxu0 %v14636_v57  ;;  %10336 = vmatpush3.bf16.msra.mxu1 %v14637_v41  ;;  %v6808_v57 = vld [vmem:[%s14063_s2 + $0x5] ss:$0 sm:$0xff]  ;;  %v13505_v41 = vld [vmem:[#allocation8 + $0x28] sm:$0xff] }
 0x88e   :  { %10193 = vmatprep.subr.bf16.mxu0 %v14609_v63  ;;  %10337 = vmatprep.subr.bf16.mxu1 %v14609_v63 }
 0x891   :  { %10195 = vmatpush3.bf16.msra.mxu0 %v14638_v54  ;;  %10339 = vmatpush3.bf16.msra.mxu1 %v14639_v4  ;;  %v13507_v54 = vld [vmem:[#allocation8 + $0x38] sm:$0xff]  ;;  %v14311_v4 = vand.u32 4294901760, %v13505_v41 }
 0x892   :  { %10196 = vmatprep.subr.bf16.mxu0 %v14609_v63  ;;  %10340 = vmatprep.subr.bf16.mxu1 %v14609_v63 }
 0x895   :  { %10198 = vmatpush3.bf16.msra.mxu0 %v14640_v52  ;;  %10342 = vmatpush3.bf16.msra.mxu1 %v14641_v5  ;;  %v14310_v52 = vand.u32 4294901760, %v13507_v54  ;;  %v13511_v5 = vld [vmem:[#allocation8 + $0x20] sm:$0xff] }
 0x896   :  { %10199 = vmatprep.subr.bf16.mxu0 %v14609_v63  ;;  %10343 = vmatprep.subr.bf16.mxu1 %v14609_v63 }
 0x897   :  { %v13521_v56 = vpack.c.bf16 %v14310_v52, %v14311_v4  ;;  %v5978_v52 = vand.u32 4294901760, %v5916_v7  ;;  %v5982_v4 = vand.u32 4294901760, %v5918_v42 }
 0x899   :  { %10201 = vmatpush3.bf16.msra.mxu0 %v14642_v1  ;;  %10345 = vmatpush3.bf16.msra.mxu1 %v14643_v21  ;;  %v13513_v1 = vld [vmem:[#allocation8 + $0x30] sm:$0xff]  ;;  %v14309_v21 = vand.u32 4294901760, %v13511_v5  ;;  %14680 = vst [vmem:[#allocation50_spill] sm:$0xff] %v13521_v56 }
 0x89a   :  { %10202 = vmatprep.subr.bf16.mxu0 %v14609_v63  ;;  %10346 = vmatprep.subr.bf16.mxu1 %v14609_v63  ;;  %v5924_v63 = vand.u32 4294901760, %v13484_v47 }
 0x89d   :  { %10204 = vmatpush3.bf16.msra.mxu0 %v14644_v46  ;;  %10348 = vmatpush3.bf16.msra.mxu1 %v14645_v17  ;;  %v14308_v46 = vand.u32 4294901760, %v13513_v1 }
 0x89f   :  { %v13527_v40 = vpack.c.bf16 %v14308_v46, %v14309_v21 }
 0x8a0   :  { %8889 = vmatmul.mubr.f32.vlgmr.msra.gmra.mrb[10].mxu0 %v13203_v14  ;;  %9099 = vmatmul.mubr.f32.vlgmr.msra.gmra.mrb[52].mxu1 %v13203_v14  ;;  %v13492_v14 = vpack.c.bf16 %v5924_v63, %v5920_v62 }
 0x8a1   :  { %6016 = vmatprep.mubr.f32.mxu0 %v14613_v0  ;;  %14681 = vst [vmem:[#allocation29_spill] sm:$0xff] %v13527_v40 }
 0x8a2   :  { %14678 = vst [vmem:[#allocation47_spill] sm:$0xff] %v13492_v14  ;;  %10350 = vmatprep.subr.bf16.mxu0 %v13492_v14 }
 0x8a3   :  { %10352 = vmatpush1.bf16.msra.mxu0 %v13496_v39 }
 0x8a4   :  { %10354 = vmatprep.subr.bf16.mxu0 %v13521_v56 }
 0x8a7   :  { %10356 = vmatpush1.bf16.msra.mxu0 %v13527_v40 }
 0x8a8   :  { %10358 = vmatprep.subr.bf16.mxu0 %v13549_v37 }
 0x8ab   :  { %10360 = vmatpush1.bf16.msra.mxu0 %v13555_v23 }
 0x8ac   :  { %10362 = vmatprep.subr.bf16.mxu0 %v13575_v36  ;;  %v14697_v36 = vand.u32 4294901760, %v13513_v1 }
 0x8af   :  { %10364 = vmatpush1.bf16.msra.mxu0 %v13581_v30 }
 0x8b0   :  { %10366 = vmatprep.subr.bf16.mxu0 %v13601_v11  ;;  %v14693_v11 = vand.u32 4294901760, %v13507_v54 }
 0x8b2   :  { %v13641_v30 = vsub.f32 %v13507_v54, %v14693_v11  ;;  %v14699_v11 = vand.u32 4294901760, %v13531_v58 }
 0x8b3   :  { %10368 = vmatpush1.bf16.msra.mxu0 %v13603_v13  ;;  %v14692_v13 = vand.u32 4294901760, %v13505_v41 }
 0x8b4   :  { %10370 = vmatprep.subr.bf16.mxu0 %v13607_v53  ;;  %v13666_v23 = vsub.f32 %v13531_v58, %v14699_v11 }
 0x8d3   :  { %v5317_v34 = vpop.f32.mrb[42].mxu1 }
 0x8d4   :  { %v8925_v50 = vpop.f32.mrb[43].mxu1  ;;  %v5318_v17 = vadd.f32 %v6808_v57, %v5317_v34  ;;  %v5908_v34 = vld [vmem:[#allocation8 + $0xa0] sm:$0xff]  ;;  %v5913_v57 = vld [vmem:[#allocation8 + $0xc8] sm:$0xff] }
 0x8d5   :  { %v5910_v50 = vld [vmem:[#allocation8 + $0xb0] sm:$0xff]  ;;  %v5962_v28 = vand.u32 4294901760, %v5908_v34  ;;  %v5968_v32 = vand.u32 4294901760, %v5913_v57 }
 0x8d6   :  { %v5966_v8 = vand.u32 4294901760, %v5910_v50 }
 0x8d8   :  { %v13609_v27 = vpack.c.bf16 %v5966_v8, %v5962_v28 }
 0x8da   :  { %14689 = vst [vmem:[#allocation31_spill] sm:$0xff] %v13609_v27  ;;  %10372 = vmatpush1.bf16.msra.mxu0 %v13609_v27  ;;  %v14696_v27 = vand.u32 4294901760, %v13511_v5 }
 0x8dc   :  { %v13651_v53 = vsub.f32 %v13511_v5, %v14696_v27  ;;  %v14701_v27 = vand.u32 4294901760, %v13540_v43 }
 0x8f3   :  { %v5468_v26 = vpop.f32.mrb[44].mxu1 }
 0x8f4   :  { %v13533_v49 = vadd.f32 %v5468_v26, %v5318_v17  ;;  %v8960_v24 = vpop.f32.mrb[45].mxu1  ;;  %v5915_v17 = vld [vmem:[#allocation8 + $0xd8] sm:$0xff]  ;;  %v13614_v26 = vsub.f32 %v13482_v29, %v5920_v62  ;;  %v5917_v29 = vld [vmem:[#allocation8 + $0xe8] sm:$0xff] }
 0x8f5   :  { %v13619_v24 = vsub.f32 %v13484_v47, %v5924_v63  ;;  %v5972_v9 = vand.u32 4294901760, %v5915_v17  ;;  %v5919_v62 = vld [vmem:[#allocation8 + $0xf8] sm:$0xff]  ;;  %v5976_v47 = vand.u32 4294901760, %v5917_v29 }
 0x8f6   :  { %v5980_v63 = vand.u32 4294901760, %v5919_v62  ;;  %v14695_v21 = vand.u32 4294901760, %v13614_v26 }
 0x8f7   :  { %v13623_v61 = vpack.c.bf16 %v5972_v9, %v5968_v32 }
 0x8f8   :  { %v13643_v46 = vpack.c.bf16 %v5980_v63, %v5976_v47 }
 0x8f9   :  { %14690 = vst [vmem:[#allocation32_spill] sm:$0xff] %v13623_v61  ;;  %10374 = vmatprep.subr.bf16.mxu0 %v13623_v61  ;;  %v13636_v61 = vsub.f32 %v13505_v41, %v14692_v13  ;;  %v13656_v41 = vsub.f32 %v13513_v1, %v14697_v36  ;;  %v14698_v13 = vand.u32 4294901760, %v13529_v16  ;;  %v13676_v1 = vsub.f32 %v13540_v43, %v14701_v27 }
 0x8fa   :  { %10376 = vmatpush1.bf16.msra.mxu0 %v13625_v45  ;;  %14694 = vst [vmem:[#allocation41_spill] sm:$0xff] %v13643_v46  ;;  %v6031_v45 = vsub.f32 %v13614_v26, %v14695_v21  ;;  %v14700_v21 = vand.u32 4294901760, %v13538_v22  ;;  %v14702_v36 = vand.u32 4294901760, %v13557_v38  ;;  %v14705_v43 = vand.u32 4294901760, %v13566_v12 }
 0x8fb   :  { %v13661_v54 = vsub.f32 %v13529_v16, %v14698_v13  ;;  %v14703_v13 = vand.u32 4294901760, %v13559_v48  ;;  %10378 = vmatprep.subr.bf16.mxu0 %v13643_v46  ;;  %v13721_v46 = vsub.f32 %v5910_v50, %v5966_v8 }
 0x8fc   :  { %v13671_v5 = vsub.f32 %v13538_v22, %v14700_v21  ;;  %v13681_v16 = vsub.f32 %v13557_v38, %v14702_v36  ;;  %v14704_v22 = vand.u32 4294901760, %v13564_v18  ;;  %v13697_v21 = vsub.f32 %v13566_v12, %v14705_v43 }
 0x8fd   :  { %v13686_v58 = vsub.f32 %v13559_v48, %v14703_v13  ;;  %v14707_v38 = vand.u32 4294901760, %v13583_v31  ;;  %v14709_v48 = vand.u32 4294901760, %v13585_v6  ;;  %v13710_v13 = vsub.f32 %v13590_v44, %v5954_v60  ;;  %14716 = vst [vmem:[#allocation22_spill] sm:$0xff] %v13721_v46 }
 0x8fe   :  { %v13692_v11 = vsub.f32 %v13564_v18, %v14704_v22  ;;  %14706 = vst [vmem:[#allocation15_spill] sm:$0xff] %v13697_v21  ;;  %v13713_v18 = vsub.f32 %v13592_v10, %v5958_v59  ;;  %v13715_v22 = vsub.f32 %v5909_v33, %v5960_v3  ;;  %v13717_v12 = vsub.f32 %v5911_v19, %v5964_v35 }
 0x8ff   :  { %v13702_v27 = vsub.f32 %v13583_v31, %v14707_v38  ;;  %v13707_v36 = vsub.f32 %v13585_v6, %v14709_v48  ;;  %14711 = vst [vmem:[#allocation46_spill] sm:$0xff] %v13710_v13  ;;  %v13719_v43 = vsub.f32 %v5908_v34, %v5962_v28  ;;  %v13723_v31 = vsub.f32 %v5913_v57, %v5968_v32 }
 0x900   :  { %14712 = vst [vmem:[#allocation18_spill] sm:$0xff] %v13713_v18  ;;  %14713 = vst [vmem:[#allocation19_spill] sm:$0xff] %v13715_v22  ;;  %v13725_v38 = vsub.f32 %v5915_v17, %v5972_v9  ;;  %v13727_v6 = vsub.f32 %v5912_v15, %v5970_v20  ;;  %v13729_v48 = vsub.f32 %v5914_v25, %v5974_v51  ;;  %v6032_v19 = vand.u32 4294901760, %v6031_v45 }
 0x901   :  { %14708 = vst [vmem:[#allocation16_spill] sm:$0xff] %v13702_v27  ;;  %14710 = vst [vmem:[#allocation36_spill] sm:$0xff] %v13707_v36  ;;  %v13731_v44 = vsub.f32 %v5917_v29, %v5976_v47  ;;  %v13733_v10 = vsub.f32 %v5919_v62, %v5980_v63  ;;  %v13735_v60 = vpack.c.bf16 %v5982_v4, %v5978_v52  ;;  %v14726_v32 = vand.u32 4294901760, %v13619_v24 }
 0x902   :  { %14714 = vst [vmem:[#allocation20_spill] sm:$0xff] %v13717_v12  ;;  %14715 = vst [vmem:[#allocation21_spill] sm:$0xff] %v13719_v43  ;;  %v13737_v59 = vsub.f32 %v5916_v7, %v5978_v52  ;;  %v13739_v33 = vsub.f32 %v5918_v42, %v5982_v4  ;;  %v14727_v20 = vand.u32 4294901760, %v13494_v55  ;;  %v14728_v25 = vand.u32 4294901760, %v13498_v2 }
 0x903   :  { %14717 = vst [vmem:[#allocation23_spill] sm:$0xff] %v13723_v31  ;;  %14718 = vst [vmem:[#allocation34_spill] sm:$0xff] %v13725_v38  ;;  %v6043_v9 = vsub.f32 %v13619_v24, %v14726_v32  ;;  %v14347_v3 = vand.u32 4294901760, %v13636_v61  ;;  %10380 = vmatpush1.bf16.msra.mxu0 %v13735_v60  ;;  %v14346_v4 = vand.u32 4294901760, %v13641_v30  ;;  %v14344_v52 = vand.u32 4294901760, %v13651_v53 }
 0x904   :  { %14719 = vst [vmem:[#allocation40_spill] sm:$0xff] %v13727_v6  ;;  %14720 = vst [vmem:[#allocation35_spill] sm:$0xff] %v13729_v48  ;;  %v6037_v51 = vsub.f32 %v13494_v55, %v14727_v20  ;;  %v6049_v15 = vsub.f32 %v13498_v2, %v14728_v25  ;;  %v14338_v42 = vand.u32 4294901760, %v13656_v41  ;;  %v14335_v7 = vand.u32 4294901760, %v13661_v54 }
 0x905   :  { %14721 = vst [vmem:[#allocation24_spill] sm:$0xff] %v13731_v44  ;;  %14722 = vst [vmem:[#allocation25_spill] sm:$0xff] %v13733_v10  ;;  %v6044_v50 = vand.u32 4294901760, %v6043_v9  ;;  %v6055_v57 = vsub.f32 %v13636_v61, %v14347_v3  ;;  %v6067_v17 = vsub.f32 %v13641_v30, %v14346_v4  ;;  %v6061_v29 = vsub.f32 %v13651_v53, %v14344_v52 }
 0x906   :  { %14723 = vst [vmem:[#allocation26_spill] sm:$0xff] %v13735_v60  ;;  %14724 = vst [vmem:[#allocation27_spill] sm:$0xff] %v13737_v59  ;;  %v6038_v28 = vand.u32 4294901760, %v6037_v51  ;;  %v6050_v8 = vand.u32 4294901760, %v6049_v15  ;;  %v6079_v63 = vsub.f32 %v13661_v54, %v14335_v7  ;;  %v14334_v32 = vand.u32 4294901760, %v13666_v23 }
 0x907   :  { %14725 = vst [vmem:[#allocation30_spill] sm:$0xff] %v13739_v33  ;;  %v10381_v62 = vpack.c.bf16 %v6044_v50, %v6032_v19  ;;  %v6056_v9 = vand.u32 4294901760, %v6055_v57  ;;  %v6068_v20 = vand.u32 4294901760, %v6067_v17  ;;  %v6062_v51 = vand.u32 4294901760, %v6061_v29 }
 0x908   :  { %v13771_v47 = vpack.c.bf16 %v6050_v8, %v6038_v28  ;;  %v6080_v15 = vand.u32 4294901760, %v6079_v63  ;;  %v14332_v19 = vand.u32 4294901760, %v13671_v5  ;;  %v14336_v8 = vand.u32 4294901760, %v13681_v16 }
 0x909   :  { %10382 = vmatprep.subr.bf16.mxu0 %v10381_v62  ;;  %v13782_v50 = vpack.c.bf16 %v6068_v20, %v6056_v9  ;;  %v14337_v57 = vand.u32 4294901760, %v13686_v58  ;;  %v14339_v62 = vand.u32 4294901760, %v13692_v11  ;;  %v14340_v20 = vand.u32 4294901760, %v13697_v21 }
 0x90a   :  { %v6085_v29 = vsub.f32 %v13671_v5, %v14332_v19  ;;  %v6103_v63 = vsub.f32 %v13681_v16, %v14336_v8 }
 0x90b   :  { %v6115_v9 = vsub.f32 %v13686_v58, %v14337_v57  ;;  %v6121_v8 = vsub.f32 %v13697_v21, %v14340_v20 }
 0x90d   :  { %v6116_v7 = vand.u32 4294901760, %v6115_v9  ;;  %v14345_v9 = vand.u32 4294901760, %v13713_v18 }
 0x913   :  { %v5572_v35 = vpop.f32.mrb[46].mxu1 }
 0x914   :  { %v13757_v45 = vadd.f32 %v5572_v35, %v13533_v49  ;;  %v8995_v34 = vpop.f32.mrb[47].mxu1  ;;  %v6073_v49 = vsub.f32 %v13656_v41, %v14338_v42  ;;  %v6091_v35 = vsub.f32 %v13666_v23, %v14334_v32  ;;  %v6104_v32 = vand.u32 4294901760, %v6103_v63 }
 0x915   :  { %v14333_v34 = vand.u32 4294901760, %v13676_v1 }
 0x916   :  { %v6074_v25 = vand.u32 4294901760, %v6073_v49  ;;  %v6092_v17 = vand.u32 4294901760, %v6091_v35  ;;  %v6086_v35 = vand.u32 4294901760, %v6085_v29  ;;  %v14343_v29 = vand.u32 4294901760, %v13710_v13 }
 0x917   :  { %v6097_v49 = vsub.f32 %v13676_v1, %v14333_v34  ;;  %v6109_v34 = vsub.f32 %v13692_v11, %v14339_v62  ;;  %v6122_v62 = vand.u32 4294901760, %v6121_v8  ;;  %v14355_v8 = vand.u32 4294901760, %v13721_v46 }
 0x918   :  { %v13784_v28 = vpack.c.bf16 %v6074_v25, %v6062_v51  ;;  %v14341_v51 = vand.u32 4294901760, %v13702_v27  ;;  %v13803_v25 = vpack.c.bf16 %v6092_v17, %v6080_v15  ;;  %v14342_v17 = vand.u32 4294901760, %v13707_v36 }
 0x919   :  { %v6098_v19 = vand.u32 4294901760, %v6097_v49  ;;  %v6110_v15 = vand.u32 4294901760, %v6109_v34  ;;  %v13818_v49 = vpack.c.bf16 %v6116_v7, %v6104_v32  ;;  %v14348_v34 = vand.u32 4294901760, %v13715_v22 }
 0x91a   :  { %v6127_v57 = vsub.f32 %v13702_v27, %v14341_v51  ;;  %v6139_v20 = vsub.f32 %v13707_v36, %v14342_v17  ;;  %v6145_v7 = vsub.f32 %v13713_v18, %v14345_v9  ;;  %v14352_v32 = vand.u32 4294901760, %v13719_v43 }
 0x91b   :  { %v13814_v42 = vpack.c.bf16 %v6098_v19, %v6086_v35  ;;  %v6133_v19 = vsub.f32 %v13710_v13, %v14343_v29  ;;  %v14351_v35 = vand.u32 4294901760, %v13717_v12  ;;  %v13829_v51 = vpack.c.bf16 %v6122_v62, %v6110_v15 }
 0x91c   :  { %v6128_v63 = vand.u32 4294901760, %v6127_v57  ;;  %v6140_v57 = vand.u32 4294901760, %v6139_v20  ;;  %v6151_v29 = vsub.f32 %v13715_v22, %v14348_v34  ;;  %v6146_v62 = vand.u32 4294901760, %v6145_v7 }
 0x91d   :  { %v6134_v17 = vand.u32 4294901760, %v6133_v19  ;;  %v6163_v52 = vsub.f32 %v13717_v12, %v14351_v35  ;;  %v6157_v15 = vsub.f32 %v13719_v43, %v14352_v32  ;;  %v6169_v9 = vsub.f32 %v13721_v46, %v14355_v8 }
 0x91e   :  { %v14359_v20 = vand.u32 4294901760, %v13723_v31  ;;  %v13849_v19 = vpack.c.bf16 %v6140_v57, %v6128_v63  ;;  %v6152_v4 = vand.u32 4294901760, %v6151_v29  ;;  %v14356_v34 = vand.u32 4294901760, %v13725_v38 }
 0x91f   :  { %v6164_v3 = vand.u32 4294901760, %v6163_v52  ;;  %v13852_v60 = vpack.c.bf16 %v6146_v62, %v6134_v17  ;;  %v6158_v35 = vand.u32 4294901760, %v6157_v15  ;;  %v6170_v7 = vand.u32 4294901760, %v6169_v9 }
 0x920   :  { %v6175_v32 = vsub.f32 %v13723_v31, %v14359_v20  ;;  %v6187_v8 = vsub.f32 %v13725_v38, %v14356_v34  ;;  %v14357_v63 = vand.u32 4294901760, %v13727_v6  ;;  %v14358_v52 = vand.u32 4294901760, %v13729_v48 }
 0x921   :  { %v13857_v37 = vpack.c.bf16 %v6164_v3, %v6152_v4  ;;  %v13864_v29 = vpack.c.bf16 %v6170_v7, %v6158_v35  ;;  %v14362_v57 = vand.u32 4294901760, %v13731_v44  ;;  %v14369_v9 = vand.u32 4294901760, %v13733_v10 }
 0x922   :  { %v6176_v17 = vand.u32 4294901760, %v6175_v32  ;;  %v6188_v62 = vand.u32 4294901760, %v6187_v8  ;;  %v6181_v3 = vsub.f32 %v13727_v6, %v14357_v63  ;;  %v6193_v4 = vsub.f32 %v13729_v48, %v14358_v52 }
 0x923   :  { %14729 = vst [vmem:[#allocation33_spill] sm:$0xff] %v13864_v29  ;;  %v14371_v15 = vand.u32 4294901760, %v13737_v59  ;;  %v6199_v35 = vsub.f32 %v13731_v44, %v14362_v57  ;;  %v6211_v32 = vsub.f32 %v13733_v10, %v14369_v9  ;;  %v14370_v8 = vand.u32 4294901760, %v13739_v33 }
 0x924   :  { %v13882_v7 = vpack.c.bf16 %v6188_v62, %v6176_v17  ;;  %v6182_v34 = vand.u32 4294901760, %v6181_v3  ;;  %v6194_v63 = vand.u32 4294901760, %v6193_v4  ;;  %v10413_v17 = vpack.c.bf16 %v13619_v24, %v13614_v26 }
 0x925   :  { %v6205_v52 = vsub.f32 %v13737_v59, %v14371_v15  ;;  %v6200_v20 = vand.u32 4294901760, %v6199_v35  ;;  %v6212_v40 = vand.u32 4294901760, %v6211_v32  ;;  %v6217_v57 = vsub.f32 %v13739_v33, %v14370_v8 }
 0x926   :  { %v10407_v56 = vpack.c.bf16 %v6194_v63, %v6182_v34  ;;  %v10415_v62 = vpack.c.bf16 %v13498_v2, %v13494_v55  ;;  %v10417_v3 = vpack.c.bf16 %v13641_v30, %v13636_v61  ;;  %v10419_v35 = vpack.c.bf16 %v13656_v41, %v13651_v53 }
 0x927   :  { %v6206_v39 = vand.u32 4294901760, %v6205_v52  ;;  %v10409_v14 = vpack.c.bf16 %v6212_v40, %v6200_v20  ;;  %v6218_v9 = vand.u32 4294901760, %v6217_v57  ;;  %v10421_v40 = vpack.c.bf16 %v13666_v23, %v13661_v54 }
 0x928   :  { %v10425_v20 = vpack.c.bf16 %v13686_v58, %v13681_v16  ;;  %v10427_v63 = vpack.c.bf16 %v13697_v21, %v13692_v11  ;;  %v10429_v52 = vpack.c.bf16 %v13707_v36, %v13702_v27  ;;  %v10431_v57 = vpack.c.bf16 %v13713_v18, %v13710_v13 }
 0x929   :  { %v10411_v29 = vpack.c.bf16 %v6218_v9, %v6206_v39  ;;  %v10423_v39 = vpack.c.bf16 %v13676_v1, %v13671_v5  ;;  %v10435_v9 = vpack.c.bf16 %v13721_v46, %v13719_v43  ;;  %v10441_v8 = vpack.c.bf16 %v13733_v10, %v13731_v44  ;;  %v14730_v10 = vld [vmem:[#allocation17_spill] sm:$0xff] }
 0x92a   :  { %v10443_v15 = vpack.c.bf16 %v13739_v33, %v13737_v59 }
 0x933   :  { %v5661_v4 = vpop.f32.mrb[48].mxu1 }
 0x934   :  { %v5662_v32 = vadd.f32 %v5661_v4, %v13757_v45  ;;  %v9030_v34 = vpop.f32.mrb[49].mxu1  ;;  %v10433_v45 = vpack.c.bf16 %v13717_v12, %v13715_v22  ;;  %v10437_v4 = vpack.c.bf16 %v13725_v38, %v13723_v31  ;;  %v6806_v12 = vld [vmem:[%s14063_s2 + $0x4] ss:$0 sm:$0xff] }
 0x935   :  { %v10439_v34 = vpack.c.bf16 %v13729_v48, %v13727_v6 }
 0x953   :  { %v5780_v36 = vpop.f32.mrb[50].mxu1 }
 0x954   :  { %v5781_v18 = vadd.f32 %v5780_v36, %v5662_v32  ;;  %v9065_v13 = vpop.f32.mrb[51].mxu1 }
 0x973   :  { %v5201_v46 = vpop.f32.mrb[10].mxu0  ;;  %v5867_v43 = vpop.f32.mrb[52].mxu1 }
 0x974   :  { %v10543_v22 = vadd.f32 %v6806_v12, %v5201_v46  ;;  %v5868_v38 = vadd.f32 %v5867_v43, %v5781_v18  ;;  %v8890_v31 = vpop.f32.mrb[11].mxu0  ;;  %v9100_v27 = vpop.f32.mrb[53].mxu1  ;;  %v14731_v46 = vld [vmem:[#allocation33_spill] sm:$0xff]  ;;  %v14737_v18 = vld [vmem:[#allocation43_spill] sm:$0xff]  ;;  %v14739_v12 = vld [vmem:[#allocation44_spill] sm:$0xff] }
 0x975   :  { %v14736_v27 = vld [vmem:[#allocation42_spill] sm:$0xff]  ;;  %v14740_v43 = vld [vmem:[#allocation45_spill] sm:$0xff]  ;;  %v14741_v31 = vld [vmem:[#allocation48_spill] sm:$0xff] }
 0x976   :  { %v5871_v48 = vmul.f32 1.442695, %v10543_v22  ;;  %v14738_v22 = vld [vmem:[#allocation37_spill] sm:$0xff] }
 0x978   :  { %10597 = vpow2.f32 %v5871_v48  ;;  %v14744_v48 = vld [vmem:[#allocation32_spill] sm:$0xff] }
 0x982   :  { %v10598_v6 = vpop.eup %10597 }
 0x983   :  { %v5873_v44 = vmul.f32 %v10598_v6, %v14730_v10  ;;  %v14743_v6 = vld [vmem:[#allocation31_spill] sm:$0xff]  ;;  %v14746_v10 = vld [vmem:[#allocation41_spill] sm:$0xff] }
 0x985   :  { %v5874_v21 = vadd.f32 %v5873_v44, %v5868_v38  ;;  %v14742_v38 = vld [vmem:[#allocation28_spill] sm:$0xff]  ;;  %v14745_v44 = vld [vmem:[#allocation38_spill] sm:$0xff] }
 0x987   :  { %v13927_v33 = vand.u32 4294901760, %v5874_v21 }
 0x989   :  { %v6018_v36 = vsub.f32 %v5874_v21, %v13927_v33  ;;  %v14735_v21 = vld [vmem:[#allocation29_spill] sm:$0xff] }
 0x98b   :  { %v6019_v13 = vand.u32 4294901760, %v6018_v36 }
 0x98d   :  { %v6020_v32 = vsub.f32 %v6018_v36, %v6019_v13 }
 0x98f   :  { %v6021_v59 = vand.u32 4294901760, %v6020_v32 }
 0x991   :  { %6022 = vmatmul.mubr.f32.vlgmr.msra.gmra.mrb[12].mxu0 %v6021_v59  ;;  %v14748_v59 = vand.u32 4294901760, %v13619_v24  ;;  %v14755_v24 = vand.u32 4294901760, %v13656_v41  ;;  %v14761_v41 = vand.u32 4294901760, %v13686_v58  ;;  %v14773_v58 = vld [vmem:[#allocation19_spill] sm:$0xff] }
 0x992   :  { %10384 = vmatpush1.bf16.msra.mxu0 %v13771_v47  ;;  %6252 = vmatprep.mubr.f32.mxu0 %v14613_v0  ;;  %v14749_v47 = vld [vmem:[#allocation26_spill] sm:$0xff] }
 0x993   :  { %10386 = vmatprep.subr.bf16.mxu0 %v13782_v50  ;;  %v14750_v50 = vand.u32 4294901760, %v13494_v55  ;;  %v14756_v55 = vand.u32 4294901760, %v13661_v54 }
 0x996   :  { %10388 = vmatpush1.bf16.msra.mxu0 %v13784_v28  ;;  %v14751_v28 = vand.u32 4294901760, %v13498_v2  ;;  %v14757_v2 = vand.u32 4294901760, %v13666_v23  ;;  %v14765_v23 = vld [vmem:[#allocation16_spill] sm:$0xff] }
 0x997   :  { %10390 = vmatprep.subr.bf16.mxu0 %v13803_v25  ;;  %v14752_v25 = vand.u32 4294901760, %v13636_v61  ;;  %v14758_v61 = vand.u32 4294901760, %v13671_v5 }
 0x99a   :  { %10392 = vmatpush1.bf16.msra.mxu0 %v13814_v42 }
 0x99b   :  { %10394 = vmatprep.subr.bf16.mxu0 %v13818_v49  ;;  %v14753_v49 = vand.u32 4294901760, %v13641_v30  ;;  %v14759_v30 = vand.u32 4294901760, %v13676_v1  ;;  %v14769_v1 = vld [vmem:[#allocation46_spill] sm:$0xff] }
 0x99e   :  { %10396 = vmatpush1.bf16.msra.mxu0 %v13829_v51  ;;  %v10479_v51 = vpack.c.bf16 %v14751_v28, %v14750_v50  ;;  %v14785_v28 = vld [vmem:[#allocation40_spill] sm:$0xff] }
 0x99f   :  { %10398 = vmatprep.subr.bf16.mxu0 %v13849_v19  ;;  %v10481_v19 = vpack.c.bf16 %v14753_v49, %v14752_v25  ;;  %v14787_v25 = vld [vmem:[#allocation35_spill] sm:$0xff] }
 0x9a0   :  { %v14788_v49 = vand.u32 4294901760, %v14787_v25 }
 0x9a2   :  { %10400 = vmatpush1.bf16.msra.mxu0 %v13852_v60  ;;  %v14747_v60 = vand.u32 4294901760, %v13614_v26  ;;  %v14754_v26 = vand.u32 4294901760, %v13651_v53  ;;  %v14760_v53 = vand.u32 4294901760, %v13681_v16 }
 0x9a3   :  { %10402 = vmatprep.subr.bf16.mxu0 %v13857_v37  ;;  %v14734_v37 = vld [vmem:[#allocation50_spill] sm:$0xff] }
 0x9a4   :  { %v10477_v42 = vpack.c.bf16 %v14748_v59, %v14747_v60  ;;  %v14783_v59 = vld [vmem:[#allocation34_spill] sm:$0xff] }
 0x9a6   :  { %10404 = vmatpush1.bf16.msra.mxu0 %v14731_v46  ;;  %v14781_v46 = vld [vmem:[#allocation23_spill] sm:$0xff] }
 0x9a7   :  { %10406 = vmatprep.subr.bf16.mxu0 %v13882_v7  ;;  %v10489_v7 = vpack.c.bf16 %v14761_v41, %v14760_v53  ;;  %v14782_v60 = vand.u32 4294901760, %v14781_v46 }
 0x9aa   :  { %10408 = vmatpush1.bf16.msra.mxu0 %v10407_v56  ;;  %v14733_v56 = vld [vmem:[#allocation49_spill] sm:$0xff] }
 0x9ab   :  { %10410 = vmatprep.subr.bf16.mxu0 %v10409_v14  ;;  %v14732_v14 = vld [vmem:[#allocation47_spill] sm:$0xff] }
 0x9ae   :  { %10412 = vmatpush1.bf16.msra.mxu0 %v10411_v29  ;;  %v10483_v29 = vpack.c.bf16 %v14755_v24, %v14754_v26  ;;  %v14789_v26 = vld [vmem:[#allocation24_spill] sm:$0xff] }
 0x9af   :  { %10414 = vmatprep.subr.bf16.mxu0 %v10413_v17  ;;  %v14762_v17 = vand.u32 4294901760, %v13692_v11  ;;  %v14790_v24 = vand.u32 4294901760, %v14789_v26 }
 0x9b1   :  { %6254 = vmatmul.mubr.f32.vlgmr.msra.gmra.mrb[12].mxu0 %v13927_v33 }
 0x9b2   :  { %10416 = vmatpush1.bf16.msra.mxu0 %v10415_v62  ;;  %6388 = vmatprep.mubr.f32.mxu0 %v14613_v0  ;;  %v14763_v62 = vld [vmem:[#allocation15_spill] sm:$0xff] }
 0x9b3   :  { %10418 = vmatprep.subr.bf16.mxu0 %v10417_v3  ;;  %v14764_v54 = vand.u32 4294901760, %v14763_v62 }
 0x9b5   :  { %v10491_v3 = vpack.c.bf16 %v14764_v54, %v14762_v17 }
 0x9b6   :  { %10420 = vmatpush1.bf16.msra.mxu0 %v10419_v35  ;;  %v14766_v35 = vand.u32 4294901760, %v14765_v23 }
 0x9b7   :  { %10422 = vmatprep.subr.bf16.mxu0 %v10421_v40  ;;  %v14767_v40 = vld [vmem:[#allocation36_spill] sm:$0xff] }
 0x9b8   :  { %v14768_v5 = vand.u32 4294901760, %v14767_v40 }
 0x9ba   :  { %10424 = vmatpush1.bf16.msra.mxu0 %v10423_v39  ;;  %v10493_v39 = vpack.c.bf16 %v14768_v5, %v14766_v35 }
 0x9bb   :  { %10426 = vmatprep.subr.bf16.mxu0 %v10425_v20  ;;  %v14770_v20 = vand.u32 4294901760, %v14769_v1 }
 0x9be   :  { %10428 = vmatpush1.bf16.msra.mxu0 %v10427_v63  ;;  %v14771_v63 = vld [vmem:[#allocation18_spill] sm:$0xff] }
 0x9bf   :  { %10430 = vmatprep.subr.bf16.mxu0 %v10429_v52  ;;  %v14772_v16 = vand.u32 4294901760, %v14771_v63 }
 0x9c1   :  { %v10495_v52 = vpack.c.bf16 %v14772_v16, %v14770_v20 }
 0x9c2   :  { %10432 = vmatpush1.bf16.msra.mxu0 %v10431_v57  ;;  %v14774_v57 = vand.u32 4294901760, %v14773_v58 }
 0x9c3   :  { %10434 = vmatprep.subr.bf16.mxu0 %v10433_v45  ;;  %v14775_v45 = vld [vmem:[#allocation20_spill] sm:$0xff] }
 0x9c4   :  { %v14776_v11 = vand.u32 4294901760, %v14775_v45 }
 0x9c6   :  { %10436 = vmatpush1.bf16.msra.mxu0 %v10435_v9  ;;  %v10497_v9 = vpack.c.bf16 %v14776_v11, %v14774_v57 }
 0x9c7   :  { %10438 = vmatprep.subr.bf16.mxu0 %v10437_v4  ;;  %v14777_v4 = vld [vmem:[#allocation21_spill] sm:$0xff] }
 0x9ca   :  { %10440 = vmatpush1.bf16.msra.mxu0 %v10439_v34  ;;  %v14778_v34 = vand.u32 4294901760, %v14777_v4 }
 0x9cb   :  { %10442 = vmatprep.subr.bf16.mxu0 %v10441_v8  ;;  %v10487_v8 = vpack.c.bf16 %v14759_v30, %v14758_v61  ;;  %v14795_v30 = vld [vmem:[#allocation30_spill] sm:$0xff] }
 0x9ce   :  { %10444 = vmatpush1.bf16.msra.mxu0 %v10443_v15  ;;  %v10485_v15 = vpack.c.bf16 %v14757_v2, %v14756_v55 }
 0x9cf   :  { %10446 = vmatprep.subr.bf16.mxu0 %v14732_v14 }
 0x9d1   :  { %6391 = vmatmul.mubr.f32.vlgmr.msra.gmra.mrb[12].mxu0 %v6018_v36  ;;  %v14779_v36 = vld [vmem:[#allocation22_spill] sm:$0xff] }
 0x9d2   :  { %10448 = vmatpush1.bf16.msra.mxu0 %v14733_v56  ;;  %6493 = vmatprep.mubr.f32.mxu0 %v14613_v0 }
 0x9d3   :  { %10450 = vmatprep.subr.bf16.mxu0 %v14734_v37 }
 0x9d6   :  { %10452 = vmatpush1.bf16.msra.mxu0 %v14735_v21 }
 0x9d7   :  { %10454 = vmatprep.subr.bf16.mxu0 %v14736_v27 }
 0x9da   :  { %10456 = vmatpush1.bf16.msra.mxu0 %v14737_v18 }
 0x9db   :  { %10458 = vmatprep.subr.bf16.mxu0 %v14738_v22 }
 0x9de   :  { %10460 = vmatpush1.bf16.msra.mxu0 %v14739_v12 }
 0x9df   :  { %10462 = vmatprep.subr.bf16.mxu0 %v14740_v43 }
 0x9e2   :  { %10464 = vmatpush1.bf16.msra.mxu0 %v14741_v31 }
 0x9e3   :  { %10466 = vmatprep.subr.bf16.mxu0 %v14742_v38 }
 0x9e6   :  { %10468 = vmatpush1.bf16.msra.mxu0 %v14743_v6 }
 0x9e7   :  { %10470 = vmatprep.subr.bf16.mxu0 %v14744_v48 }
 0x9ea   :  { %10472 = vmatpush1.bf16.msra.mxu0 %v14745_v44 }
 0x9eb   :  { %10474 = vmatprep.subr.bf16.mxu0 %v14746_v10 }
 0x9ee   :  { %10476 = vmatpush1.bf16.msra.mxu0 %v14749_v47 }
 0x9ef   :  { %10478 = vmatprep.subr.bf16.mxu0 %v10477_v42  ;;  %v14784_v42 = vand.u32 4294901760, %v14783_v59 }
 0x9f1   :  { %6497 = vmatmul.mubr.f32.vlgmr.msra.gmra.mrb[12].mxu0 %v6019_v13  ;;  %v14780_v13 = vand.u32 4294901760, %v14779_v36  ;;  %v10501_v50 = vpack.c.bf16 %v14784_v42, %v14782_v60 }
 0x9f2   :  { %10480 = vmatpush1.bf16.msra.mxu0 %v10479_v51  ;;  %6663 = vmatprep.mubr.f32.mxu0 %v14613_v0  ;;  %v14786_v51 = vand.u32 4294901760, %v14785_v28 }
 0x9f3   :  { %10482 = vmatprep.subr.bf16.mxu0 %v10481_v19  ;;  %v10499_v32 = vpack.c.bf16 %v14780_v13, %v14778_v34 }
 0x9f4   :  { %v10503_v19 = vpack.c.bf16 %v14788_v49, %v14786_v51 }
 0x9f6   :  { %10484 = vmatpush1.bf16.msra.mxu0 %v10483_v29  ;;  %v14791_v29 = vld [vmem:[#allocation25_spill] sm:$0xff] }
 0x9f7   :  { %10486 = vmatprep.subr.bf16.mxu0 %v10485_v15  ;;  %v14792_v55 = vand.u32 4294901760, %v14791_v29  ;;  %v14793_v15 = vld [vmem:[#allocation27_spill] sm:$0xff] }
 0x9f8   :  { %v14794_v61 = vand.u32 4294901760, %v14793_v15 }
 0x9f9   :  { %v10505_v2 = vpack.c.bf16 %v14792_v55, %v14790_v24 }
 0x9fa   :  { %10488 = vmatpush1.bf16.msra.mxu0 %v10487_v8  ;;  %v14796_v8 = vand.u32 4294901760, %v14795_v30 }
 0x9fb   :  { %10490 = vmatprep.subr.bf16.mxu0 %v10489_v7 }
 0x9fc   :  { %v10507_v53 = vpack.c.bf16 %v14796_v8, %v14794_v61 }
 0x9fe   :  { %10492 = vmatpush1.bf16.msra.mxu0 %v10491_v3 }
 0x9ff   :  { %10494 = vmatprep.subr.bf16.mxu0 %v10493_v39 }
 0xa02   :  { %10496 = vmatpush1.bf16.msra.mxu0 %v10495_v52 }
 0xa03   :  { %10498 = vmatprep.subr.bf16.mxu0 %v10497_v9 }
 0xa06   :  { %10500 = vmatpush1.bf16.msra.mxu0 %v10499_v32 }
 0xa07   :  { %10502 = vmatprep.subr.bf16.mxu0 %v10501_v50 }
 0xa0a   :  { %10504 = vmatpush1.bf16.msra.mxu0 %v10503_v19 }
 0xa0b   :  { %10506 = vmatprep.subr.bf16.mxu0 %v10505_v2 }
 0xa0e   :  { %10508 = vmatpush1.bf16.msra.mxu0 %v10507_v53 }
 0xa0f   :  { %10510 = vmatprep.subr.bf16.mxu0 %v14732_v14 }
 0xa11   :  { %6665 = vmatmul.mubr.f32.vlgmr.msra.gmra.mrb[12].mxu0 %v13927_v33 }
 0xa12   :  { %10512 = vmatpush1.bf16.msra.mxu0 %v14733_v56  ;;  %6767 = vmatprep.mubr.f32.mxu0 %v14613_v0  ;;  %v5877_v0 = vlaneseq }
 0xa13   :  { %10514 = vmatprep.subr.bf16.mxu0 %v14734_v37 }
 0xa14   :  { %v5878_v14 = vshrl.u32 %v5877_v0, 7 }
 0xa16   :  { %10516 = vmatpush1.bf16.msra.mxu0 %v14735_v21  ;;  %v5879_v56 = vsub.s32 0, %v5878_v14  ;;  %v5883_v37 = vsub.s32 1, %v5878_v14  ;;  %v5875_v21 = vld [vmem:[%s14066_s5] sm:$0x3] }
 0xa17   :  { %10518 = vmatprep.subr.bf16.mxu0 %v14736_v27 }
 0xa18   :  { %v5880_v27 = vrot.slane %v5875_v21, %v5879_v56 }
 0xa1a   :  { %10520 = vmatpush1.bf16.msra.mxu0 %v14737_v18  ;;  %v5884_v18 = vrot.slane %v5875_v21, %v5883_v37 }
 0xa1b   :  { %10522 = vmatprep.subr.bf16.mxu0 %v14738_v22 }
 0xa1c   :  { %v5885_v22 = vcombine.low %v5880_v27, %v5884_v18 }
 0xa1e   :  { %10524 = vmatpush1.bf16.msra.mxu0 %v14739_v12 }
 0xa1f   :  { %10526 = vmatprep.subr.bf16.mxu0 %v14740_v43  ;;  %v10599_v43 = vld [vmem:[#allocation2] sm:$0x77] }
 0xa22   :  { %10528 = vmatpush1.bf16.msra.mxu0 %v14741_v31  ;;  %v5887_v31 = vmul.f32 %v10599_v43, %v5885_v22 }
 0xa23   :  { %10530 = vmatprep.subr.bf16.mxu0 %v14742_v38 }
 0xa26   :  { %10532 = vmatpush1.bf16.msra.mxu0 %v14743_v6 }
 0xa27   :  { %10534 = vmatprep.subr.bf16.mxu0 %v14744_v48 }
 0xa2a   :  { %10536 = vmatpush1.bf16.msra.mxu0 %v14745_v44 }
 0xa2b   :  { %10538 = vmatprep.subr.bf16.mxu0 %v14746_v10 }
 0xa2e   :  { %10540 = vmatpush1.bf16.msra.mxu0 %v14749_v47 }
 0xa31   :  { %6769 = vmatmul.mubr.f32.vlgmr.msra.gmra.mrb[12].mxu0 %v13927_v33 }
 0xb04   :  { %v6770_v12 = vpop.f32.mrb[12].mxu0 }
 0xb05   :  { %v6772_v38 = vpop.f32.mrb[13].mxu0 }
 0xb06   :  { %v6777_v6 = vcombine.low %v6770_v12, %v6772_v38 }
 0xb08   :  { %v6779_v48 = vadd.f32 %v6777_v6, %v5887_v31 }
 0xb0a   :  { %6780 = vst [vmem:[#allocation10] sm:$0x77] %v6779_v48 }
 0xb0b   :  { %10699 = shalt.err (!%p10696_p8)
}
 0xb0c   :  { %s10700_s15 = scalar_lea.hbm %s14067_s6, 128 }
 0xb0d   :  { %p10701_p9 = scmp.ne.s32.totalorder %s14067_s6, %s10700_s15  ;;  %p10704_p10 = scmp.lt.u32.totalorder %s10700_s15, %s14067_s6 }
 0xb0f   :  { %p10706_p11 = pnand %p10704_p10, %p10701_p9 }
 0xb11   :  { %10709 = shalt.err (!%p10706_p11)
}
 0xb12   :  { %6790 = dma.vmem_to_hbm [thread:$0]  %s6788_s11, 128, %s14067_s6, [#allocation4]  }
 0xb13   :  { %10716 = dma.done.wait [#allocation4], 128  }
 0xb14   :  { %10717 = vsyncadd [#allocation4], 4294967168 }
 0xb15   :  { %6794 = vsyncpa [#allocation3], 1 }
 0xb16   :  { %6795 = vsyncpa [#allocation6], 1 }
 0xb17   :  { %6796 = vsyncpa [#allocation9], 1 }
 0xb18   :  { %6797 = vsyncpa [#allocation4], 1 }

</bundles_post_ra>
